<compile_context>
chip_gen: v5e
topology: v5e:2x2
jax: 0.10.0
libtpu: 0.0.40
codegen_flags: <defaults>
</compile_context>

<pallas_src>
import functools

import numpy as np

import jax
import jax.numpy as jnp
from jax import lax
from jax.experimental import pallas as pl
from jax.experimental.pallas import tpu as pltpu

EPS = 1e-5
CONV_CHANNELS = (4, 8)          # config['conv_channels']
NUM_CLASSES = 41
FC1_HIDDEN = 128
KSIZES = (3, 3, 5, 3, 3, 5)     # kernel sizes of conv1..conv6
STRIDES = (1, 1, 2, 1, 1, 2)    # strides of conv1..conv6

_VMEM = pl.BlockSpec(memory_space=pltpu.MemorySpace.VMEM)


# ---------------------------------------------------------------------------
# The single fused kernel
# ---------------------------------------------------------------------------
def _fused_forward_kernel(*refs, cfg):
    """Whole Method_CNN_ORL forward in one kernel (see module docstring)."""
    out_ref = refs[-1]
    it = iter(refs[:-1])
    x_ref = next(it)                      # (N*H0, W0) lane-dense input (C_in=1)

    f32 = jnp.float32
    n_batch = cfg["batch"]
    h0 = cfg["h0"]
    acts = [x_ref[n * h0:(n + 1) * h0, :] for n in range(n_batch)]

    # ---- conv1..conv6 : conv + bias -> ReLU -> BatchNorm2d ----------------
    for lc in cfg["conv"]:
        wsel_ref = next(it)               # (KH, Win*Ci, OW*Co) lane-folded weight
        bias_ref = next(it)               # (1, OW*Co)  pre-tiled bias
        gamma_ref = next(it)              # (1, Co)
        beta_ref = next(it)               # (1, Co)
        ssum_ref = next(it)               # (OW*Co, Co) per-channel sum matrix
        stile_ref = next(it)              # (Co, OW*Co) channel -> lane tiling
        rowsel_ref = next(it) if lc["stride"] != 1 else None   # (KH, OH, Hin)

        oh, kh = lc["oh"], lc["kh"]
        ys = []
        s1 = None
        s2 = None
        for n in range(n_batch):
            a = acts[n]
            acc = None
            for i in range(kh):
                if rowsel_ref is None:                       # stride 1: plain slice
                    xi = a[i:i + oh, :]                      # (OH, Win*Ci)
                else:                                        # stride 2: 0/1 row gather
                    xi = jnp.dot(rowsel_ref[i], a, preferred_element_type=f32)
                t = jnp.dot(xi, wsel_ref[i], preferred_element_type=f32)
                acc = t if acc is None else acc + t          # (OH, OW*Co)
            y = jnp.maximum(acc + bias_ref[...], 0.0)        # conv + bias, ReLU
            ps1 = jnp.sum(y, axis=0, keepdims=True)          # single-pass BN stats
            ps2 = jnp.sum(y * y, axis=0, keepdims=True)
            s1 = ps1 if s1 is None else s1 + ps1
            s2 = ps2 if s2 is None else s2 + ps2
            ys.append(y)

        # BatchNorm2d, training-mode batch statistics (biased variance).
        inv_m = 1.0 / float(n_batch * lc["oh"] * lc["ow"])
        ch_s1 = jnp.dot(s1, ssum_ref[...], preferred_element_type=f32)   # (1, Co)
        ch_s2 = jnp.dot(s2, ssum_ref[...], preferred_element_type=f32)
        mean = ch_s1 * inv_m
        var = ch_s2 * inv_m - mean * mean
        scale = gamma_ref[...] * lax.rsqrt(var + EPS)
        shift = beta_ref[...] - scale * mean
        scale_t = jnp.dot(scale, stile_ref[...], preferred_element_type=f32)
        shift_t = jnp.dot(shift, stile_ref[...], preferred_element_type=f32)
        acts = [scale_t * y + shift_t for y in ys]

    # ---- flatten (NHWC order baked into fc1 weight) + fc1 + ReLU + BN1d ---
    fc1w_ref = next(it)                    # (OH*OW*C, 128), rows in (oh, ow, c) order
    fc1b_ref = next(it)                    # (1, 128)
    fc1g_ref = next(it)                    # (1, 128)
    fc1beta_ref = next(it)                 # (1, 128)
    fc2w_ref = next(it)                    # (128, 41)
    fc2b_ref = next(it)                    # (1, 41)

    last = cfg["conv"][-1]
    lw = last["ow"] * last["co"]           # lane width of the last conv output
    hs = []
    s1 = None
    s2 = None
    for n in range(n_batch):
        y = acts[n]                        # (OH_last, lw)
        h = fc1b_ref[...]
        for r in range(last["oh"]):
            h = h + jnp.dot(y[r:r + 1, :], fc1w_ref[r * lw:(r + 1) * lw, :],
                            preferred_element_type=f32)
        h = jnp.maximum(h, 0.0)            # fc1 + bias, ReLU
        s1 = h if s1 is None else s1 + h
        s2 = h * h if s2 is None else s2 + h * h
        hs.append(h)

    inv_b = 1.0 / float(n_batch)
    mean = s1 * inv_b
    var = s2 * inv_b - mean * mean
    scale = fc1g_ref[...] * lax.rsqrt(var + EPS)
    shift = fc1beta_ref[...] - scale * mean

    # ---- fc2 + Softmax(dim=1) ---------------------------------------------
    for n in range(n_batch):
        h = scale * hs[n] + shift
        logits = jnp.dot(h, fc2w_ref[...], preferred_element_type=f32) + fc2b_ref[...]
        z = logits - jnp.max(logits, axis=1, keepdims=True)
        e = jnp.exp(z)
        denom = jnp.sum(e, axis=1, keepdims=True)
        p = e / denom                       # EXACT normalization (rows sum to 1)
        out_ref[n:n + 1, :] = p.astype(out_ref.dtype)


# ---------------------------------------------------------------------------
# Host-side (one-time) precomputation of shapes and matmul-layout weights
# ---------------------------------------------------------------------------
def conv_geometry(h0, w0):
    chans = (1,) + (CONV_CHANNELS[0],) * 3 + (CONV_CHANNELS[1],) * 3
    layers = []
    h, w = h0, w0
    for l in range(6):
        k, s = KSIZES[l], STRIDES[l]
        oh, ow = (h - k) // s + 1, (w - k) // s + 1
        layers.append(dict(kh=k, kw=k, stride=s, h_in=h, w_in=w, oh=oh, ow=ow,
                           ci=chans[l], co=chans[l + 1]))
        h, w = oh, ow
    return layers


def init_params(key, fc1_in):
    """Deterministic synthetic parameters in PyTorch layouts."""
    chans = (1,) + (CONV_CHANNELS[0],) * 3 + (CONV_CHANNELS[1],) * 3
    params = {}
    keys = jax.random.split(key, 32)
    ki = 0
    for l in range(6):
        ci, co, k = chans[l], chans[l + 1], KSIZES[l]
        fan_in = ci * k * k
        params[f"conv{l+1}_w"] = (jax.random.normal(keys[ki], (co, ci, k, k), jnp.float32)
                                  / np.sqrt(fan_in)); ki += 1
        params[f"conv{l+1}_b"] = jax.random.normal(keys[ki], (co,), jnp.float32) * 0.01; ki += 1
        params[f"bn{l+1}_g"] = jnp.ones((co,), jnp.float32)
        params[f"bn{l+1}_b"] = jnp.zeros((co,), jnp.float32)
    params["fc1_w"] = (jax.random.normal(keys[ki], (FC1_HIDDEN, fc1_in), jnp.float32)
                       / np.sqrt(fc1_in)); ki += 1
    params["fc1_b"] = jax.random.normal(keys[ki], (FC1_HIDDEN,), jnp.float32) * 0.01; ki += 1
    params["bn_fc1_g"] = jnp.ones((FC1_HIDDEN,), jnp.float32)
    params["bn_fc1_b"] = jnp.zeros((FC1_HIDDEN,), jnp.float32)
    params["fc2_w"] = (jax.random.normal(keys[ki], (NUM_CLASSES, FC1_HIDDEN), jnp.float32)
                       / np.sqrt(FC1_HIDDEN)); ki += 1
    params["fc2_b"] = jax.random.normal(keys[ki], (NUM_CLASSES,), jnp.float32) * 0.01
    return params


def build_kernel_inputs(params, geom, batch):
    """Precompute all structured / matmul-layout weights once, at init."""
    flat = []
    for l, g in enumerate(geom):
        kh, kw, s = g["kh"], g["kw"], g["stride"]
        ci, co = g["ci"], g["co"]
        win, hin, oh, ow = g["w_in"], g["h_in"], g["oh"], g["ow"]

        wt = np.asarray(params[f"conv{l+1}_w"], np.float32)      # (Co, Ci, KH, KW)
        # Lane-folded weight: Wsel[i][w*Ci+c, ow*Co+co] = wt[co,c,i,j], w = s*ow + j
        wsel = np.zeros((kh, win * ci, ow * co), np.float32)
        for i in range(kh):
            for owi in range(ow):
                for j in range(kw):
                    w = s * owi + j
                    wsel[i, w * ci:(w + 1) * ci, owi * co:(owi + 1) * co] = wt[:, :, i, j].T

        bias_t = np.tile(np.asarray(params[f"conv{l+1}_b"], np.float32), ow)[None, :]
        gamma = np.asarray(params[f"bn{l+1}_g"], np.float32)[None, :]
        beta = np.asarray(params[f"bn{l+1}_b"], np.float32)[None, :]
        ssum = np.tile(np.eye(co, dtype=np.float32), (ow, 1))    # (ow*co, co)
        stile = np.ascontiguousarray(ssum.T)                     # (co, ow*co)

        layer_inputs = [wsel, bias_t, gamma, beta, ssum, stile]
        if s != 1:
            rowsel = np.zeros((kh, oh, hin), np.float32)
            for i in range(kh):
                for o in range(oh):
                    rowsel[i, o, s * o + i] = 1.0
            layer_inputs.append(rowsel)
        flat.extend(layer_inputs)

    last = geom[-1]
    c6, oh6, ow6 = last["co"], last["oh"], last["ow"]
    fc1_in = c6 * oh6 * ow6
    # Permute fc1 columns once: PyTorch NCHW flatten (c,oh,ow) -> our (oh,ow,c).
    w1 = np.asarray(params["fc1_w"], np.float32)                 # (128, fc1_in)
    w1 = w1.reshape(FC1_HIDDEN, c6, oh6, ow6).transpose(0, 2, 3, 1)
    w1 = np.ascontiguousarray(w1.reshape(FC1_HIDDEN, fc1_in).T)  # (fc1_in, 128)
    flat.append(w1)
    flat.append(np.asarray(params["fc1_b"], np.float32)[None, :])
    flat.append(np.asarray(params["bn_fc1_g"], np.float32)[None, :])
    flat.append(np.asarray(params["bn_fc1_b"], np.float32)[None, :])
    flat.append(np.ascontiguousarray(np.asarray(params["fc2_w"], np.float32).T))  # (128, 41)
    flat.append(np.asarray(params["fc2_b"], np.float32)[None, :])
    flat = [jnp.asarray(a) for a in flat]

    cfg = {"batch": batch, "h0": geom[0]["h_in"],
           "conv": [dict(kh=g["kh"], stride=g["stride"], oh=g["oh"], ow=g["ow"],
                         co=g["co"]) for g in geom]}
    return flat, cfg


def make_forward(cfg, n_flat, batch, h0, w0):
    kernel = functools.partial(_fused_forward_kernel, cfg=cfg)
    call = pl.pallas_call(
        kernel,
        out_shape=jax.ShapeDtypeStruct((batch, NUM_CLASSES), jnp.float32),
        in_specs=[_VMEM] * (1 + n_flat),
        out_specs=_VMEM,
    )

    @jax.jit
    def forward(x_nchw, flat_params):
        # (N, 1, H, W) -> lane-dense (N*H, W*C_in) with C_in = 1.
        x2d = x_nchw.reshape(batch * h0, w0)
        return call(x2d, *flat_params)

    return forward


# ---------------------------------------------------------------------------
# Pure-JAX reference (mirrors the PyTorch forward) for validation
# ---------------------------------------------------------------------------
def reference_forward(params, x):
    hp = lax.Precision.HIGHEST
    h = x
    for l in range(6):
        w = params[f"conv{l+1}_w"]
        b = params[f"conv{l+1}_b"]
        s = STRIDES[l]
        h = lax.conv_general_dilated(h, w, (s, s), "VALID",
                                     dimension_numbers=("NCHW", "OIHW", "NCHW"),
                                     precision=hp)
        h = jnp.maximum(h + b[None, :, None, None], 0.0)
        mean = jnp.mean(h, axis=(0, 2, 3), keepdims=True)
        var = jnp.mean((h - mean) ** 2, axis=(0, 2, 3), keepdims=True)
        h = (params[f"bn{l+1}_g"][None, :, None, None] * (h - mean)
             * lax.rsqrt(var + EPS) + params[f"bn{l+1}_b"][None, :, None, None])
    h = h.reshape(h.shape[0], -1)                                  # NCHW flatten
    h = jnp.dot(h, params["fc1_w"].T, precision=hp) + params["fc1_b"]
    h = jnp.maximum(h, 0.0)
    mean = jnp.mean(h, axis=0, keepdims=True)
    var = jnp.mean((h - mean) ** 2, axis=0, keepdims=True)
    h = params["bn_fc1_g"] * (h - mean) * lax.rsqrt(var + EPS) + params["bn_fc1_b"]
    h = jnp.dot(h, params["fc2_w"].T, precision=hp) + params["fc2_b"]
    return jax.nn.softmax(h, axis=1)


if __name__ == "__main__":
    key = jax.random.PRNGKey(0)
    k_x, k_p = jax.random.split(key)

    batch, h0, w0 = 2, 32, 32
    x = jax.random.normal(k_x, (batch, 1, h0, w0), jnp.float32)    # NCHW grayscale

    geom = conv_geometry(h0, w0)                                    # FC_1_SIZE = 8*2*2 = 32
    last = geom[-1]
    fc1_in = last["co"] * last["oh"] * last["ow"]
    params = init_params(k_p, fc1_in)

    flat, cfg = build_kernel_inputs(params, geom, batch)
    forward = make_forward(cfg, len(flat), batch, h0, w0)

    y = jax.block_until_ready(forward(x, flat))

    assert y.shape == (batch, NUM_CLASSES), y.shape
    # Softmax rows must sum to 1 (exact normalization in-kernel).
    row_sums = jnp.sum(y, axis=1)
    assert bool(jnp.all(jnp.abs(row_sums - 1.0) < 1e-4)), row_sums

    # Structural correctness vs. a HIGHEST-precision pure-JAX reference.  The
    # tolerance leaves headroom for MXU f32-contraction path differences; any
    # layout/BN/stride mistake would produce errors orders of magnitude larger.
    y_ref = jax.block_until_ready(reference_forward(params, x))
    max_err = float(jnp.max(jnp.abs(y - y_ref)))
    assert max_err < 5e-2, max_err

    print("KERNEL_OK")
</pallas_src>

<mosaic_0001>
module attributes {stable_mosaic.version = 11 : i64} {
  func.func @_fused_forward_kernel(%arg0: memref<64x32xf32, #tpu.memory_space<vmem>>, %arg1: memref<3x32x120xf32, #tpu.memory_space<vmem>>, %arg2: memref<1x120xf32, #tpu.memory_space<vmem>>, %arg3: memref<1x4xf32, #tpu.memory_space<vmem>>, %arg4: memref<1x4xf32, #tpu.memory_space<vmem>>, %arg5: memref<120x4xf32, #tpu.memory_space<vmem>>, %arg6: memref<4x120xf32, #tpu.memory_space<vmem>>, %arg7: memref<3x120x112xf32, #tpu.memory_space<vmem>>, %arg8: memref<1x112xf32, #tpu.memory_space<vmem>>, %arg9: memref<1x4xf32, #tpu.memory_space<vmem>>, %arg10: memref<1x4xf32, #tpu.memory_space<vmem>>, %arg11: memref<112x4xf32, #tpu.memory_space<vmem>>, %arg12: memref<4x112xf32, #tpu.memory_space<vmem>>, %arg13: memref<5x112x48xf32, #tpu.memory_space<vmem>>, %arg14: memref<1x48xf32, #tpu.memory_space<vmem>>, %arg15: memref<1x4xf32, #tpu.memory_space<vmem>>, %arg16: memref<1x4xf32, #tpu.memory_space<vmem>>, %arg17: memref<48x4xf32, #tpu.memory_space<vmem>>, %arg18: memref<4x48xf32, #tpu.memory_space<vmem>>, %arg19: memref<5x12x28xf32, #tpu.memory_space<vmem>>, %arg20: memref<3x48x80xf32, #tpu.memory_space<vmem>>, %arg21: memref<1x80xf32, #tpu.memory_space<vmem>>, %arg22: memref<1x8xf32, #tpu.memory_space<vmem>>, %arg23: memref<1x8xf32, #tpu.memory_space<vmem>>, %arg24: memref<80x8xf32, #tpu.memory_space<vmem>>, %arg25: memref<8x80xf32, #tpu.memory_space<vmem>>, %arg26: memref<3x80x64xf32, #tpu.memory_space<vmem>>, %arg27: memref<1x64xf32, #tpu.memory_space<vmem>>, %arg28: memref<1x8xf32, #tpu.memory_space<vmem>>, %arg29: memref<1x8xf32, #tpu.memory_space<vmem>>, %arg30: memref<64x8xf32, #tpu.memory_space<vmem>>, %arg31: memref<8x64xf32, #tpu.memory_space<vmem>>, %arg32: memref<5x64x16xf32, #tpu.memory_space<vmem>>, %arg33: memref<1x16xf32, #tpu.memory_space<vmem>>, %arg34: memref<1x8xf32, #tpu.memory_space<vmem>>, %arg35: memref<1x8xf32, #tpu.memory_space<vmem>>, %arg36: memref<16x8xf32, #tpu.memory_space<vmem>>, %arg37: memref<8x16xf32, #tpu.memory_space<vmem>>, %arg38: memref<5x2x8xf32, #tpu.memory_space<vmem>>, %arg39: memref<32x128xf32, #tpu.memory_space<vmem>>, %arg40: memref<1x128xf32, #tpu.memory_space<vmem>>, %arg41: memref<1x128xf32, #tpu.memory_space<vmem>>, %arg42: memref<1x128xf32, #tpu.memory_space<vmem>>, %arg43: memref<128x41xf32, #tpu.memory_space<vmem>>, %arg44: memref<1x41xf32, #tpu.memory_space<vmem>>, %arg45: memref<2x41xf32, #tpu.memory_space<vmem>>) attributes {dimension_semantics = [], scalar_prefetch = 0 : i64, scratch_operands = 0 : i64, tpu.core_type = #tpu.core_type<tc>} {
    %c0 = arith.constant 0 : index
    %c0_0 = arith.constant 0 : index
    %0 = vector.load %arg0[%c0, %c0_0] : memref<64x32xf32, #tpu.memory_space<vmem>>, vector<32x32xf32>
    %c32 = arith.constant 32 : index
    %c0_1 = arith.constant 0 : index
    %1 = vector.load %arg0[%c32, %c0_1] : memref<64x32xf32, #tpu.memory_space<vmem>>, vector<32x32xf32>
    %2 = vector.extract_strided_slice %0 {offsets = [0, 0], sizes = [30, 32], strides = [1, 1]} : vector<32x32xf32> to vector<30x32xf32>
    %c0_2 = arith.constant 0 : index
    %c0_3 = arith.constant 0 : index
    %c0_4 = arith.constant 0 : index
    %3 = vector.load %arg1[%c0_2, %c0_3, %c0_4] : memref<3x32x120xf32, #tpu.memory_space<vmem>>, vector<1x32x120xf32>
    %4 = vector.shape_cast %3 : vector<1x32x120xf32> to vector<32x120xf32>
    %cst = arith.constant dense<0.000000e+00> : vector<30x120xf32>
    %5 = tpu.matmul %2, %4, %cst {dimension_numbers = #tpu.dot_dimension_numbers<[1], [0], [0], [1], [0, 0, 1, 1], [], []>} : vector<30x32xf32>, vector<32x120xf32>, vector<30x120xf32> -> vector<30x120xf32>
    %6 = vector.extract_strided_slice %0 {offsets = [1, 0], sizes = [30, 32], strides = [1, 1]} : vector<32x32xf32> to vector<30x32xf32>
    %c1 = arith.constant 1 : index
    %c0_5 = arith.constant 0 : index
    %c0_6 = arith.constant 0 : index
    %7 = vector.load %arg1[%c1, %c0_5, %c0_6] : memref<3x32x120xf32, #tpu.memory_space<vmem>>, vector<1x32x120xf32>
    %8 = vector.shape_cast %7 : vector<1x32x120xf32> to vector<32x120xf32>
    %cst_7 = arith.constant dense<0.000000e+00> : vector<30x120xf32>
    %9 = tpu.matmul %6, %8, %cst_7 {dimension_numbers = #tpu.dot_dimension_numbers<[1], [0], [0], [1], [0, 0, 1, 1], [], []>} : vector<30x32xf32>, vector<32x120xf32>, vector<30x120xf32> -> vector<30x120xf32>
    %10 = arith.addf %5, %9 : vector<30x120xf32>
    %11 = vector.extract_strided_slice %0 {offsets = [2, 0], sizes = [30, 32], strides = [1, 1]} : vector<32x32xf32> to vector<30x32xf32>
    %c2 = arith.constant 2 : index
    %c0_8 = arith.constant 0 : index
    %c0_9 = arith.constant 0 : index
    %12 = vector.load %arg1[%c2, %c0_8, %c0_9] : memref<3x32x120xf32, #tpu.memory_space<vmem>>, vector<1x32x120xf32>
    %13 = vector.shape_cast %12 : vector<1x32x120xf32> to vector<32x120xf32>
    %cst_10 = arith.constant dense<0.000000e+00> : vector<30x120xf32>
    %14 = tpu.matmul %11, %13, %cst_10 {dimension_numbers = #tpu.dot_dimension_numbers<[1], [0], [0], [1], [0, 0, 1, 1], [], []>} : vector<30x32xf32>, vector<32x120xf32>, vector<30x120xf32> -> vector<30x120xf32>
    %15 = arith.addf %10, %14 : vector<30x120xf32>
    %c0_11 = arith.constant 0 : index
    %c0_12 = arith.constant 0 : index
    %16 = vector.load %arg2[%c0_11, %c0_12] : memref<1x120xf32, #tpu.memory_space<vmem>>, vector<1x120xf32>
    %17 = vector.broadcast %16 : vector<1x120xf32> to vector<30x120xf32>
    %18 = arith.addf %15, %17 : vector<30x120xf32>
    %cst_13 = arith.constant 0.000000e+00 : f32
    %19 = vector.broadcast %cst_13 : f32 to vector<30x120xf32>
    %20 = arith.maximumf %18, %19 : vector<30x120xf32>
    %cst_14 = arith.constant dense<0.000000e+00> : vector<120xf32>
    %21 = vector.multi_reduction <add>, %20, %cst_14 [0] : vector<30x120xf32> to vector<120xf32>
    %22 = vector.shape_cast %21 : vector<120xf32> to vector<1x120xf32>
    %23 = arith.mulf %20, %20 : vector<30x120xf32>
    %cst_15 = arith.constant dense<0.000000e+00> : vector<120xf32>
    %24 = vector.multi_reduction <add>, %23, %cst_15 [0] : vector<30x120xf32> to vector<120xf32>
    %25 = vector.shape_cast %24 : vector<120xf32> to vector<1x120xf32>
    %26 = vector.extract_strided_slice %1 {offsets = [0, 0], sizes = [30, 32], strides = [1, 1]} : vector<32x32xf32> to vector<30x32xf32>
    %c0_16 = arith.constant 0 : index
    %c0_17 = arith.constant 0 : index
    %c0_18 = arith.constant 0 : index
    %27 = vector.load %arg1[%c0_16, %c0_17, %c0_18] : memref<3x32x120xf32, #tpu.memory_space<vmem>>, vector<1x32x120xf32>
    %28 = vector.shape_cast %27 : vector<1x32x120xf32> to vector<32x120xf32>
    %cst_19 = arith.constant dense<0.000000e+00> : vector<30x120xf32>
    %29 = tpu.matmul %26, %28, %cst_19 {dimension_numbers = #tpu.dot_dimension_numbers<[1], [0], [0], [1], [0, 0, 1, 1], [], []>} : vector<30x32xf32>, vector<32x120xf32>, vector<30x120xf32> -> vector<30x120xf32>
    %30 = vector.extract_strided_slice %1 {offsets = [1, 0], sizes = [30, 32], strides = [1, 1]} : vector<32x32xf32> to vector<30x32xf32>
    %c1_20 = arith.constant 1 : index
    %c0_21 = arith.constant 0 : index
    %c0_22 = arith.constant 0 : index
    %31 = vector.load %arg1[%c1_20, %c0_21, %c0_22] : memref<3x32x120xf32, #tpu.memory_space<vmem>>, vector<1x32x120xf32>
    %32 = vector.shape_cast %31 : vector<1x32x120xf32> to vector<32x120xf32>
    %cst_23 = arith.constant dense<0.000000e+00> : vector<30x120xf32>
    %33 = tpu.matmul %30, %32, %cst_23 {dimension_numbers = #tpu.dot_dimension_numbers<[1], [0], [0], [1], [0, 0, 1, 1], [], []>} : vector<30x32xf32>, vector<32x120xf32>, vector<30x120xf32> -> vector<30x120xf32>
    %34 = arith.addf %29, %33 : vector<30x120xf32>
    %35 = vector.extract_strided_slice %1 {offsets = [2, 0], sizes = [30, 32], strides = [1, 1]} : vector<32x32xf32> to vector<30x32xf32>
    %c2_24 = arith.constant 2 : index
    %c0_25 = arith.constant 0 : index
    %c0_26 = arith.constant 0 : index
    %36 = vector.load %arg1[%c2_24, %c0_25, %c0_26] : memref<3x32x120xf32, #tpu.memory_space<vmem>>, vector<1x32x120xf32>
    %37 = vector.shape_cast %36 : vector<1x32x120xf32> to vector<32x120xf32>
    %cst_27 = arith.constant dense<0.000000e+00> : vector<30x120xf32>
    %38 = tpu.matmul %35, %37, %cst_27 {dimension_numbers = #tpu.dot_dimension_numbers<[1], [0], [0], [1], [0, 0, 1, 1], [], []>} : vector<30x32xf32>, vector<32x120xf32>, vector<30x120xf32> -> vector<30x120xf32>
    %39 = arith.addf %34, %38 : vector<30x120xf32>
    %c0_28 = arith.constant 0 : index
    %c0_29 = arith.constant 0 : index
    %40 = vector.load %arg2[%c0_28, %c0_29] : memref<1x120xf32, #tpu.memory_space<vmem>>, vector<1x120xf32>
    %41 = vector.broadcast %40 : vector<1x120xf32> to vector<30x120xf32>
    %42 = arith.addf %39, %41 : vector<30x120xf32>
    %cst_30 = arith.constant 0.000000e+00 : f32
    %43 = vector.broadcast %cst_30 : f32 to vector<30x120xf32>
    %44 = arith.maximumf %42, %43 : vector<30x120xf32>
    %cst_31 = arith.constant dense<0.000000e+00> : vector<120xf32>
    %45 = vector.multi_reduction <add>, %44, %cst_31 [0] : vector<30x120xf32> to vector<120xf32>
    %46 = vector.shape_cast %45 : vector<120xf32> to vector<1x120xf32>
    %47 = arith.mulf %44, %44 : vector<30x120xf32>
    %cst_32 = arith.constant dense<0.000000e+00> : vector<120xf32>
    %48 = vector.multi_reduction <add>, %47, %cst_32 [0] : vector<30x120xf32> to vector<120xf32>
    %49 = vector.shape_cast %48 : vector<120xf32> to vector<1x120xf32>
    %50 = arith.addf %22, %46 : vector<1x120xf32>
    %51 = arith.addf %25, %49 : vector<1x120xf32>
    %c0_33 = arith.constant 0 : index
    %c0_34 = arith.constant 0 : index
    %52 = vector.load %arg5[%c0_33, %c0_34] : memref<120x4xf32, #tpu.memory_space<vmem>>, vector<120x4xf32>
    %cst_35 = arith.constant dense<0.000000e+00> : vector<1x4xf32>
    %53 = tpu.matmul %50, %52, %cst_35 {dimension_numbers = #tpu.dot_dimension_numbers<[1], [0], [0], [1], [0, 0, 1, 1], [], []>} : vector<1x120xf32>, vector<120x4xf32>, vector<1x4xf32> -> vector<1x4xf32>
    %c0_36 = arith.constant 0 : index
    %c0_37 = arith.constant 0 : index
    %54 = vector.load %arg5[%c0_36, %c0_37] : memref<120x4xf32, #tpu.memory_space<vmem>>, vector<120x4xf32>
    %cst_38 = arith.constant dense<0.000000e+00> : vector<1x4xf32>
    %55 = tpu.matmul %51, %54, %cst_38 {dimension_numbers = #tpu.dot_dimension_numbers<[1], [0], [0], [1], [0, 0, 1, 1], [], []>} : vector<1x120xf32>, vector<120x4xf32>, vector<1x4xf32> -> vector<1x4xf32>
    %cst_39 = arith.constant 5.55555569E-4 : f32
    %56 = vector.broadcast %cst_39 : f32 to vector<1x4xf32>
    %57 = arith.mulf %53, %56 : vector<1x4xf32>
    %cst_40 = arith.constant 5.55555569E-4 : f32
    %58 = vector.broadcast %cst_40 : f32 to vector<1x4xf32>
    %59 = arith.mulf %55, %58 : vector<1x4xf32>
    %60 = arith.mulf %57, %57 : vector<1x4xf32>
    %61 = arith.subf %59, %60 : vector<1x4xf32>
    %c0_41 = arith.constant 0 : index
    %c0_42 = arith.constant 0 : index
    %62 = vector.load %arg3[%c0_41, %c0_42] : memref<1x4xf32, #tpu.memory_space<vmem>>, vector<1x4xf32>
    %cst_43 = arith.constant 9.99999974E-6 : f32
    %63 = vector.broadcast %cst_43 : f32 to vector<1x4xf32>
    %64 = arith.addf %61, %63 : vector<1x4xf32>
    %65 = math.rsqrt %64 : vector<1x4xf32>
    %66 = arith.mulf %62, %65 : vector<1x4xf32>
    %c0_44 = arith.constant 0 : index
    %c0_45 = arith.constant 0 : index
    %67 = vector.load %arg4[%c0_44, %c0_45] : memref<1x4xf32, #tpu.memory_space<vmem>>, vector<1x4xf32>
    %68 = arith.mulf %66, %57 : vector<1x4xf32>
    %69 = arith.subf %67, %68 : vector<1x4xf32>
    %c0_46 = arith.constant 0 : index
    %c0_47 = arith.constant 0 : index
    %70 = vector.load %arg6[%c0_46, %c0_47] : memref<4x120xf32, #tpu.memory_space<vmem>>, vector<4x120xf32>
    %cst_48 = arith.constant dense<0.000000e+00> : vector<1x120xf32>
    %71 = tpu.matmul %66, %70, %cst_48 {dimension_numbers = #tpu.dot_dimension_numbers<[1], [0], [0], [1], [0, 0, 1, 1], [], []>} : vector<1x4xf32>, vector<4x120xf32>, vector<1x120xf32> -> vector<1x120xf32>
    %c0_49 = arith.constant 0 : index
    %c0_50 = arith.constant 0 : index
    %72 = vector.load %arg6[%c0_49, %c0_50] : memref<4x120xf32, #tpu.memory_space<vmem>>, vector<4x120xf32>
    %cst_51 = arith.constant dense<0.000000e+00> : vector<1x120xf32>
    %73 = tpu.matmul %69, %72, %cst_51 {dimension_numbers = #tpu.dot_dimension_numbers<[1], [0], [0], [1], [0, 0, 1, 1], [], []>} : vector<1x4xf32>, vector<4x120xf32>, vector<1x120xf32> -> vector<1x120xf32>
    %74 = vector.broadcast %71 : vector<1x120xf32> to vector<30x120xf32>
    %75 = arith.mulf %74, %20 : vector<30x120xf32>
    %76 = vector.broadcast %73 : vector<1x120xf32> to vector<30x120xf32>
    %77 = arith.addf %75, %76 : vector<30x120xf32>
    %78 = vector.broadcast %71 : vector<1x120xf32> to vector<30x120xf32>
    %79 = arith.mulf %78, %44 : vector<30x120xf32>
    %80 = vector.broadcast %73 : vector<1x120xf32> to vector<30x120xf32>
    %81 = arith.addf %79, %80 : vector<30x120xf32>
    %82 = vector.extract_strided_slice %77 {offsets = [0, 0], sizes = [28, 120], strides = [1, 1]} : vector<30x120xf32> to vector<28x120xf32>
    %c0_52 = arith.constant 0 : index
    %c0_53 = arith.constant 0 : index
    %c0_54 = arith.constant 0 : index
    %83 = vector.load %arg7[%c0_52, %c0_53, %c0_54] : memref<3x120x112xf32, #tpu.memory_space<vmem>>, vector<1x120x112xf32>
    %84 = vector.shape_cast %83 : vector<1x120x112xf32> to vector<120x112xf32>
    %cst_55 = arith.constant dense<0.000000e+00> : vector<28x112xf32>
    %85 = tpu.matmul %82, %84, %cst_55 {dimension_numbers = #tpu.dot_dimension_numbers<[1], [0], [0], [1], [0, 0, 1, 1], [], []>} : vector<28x120xf32>, vector<120x112xf32>, vector<28x112xf32> -> vector<28x112xf32>
    %86 = vector.extract_strided_slice %77 {offsets = [1, 0], sizes = [28, 120], strides = [1, 1]} : vector<30x120xf32> to vector<28x120xf32>
    %c1_56 = arith.constant 1 : index
    %c0_57 = arith.constant 0 : index
    %c0_58 = arith.constant 0 : index
    %87 = vector.load %arg7[%c1_56, %c0_57, %c0_58] : memref<3x120x112xf32, #tpu.memory_space<vmem>>, vector<1x120x112xf32>
    %88 = vector.shape_cast %87 : vector<1x120x112xf32> to vector<120x112xf32>
    %cst_59 = arith.constant dense<0.000000e+00> : vector<28x112xf32>
    %89 = tpu.matmul %86, %88, %cst_59 {dimension_numbers = #tpu.dot_dimension_numbers<[1], [0], [0], [1], [0, 0, 1, 1], [], []>} : vector<28x120xf32>, vector<120x112xf32>, vector<28x112xf32> -> vector<28x112xf32>
    %90 = arith.addf %85, %89 : vector<28x112xf32>
    %91 = vector.extract_strided_slice %77 {offsets = [2, 0], sizes = [28, 120], strides = [1, 1]} : vector<30x120xf32> to vector<28x120xf32>
    %c2_60 = arith.constant 2 : index
    %c0_61 = arith.constant 0 : index
    %c0_62 = arith.constant 0 : index
    %92 = vector.load %arg7[%c2_60, %c0_61, %c0_62] : memref<3x120x112xf32, #tpu.memory_space<vmem>>, vector<1x120x112xf32>
    %93 = vector.shape_cast %92 : vector<1x120x112xf32> to vector<120x112xf32>
    %cst_63 = arith.constant dense<0.000000e+00> : vector<28x112xf32>
    %94 = tpu.matmul %91, %93, %cst_63 {dimension_numbers = #tpu.dot_dimension_numbers<[1], [0], [0], [1], [0, 0, 1, 1], [], []>} : vector<28x120xf32>, vector<120x112xf32>, vector<28x112xf32> -> vector<28x112xf32>
    %95 = arith.addf %90, %94 : vector<28x112xf32>
    %c0_64 = arith.constant 0 : index
    %c0_65 = arith.constant 0 : index
    %96 = vector.load %arg8[%c0_64, %c0_65] : memref<1x112xf32, #tpu.memory_space<vmem>>, vector<1x112xf32>
    %97 = vector.broadcast %96 : vector<1x112xf32> to vector<28x112xf32>
    %98 = arith.addf %95, %97 : vector<28x112xf32>
    %cst_66 = arith.constant 0.000000e+00 : f32
    %99 = vector.broadcast %cst_66 : f32 to vector<28x112xf32>
    %100 = arith.maximumf %98, %99 : vector<28x112xf32>
    %cst_67 = arith.constant dense<0.000000e+00> : vector<112xf32>
    %101 = vector.multi_reduction <add>, %100, %cst_67 [0] : vector<28x112xf32> to vector<112xf32>
    %102 = vector.shape_cast %101 : vector<112xf32> to vector<1x112xf32>
    %103 = arith.mulf %100, %100 : vector<28x112xf32>
    %cst_68 = arith.constant dense<0.000000e+00> : vector<112xf32>
    %104 = vector.multi_reduction <add>, %103, %cst_68 [0] : vector<28x112xf32> to vector<112xf32>
    %105 = vector.shape_cast %104 : vector<112xf32> to vector<1x112xf32>
    %106 = vector.extract_strided_slice %81 {offsets = [0, 0], sizes = [28, 120], strides = [1, 1]} : vector<30x120xf32> to vector<28x120xf32>
    %c0_69 = arith.constant 0 : index
    %c0_70 = arith.constant 0 : index
    %c0_71 = arith.constant 0 : index
    %107 = vector.load %arg7[%c0_69, %c0_70, %c0_71] : memref<3x120x112xf32, #tpu.memory_space<vmem>>, vector<1x120x112xf32>
    %108 = vector.shape_cast %107 : vector<1x120x112xf32> to vector<120x112xf32>
    %cst_72 = arith.constant dense<0.000000e+00> : vector<28x112xf32>
    %109 = tpu.matmul %106, %108, %cst_72 {dimension_numbers = #tpu.dot_dimension_numbers<[1], [0], [0], [1], [0, 0, 1, 1], [], []>} : vector<28x120xf32>, vector<120x112xf32>, vector<28x112xf32> -> vector<28x112xf32>
    %110 = vector.extract_strided_slice %81 {offsets = [1, 0], sizes = [28, 120], strides = [1, 1]} : vector<30x120xf32> to vector<28x120xf32>
    %c1_73 = arith.constant 1 : index
    %c0_74 = arith.constant 0 : index
    %c0_75 = arith.constant 0 : index
    %111 = vector.load %arg7[%c1_73, %c0_74, %c0_75] : memref<3x120x112xf32, #tpu.memory_space<vmem>>, vector<1x120x112xf32>
    %112 = vector.shape_cast %111 : vector<1x120x112xf32> to vector<120x112xf32>
    %cst_76 = arith.constant dense<0.000000e+00> : vector<28x112xf32>
    %113 = tpu.matmul %110, %112, %cst_76 {dimension_numbers = #tpu.dot_dimension_numbers<[1], [0], [0], [1], [0, 0, 1, 1], [], []>} : vector<28x120xf32>, vector<120x112xf32>, vector<28x112xf32> -> vector<28x112xf32>
    %114 = arith.addf %109, %113 : vector<28x112xf32>
    %115 = vector.extract_strided_slice %81 {offsets = [2, 0], sizes = [28, 120], strides = [1, 1]} : vector<30x120xf32> to vector<28x120xf32>
    %c2_77 = arith.constant 2 : index
    %c0_78 = arith.constant 0 : index
    %c0_79 = arith.constant 0 : index
    %116 = vector.load %arg7[%c2_77, %c0_78, %c0_79] : memref<3x120x112xf32, #tpu.memory_space<vmem>>, vector<1x120x112xf32>
    %117 = vector.shape_cast %116 : vector<1x120x112xf32> to vector<120x112xf32>
    %cst_80 = arith.constant dense<0.000000e+00> : vector<28x112xf32>
    %118 = tpu.matmul %115, %117, %cst_80 {dimension_numbers = #tpu.dot_dimension_numbers<[1], [0], [0], [1], [0, 0, 1, 1], [], []>} : vector<28x120xf32>, vector<120x112xf32>, vector<28x112xf32> -> vector<28x112xf32>
    %119 = arith.addf %114, %118 : vector<28x112xf32>
    %c0_81 = arith.constant 0 : index
    %c0_82 = arith.constant 0 : index
    %120 = vector.load %arg8[%c0_81, %c0_82] : memref<1x112xf32, #tpu.memory_space<vmem>>, vector<1x112xf32>
    %121 = vector.broadcast %120 : vector<1x112xf32> to vector<28x112xf32>
    %122 = arith.addf %119, %121 : vector<28x112xf32>
    %cst_83 = arith.constant 0.000000e+00 : f32
    %123 = vector.broadcast %cst_83 : f32 to vector<28x112xf32>
    %124 = arith.maximumf %122, %123 : vector<28x112xf32>
    %cst_84 = arith.constant dense<0.000000e+00> : vector<112xf32>
    %125 = vector.multi_reduction <add>, %124, %cst_84 [0] : vector<28x112xf32> to vector<112xf32>
    %126 = vector.shape_cast %125 : vector<112xf32> to vector<1x112xf32>
    %127 = arith.mulf %124, %124 : vector<28x112xf32>
    %cst_85 = arith.constant dense<0.000000e+00> : vector<112xf32>
    %128 = vector.multi_reduction <add>, %127, %cst_85 [0] : vector<28x112xf32> to vector<112xf32>
    %129 = vector.shape_cast %128 : vector<112xf32> to vector<1x112xf32>
    %130 = arith.addf %102, %126 : vector<1x112xf32>
    %131 = arith.addf %105, %129 : vector<1x112xf32>
    %c0_86 = arith.constant 0 : index
    %c0_87 = arith.constant 0 : index
    %132 = vector.load %arg11[%c0_86, %c0_87] : memref<112x4xf32, #tpu.memory_space<vmem>>, vector<112x4xf32>
    %cst_88 = arith.constant dense<0.000000e+00> : vector<1x4xf32>
    %133 = tpu.matmul %130, %132, %cst_88 {dimension_numbers = #tpu.dot_dimension_numbers<[1], [0], [0], [1], [0, 0, 1, 1], [], []>} : vector<1x112xf32>, vector<112x4xf32>, vector<1x4xf32> -> vector<1x4xf32>
    %c0_89 = arith.constant 0 : index
    %c0_90 = arith.constant 0 : index
    %134 = vector.load %arg11[%c0_89, %c0_90] : memref<112x4xf32, #tpu.memory_space<vmem>>, vector<112x4xf32>
    %cst_91 = arith.constant dense<0.000000e+00> : vector<1x4xf32>
    %135 = tpu.matmul %131, %134, %cst_91 {dimension_numbers = #tpu.dot_dimension_numbers<[1], [0], [0], [1], [0, 0, 1, 1], [], []>} : vector<1x112xf32>, vector<112x4xf32>, vector<1x4xf32> -> vector<1x4xf32>
    %cst_92 = arith.constant 6.37755089E-4 : f32
    %136 = vector.broadcast %cst_92 : f32 to vector<1x4xf32>
    %137 = arith.mulf %133, %136 : vector<1x4xf32>
    %cst_93 = arith.constant 6.37755089E-4 : f32
    %138 = vector.broadcast %cst_93 : f32 to vector<1x4xf32>
    %139 = arith.mulf %135, %138 : vector<1x4xf32>
    %140 = arith.mulf %137, %137 : vector<1x4xf32>
    %141 = arith.subf %139, %140 : vector<1x4xf32>
    %c0_94 = arith.constant 0 : index
    %c0_95 = arith.constant 0 : index
    %142 = vector.load %arg9[%c0_94, %c0_95] : memref<1x4xf32, #tpu.memory_space<vmem>>, vector<1x4xf32>
    %cst_96 = arith.constant 9.99999974E-6 : f32
    %143 = vector.broadcast %cst_96 : f32 to vector<1x4xf32>
    %144 = arith.addf %141, %143 : vector<1x4xf32>
    %145 = math.rsqrt %144 : vector<1x4xf32>
    %146 = arith.mulf %142, %145 : vector<1x4xf32>
    %c0_97 = arith.constant 0 : index
    %c0_98 = arith.constant 0 : index
    %147 = vector.load %arg10[%c0_97, %c0_98] : memref<1x4xf32, #tpu.memory_space<vmem>>, vector<1x4xf32>
    %148 = arith.mulf %146, %137 : vector<1x4xf32>
    %149 = arith.subf %147, %148 : vector<1x4xf32>
    %c0_99 = arith.constant 0 : index
    %c0_100 = arith.constant 0 : index
    %150 = vector.load %arg12[%c0_99, %c0_100] : memref<4x112xf32, #tpu.memory_space<vmem>>, vector<4x112xf32>
    %cst_101 = arith.constant dense<0.000000e+00> : vector<1x112xf32>
    %151 = tpu.matmul %146, %150, %cst_101 {dimension_numbers = #tpu.dot_dimension_numbers<[1], [0], [0], [1], [0, 0, 1, 1], [], []>} : vector<1x4xf32>, vector<4x112xf32>, vector<1x112xf32> -> vector<1x112xf32>
    %c0_102 = arith.constant 0 : index
    %c0_103 = arith.constant 0 : index
    %152 = vector.load %arg12[%c0_102, %c0_103] : memref<4x112xf32, #tpu.memory_space<vmem>>, vector<4x112xf32>
    %cst_104 = arith.constant dense<0.000000e+00> : vector<1x112xf32>
    %153 = tpu.matmul %149, %152, %cst_104 {dimension_numbers = #tpu.dot_dimension_numbers<[1], [0], [0], [1], [0, 0, 1, 1], [], []>} : vector<1x4xf32>, vector<4x112xf32>, vector<1x112xf32> -> vector<1x112xf32>
    %154 = vector.broadcast %151 : vector<1x112xf32> to vector<28x112xf32>
    %155 = arith.mulf %154, %100 : vector<28x112xf32>
    %156 = vector.broadcast %153 : vector<1x112xf32> to vector<28x112xf32>
    %157 = arith.addf %155, %156 : vector<28x112xf32>
    %158 = vector.broadcast %151 : vector<1x112xf32> to vector<28x112xf32>
    %159 = arith.mulf %158, %124 : vector<28x112xf32>
    %160 = vector.broadcast %153 : vector<1x112xf32> to vector<28x112xf32>
    %161 = arith.addf %159, %160 : vector<28x112xf32>
    %c0_105 = arith.constant 0 : index
    %c0_106 = arith.constant 0 : index
    %c0_107 = arith.constant 0 : index
    %162 = vector.load %arg19[%c0_105, %c0_106, %c0_107] : memref<5x12x28xf32, #tpu.memory_space<vmem>>, vector<1x12x28xf32>
    %163 = vector.shape_cast %162 : vector<1x12x28xf32> to vector<12x28xf32>
    %cst_108 = arith.constant dense<0.000000e+00> : vector<12x112xf32>
    %164 = tpu.matmul %163, %157, %cst_108 {dimension_numbers = #tpu.dot_dimension_numbers<[1], [0], [0], [1], [0, 0, 1, 1], [], []>} : vector<12x28xf32>, vector<28x112xf32>, vector<12x112xf32> -> vector<12x112xf32>
    %c0_109 = arith.constant 0 : index
    %c0_110 = arith.constant 0 : index
    %c0_111 = arith.constant 0 : index
    %165 = vector.load %arg13[%c0_109, %c0_110, %c0_111] : memref<5x112x48xf32, #tpu.memory_space<vmem>>, vector<1x112x48xf32>
    %166 = vector.shape_cast %165 : vector<1x112x48xf32> to vector<112x48xf32>
    %cst_112 = arith.constant dense<0.000000e+00> : vector<12x48xf32>
    %167 = tpu.matmul %164, %166, %cst_112 {dimension_numbers = #tpu.dot_dimension_numbers<[1], [0], [0], [1], [0, 0, 1, 1], [], []>} : vector<12x112xf32>, vector<112x48xf32>, vector<12x48xf32> -> vector<12x48xf32>
    %c1_113 = arith.constant 1 : index
    %c0_114 = arith.constant 0 : index
    %c0_115 = arith.constant 0 : index
    %168 = vector.load %arg19[%c1_113, %c0_114, %c0_115] : memref<5x12x28xf32, #tpu.memory_space<vmem>>, vector<1x12x28xf32>
    %169 = vector.shape_cast %168 : vector<1x12x28xf32> to vector<12x28xf32>
    %cst_116 = arith.constant dense<0.000000e+00> : vector<12x112xf32>
    %170 = tpu.matmul %169, %157, %cst_116 {dimension_numbers = #tpu.dot_dimension_numbers<[1], [0], [0], [1], [0, 0, 1, 1], [], []>} : vector<12x28xf32>, vector<28x112xf32>, vector<12x112xf32> -> vector<12x112xf32>
    %c1_117 = arith.constant 1 : index
    %c0_118 = arith.constant 0 : index
    %c0_119 = arith.constant 0 : index
    %171 = vector.load %arg13[%c1_117, %c0_118, %c0_119] : memref<5x112x48xf32, #tpu.memory_space<vmem>>, vector<1x112x48xf32>
    %172 = vector.shape_cast %171 : vector<1x112x48xf32> to vector<112x48xf32>
    %cst_120 = arith.constant dense<0.000000e+00> : vector<12x48xf32>
    %173 = tpu.matmul %170, %172, %cst_120 {dimension_numbers = #tpu.dot_dimension_numbers<[1], [0], [0], [1], [0, 0, 1, 1], [], []>} : vector<12x112xf32>, vector<112x48xf32>, vector<12x48xf32> -> vector<12x48xf32>
    %174 = arith.addf %167, %173 : vector<12x48xf32>
    %c2_121 = arith.constant 2 : index
    %c0_122 = arith.constant 0 : index
    %c0_123 = arith.constant 0 : index
    %175 = vector.load %arg19[%c2_121, %c0_122, %c0_123] : memref<5x12x28xf32, #tpu.memory_space<vmem>>, vector<1x12x28xf32>
    %176 = vector.shape_cast %175 : vector<1x12x28xf32> to vector<12x28xf32>
    %cst_124 = arith.constant dense<0.000000e+00> : vector<12x112xf32>
    %177 = tpu.matmul %176, %157, %cst_124 {dimension_numbers = #tpu.dot_dimension_numbers<[1], [0], [0], [1], [0, 0, 1, 1], [], []>} : vector<12x28xf32>, vector<28x112xf32>, vector<12x112xf32> -> vector<12x112xf32>
    %c2_125 = arith.constant 2 : index
    %c0_126 = arith.constant 0 : index
    %c0_127 = arith.constant 0 : index
    %178 = vector.load %arg13[%c2_125, %c0_126, %c0_127] : memref<5x112x48xf32, #tpu.memory_space<vmem>>, vector<1x112x48xf32>
    %179 = vector.shape_cast %178 : vector<1x112x48xf32> to vector<112x48xf32>
    %cst_128 = arith.constant dense<0.000000e+00> : vector<12x48xf32>
    %180 = tpu.matmul %177, %179, %cst_128 {dimension_numbers = #tpu.dot_dimension_numbers<[1], [0], [0], [1], [0, 0, 1, 1], [], []>} : vector<12x112xf32>, vector<112x48xf32>, vector<12x48xf32> -> vector<12x48xf32>
    %181 = arith.addf %174, %180 : vector<12x48xf32>
    %c3 = arith.constant 3 : index
    %c0_129 = arith.constant 0 : index
    %c0_130 = arith.constant 0 : index
    %182 = vector.load %arg19[%c3, %c0_129, %c0_130] : memref<5x12x28xf32, #tpu.memory_space<vmem>>, vector<1x12x28xf32>
    %183 = vector.shape_cast %182 : vector<1x12x28xf32> to vector<12x28xf32>
    %cst_131 = arith.constant dense<0.000000e+00> : vector<12x112xf32>
    %184 = tpu.matmul %183, %157, %cst_131 {dimension_numbers = #tpu.dot_dimension_numbers<[1], [0], [0], [1], [0, 0, 1, 1], [], []>} : vector<12x28xf32>, vector<28x112xf32>, vector<12x112xf32> -> vector<12x112xf32>
    %c3_132 = arith.constant 3 : index
    %c0_133 = arith.constant 0 : index
    %c0_134 = arith.constant 0 : index
    %185 = vector.load %arg13[%c3_132, %c0_133, %c0_134] : memref<5x112x48xf32, #tpu.memory_space<vmem>>, vector<1x112x48xf32>
    %186 = vector.shape_cast %185 : vector<1x112x48xf32> to vector<112x48xf32>
    %cst_135 = arith.constant dense<0.000000e+00> : vector<12x48xf32>
    %187 = tpu.matmul %184, %186, %cst_135 {dimension_numbers = #tpu.dot_dimension_numbers<[1], [0], [0], [1], [0, 0, 1, 1], [], []>} : vector<12x112xf32>, vector<112x48xf32>, vector<12x48xf32> -> vector<12x48xf32>
    %188 = arith.addf %181, %187 : vector<12x48xf32>
    %c4 = arith.constant 4 : index
    %c0_136 = arith.constant 0 : index
    %c0_137 = arith.constant 0 : index
    %189 = vector.load %arg19[%c4, %c0_136, %c0_137] : memref<5x12x28xf32, #tpu.memory_space<vmem>>, vector<1x12x28xf32>
    %190 = vector.shape_cast %189 : vector<1x12x28xf32> to vector<12x28xf32>
    %cst_138 = arith.constant dense<0.000000e+00> : vector<12x112xf32>
    %191 = tpu.matmul %190, %157, %cst_138 {dimension_numbers = #tpu.dot_dimension_numbers<[1], [0], [0], [1], [0, 0, 1, 1], [], []>} : vector<12x28xf32>, vector<28x112xf32>, vector<12x112xf32> -> vector<12x112xf32>
    %c4_139 = arith.constant 4 : index
    %c0_140 = arith.constant 0 : index
    %c0_141 = arith.constant 0 : index
    %192 = vector.load %arg13[%c4_139, %c0_140, %c0_141] : memref<5x112x48xf32, #tpu.memory_space<vmem>>, vector<1x112x48xf32>
    %193 = vector.shape_cast %192 : vector<1x112x48xf32> to vector<112x48xf32>
    %cst_142 = arith.constant dense<0.000000e+00> : vector<12x48xf32>
    %194 = tpu.matmul %191, %193, %cst_142 {dimension_numbers = #tpu.dot_dimension_numbers<[1], [0], [0], [1], [0, 0, 1, 1], [], []>} : vector<12x112xf32>, vector<112x48xf32>, vector<12x48xf32> -> vector<12x48xf32>
    %195 = arith.addf %188, %194 : vector<12x48xf32>
    %c0_143 = arith.constant 0 : index
    %c0_144 = arith.constant 0 : index
    %196 = vector.load %arg14[%c0_143, %c0_144] : memref<1x48xf32, #tpu.memory_space<vmem>>, vector<1x48xf32>
    %197 = vector.broadcast %196 : vector<1x48xf32> to vector<12x48xf32>
    %198 = arith.addf %195, %197 : vector<12x48xf32>
    %cst_145 = arith.constant 0.000000e+00 : f32
    %199 = vector.broadcast %cst_145 : f32 to vector<12x48xf32>
    %200 = arith.maximumf %198, %199 : vector<12x48xf32>
    %cst_146 = arith.constant dense<0.000000e+00> : vector<48xf32>
    %201 = vector.multi_reduction <add>, %200, %cst_146 [0] : vector<12x48xf32> to vector<48xf32>
    %202 = vector.shape_cast %201 : vector<48xf32> to vector<1x48xf32>
    %203 = arith.mulf %200, %200 : vector<12x48xf32>
    %cst_147 = arith.constant dense<0.000000e+00> : vector<48xf32>
    %204 = vector.multi_reduction <add>, %203, %cst_147 [0] : vector<12x48xf32> to vector<48xf32>
    %205 = vector.shape_cast %204 : vector<48xf32> to vector<1x48xf32>
    %c0_148 = arith.constant 0 : index
    %c0_149 = arith.constant 0 : index
    %c0_150 = arith.constant 0 : index
    %206 = vector.load %arg19[%c0_148, %c0_149, %c0_150] : memref<5x12x28xf32, #tpu.memory_space<vmem>>, vector<1x12x28xf32>
    %207 = vector.shape_cast %206 : vector<1x12x28xf32> to vector<12x28xf32>
    %cst_151 = arith.constant dense<0.000000e+00> : vector<12x112xf32>
    %208 = tpu.matmul %207, %161, %cst_151 {dimension_numbers = #tpu.dot_dimension_numbers<[1], [0], [0], [1], [0, 0, 1, 1], [], []>} : vector<12x28xf32>, vector<28x112xf32>, vector<12x112xf32> -> vector<12x112xf32>
    %c0_152 = arith.constant 0 : index
    %c0_153 = arith.constant 0 : index
    %c0_154 = arith.constant 0 : index
    %209 = vector.load %arg13[%c0_152, %c0_153, %c0_154] : memref<5x112x48xf32, #tpu.memory_space<vmem>>, vector<1x112x48xf32>
    %210 = vector.shape_cast %209 : vector<1x112x48xf32> to vector<112x48xf32>
    %cst_155 = arith.constant dense<0.000000e+00> : vector<12x48xf32>
    %211 = tpu.matmul %208, %210, %cst_155 {dimension_numbers = #tpu.dot_dimension_numbers<[1], [0], [0], [1], [0, 0, 1, 1], [], []>} : vector<12x112xf32>, vector<112x48xf32>, vector<12x48xf32> -> vector<12x48xf32>
    %c1_156 = arith.constant 1 : index
    %c0_157 = arith.constant 0 : index
    %c0_158 = arith.constant 0 : index
    %212 = vector.load %arg19[%c1_156, %c0_157, %c0_158] : memref<5x12x28xf32, #tpu.memory_space<vmem>>, vector<1x12x28xf32>
    %213 = vector.shape_cast %212 : vector<1x12x28xf32> to vector<12x28xf32>
    %cst_159 = arith.constant dense<0.000000e+00> : vector<12x112xf32>
    %214 = tpu.matmul %213, %161, %cst_159 {dimension_numbers = #tpu.dot_dimension_numbers<[1], [0], [0], [1], [0, 0, 1, 1], [], []>} : vector<12x28xf32>, vector<28x112xf32>, vector<12x112xf32> -> vector<12x112xf32>
    %c1_160 = arith.constant 1 : index
    %c0_161 = arith.constant 0 : index
    %c0_162 = arith.constant 0 : index
    %215 = vector.load %arg13[%c1_160, %c0_161, %c0_162] : memref<5x112x48xf32, #tpu.memory_space<vmem>>, vector<1x112x48xf32>
    %216 = vector.shape_cast %215 : vector<1x112x48xf32> to vector<112x48xf32>
    %cst_163 = arith.constant dense<0.000000e+00> : vector<12x48xf32>
    %217 = tpu.matmul %214, %216, %cst_163 {dimension_numbers = #tpu.dot_dimension_numbers<[1], [0], [0], [1], [0, 0, 1, 1], [], []>} : vector<12x112xf32>, vector<112x48xf32>, vector<12x48xf32> -> vector<12x48xf32>
    %218 = arith.addf %211, %217 : vector<12x48xf32>
    %c2_164 = arith.constant 2 : index
    %c0_165 = arith.constant 0 : index
    %c0_166 = arith.constant 0 : index
    %219 = vector.load %arg19[%c2_164, %c0_165, %c0_166] : memref<5x12x28xf32, #tpu.memory_space<vmem>>, vector<1x12x28xf32>
    %220 = vector.shape_cast %219 : vector<1x12x28xf32> to vector<12x28xf32>
    %cst_167 = arith.constant dense<0.000000e+00> : vector<12x112xf32>
    %221 = tpu.matmul %220, %161, %cst_167 {dimension_numbers = #tpu.dot_dimension_numbers<[1], [0], [0], [1], [0, 0, 1, 1], [], []>} : vector<12x28xf32>, vector<28x112xf32>, vector<12x112xf32> -> vector<12x112xf32>
    %c2_168 = arith.constant 2 : index
    %c0_169 = arith.constant 0 : index
    %c0_170 = arith.constant 0 : index
    %222 = vector.load %arg13[%c2_168, %c0_169, %c0_170] : memref<5x112x48xf32, #tpu.memory_space<vmem>>, vector<1x112x48xf32>
    %223 = vector.shape_cast %222 : vector<1x112x48xf32> to vector<112x48xf32>
    %cst_171 = arith.constant dense<0.000000e+00> : vector<12x48xf32>
    %224 = tpu.matmul %221, %223, %cst_171 {dimension_numbers = #tpu.dot_dimension_numbers<[1], [0], [0], [1], [0, 0, 1, 1], [], []>} : vector<12x112xf32>, vector<112x48xf32>, vector<12x48xf32> -> vector<12x48xf32>
    %225 = arith.addf %218, %224 : vector<12x48xf32>
    %c3_172 = arith.constant 3 : index
    %c0_173 = arith.constant 0 : index
    %c0_174 = arith.constant 0 : index
    %226 = vector.load %arg19[%c3_172, %c0_173, %c0_174] : memref<5x12x28xf32, #tpu.memory_space<vmem>>, vector<1x12x28xf32>
    %227 = vector.shape_cast %226 : vector<1x12x28xf32> to vector<12x28xf32>
    %cst_175 = arith.constant dense<0.000000e+00> : vector<12x112xf32>
    %228 = tpu.matmul %227, %161, %cst_175 {dimension_numbers = #tpu.dot_dimension_numbers<[1], [0], [0], [1], [0, 0, 1, 1], [], []>} : vector<12x28xf32>, vector<28x112xf32>, vector<12x112xf32> -> vector<12x112xf32>
    %c3_176 = arith.constant 3 : index
    %c0_177 = arith.constant 0 : index
    %c0_178 = arith.constant 0 : index
    %229 = vector.load %arg13[%c3_176, %c0_177, %c0_178] : memref<5x112x48xf32, #tpu.memory_space<vmem>>, vector<1x112x48xf32>
    %230 = vector.shape_cast %229 : vector<1x112x48xf32> to vector<112x48xf32>
    %cst_179 = arith.constant dense<0.000000e+00> : vector<12x48xf32>
    %231 = tpu.matmul %228, %230, %cst_179 {dimension_numbers = #tpu.dot_dimension_numbers<[1], [0], [0], [1], [0, 0, 1, 1], [], []>} : vector<12x112xf32>, vector<112x48xf32>, vector<12x48xf32> -> vector<12x48xf32>
    %232 = arith.addf %225, %231 : vector<12x48xf32>
    %c4_180 = arith.constant 4 : index
    %c0_181 = arith.constant 0 : index
    %c0_182 = arith.constant 0 : index
    %233 = vector.load %arg19[%c4_180, %c0_181, %c0_182] : memref<5x12x28xf32, #tpu.memory_space<vmem>>, vector<1x12x28xf32>
    %234 = vector.shape_cast %233 : vector<1x12x28xf32> to vector<12x28xf32>
    %cst_183 = arith.constant dense<0.000000e+00> : vector<12x112xf32>
    %235 = tpu.matmul %234, %161, %cst_183 {dimension_numbers = #tpu.dot_dimension_numbers<[1], [0], [0], [1], [0, 0, 1, 1], [], []>} : vector<12x28xf32>, vector<28x112xf32>, vector<12x112xf32> -> vector<12x112xf32>
    %c4_184 = arith.constant 4 : index
    %c0_185 = arith.constant 0 : index
    %c0_186 = arith.constant 0 : index
    %236 = vector.load %arg13[%c4_184, %c0_185, %c0_186] : memref<5x112x48xf32, #tpu.memory_space<vmem>>, vector<1x112x48xf32>
    %237 = vector.shape_cast %236 : vector<1x112x48xf32> to vector<112x48xf32>
    %cst_187 = arith.constant dense<0.000000e+00> : vector<12x48xf32>
    %238 = tpu.matmul %235, %237, %cst_187 {dimension_numbers = #tpu.dot_dimension_numbers<[1], [0], [0], [1], [0, 0, 1, 1], [], []>} : vector<12x112xf32>, vector<112x48xf32>, vector<12x48xf32> -> vector<12x48xf32>
    %239 = arith.addf %232, %238 : vector<12x48xf32>
    %c0_188 = arith.constant 0 : index
    %c0_189 = arith.constant 0 : index
    %240 = vector.load %arg14[%c0_188, %c0_189] : memref<1x48xf32, #tpu.memory_space<vmem>>, vector<1x48xf32>
    %241 = vector.broadcast %240 : vector<1x48xf32> to vector<12x48xf32>
    %242 = arith.addf %239, %241 : vector<12x48xf32>
    %cst_190 = arith.constant 0.000000e+00 : f32
    %243 = vector.broadcast %cst_190 : f32 to vector<12x48xf32>
    %244 = arith.maximumf %242, %243 : vector<12x48xf32>
    %cst_191 = arith.constant dense<0.000000e+00> : vector<48xf32>
    %245 = vector.multi_reduction <add>, %244, %cst_191 [0] : vector<12x48xf32> to vector<48xf32>
    %246 = vector.shape_cast %245 : vector<48xf32> to vector<1x48xf32>
    %247 = arith.mulf %244, %244 : vector<12x48xf32>
    %cst_192 = arith.constant dense<0.000000e+00> : vector<48xf32>
    %248 = vector.multi_reduction <add>, %247, %cst_192 [0] : vector<12x48xf32> to vector<48xf32>
    %249 = vector.shape_cast %248 : vector<48xf32> to vector<1x48xf32>
    %250 = arith.addf %202, %246 : vector<1x48xf32>
    %251 = arith.addf %205, %249 : vector<1x48xf32>
    %c0_193 = arith.constant 0 : index
    %c0_194 = arith.constant 0 : index
    %252 = vector.load %arg17[%c0_193, %c0_194] : memref<48x4xf32, #tpu.memory_space<vmem>>, vector<48x4xf32>
    %cst_195 = arith.constant dense<0.000000e+00> : vector<1x4xf32>
    %253 = tpu.matmul %250, %252, %cst_195 {dimension_numbers = #tpu.dot_dimension_numbers<[1], [0], [0], [1], [0, 0, 1, 1], [], []>} : vector<1x48xf32>, vector<48x4xf32>, vector<1x4xf32> -> vector<1x4xf32>
    %c0_196 = arith.constant 0 : index
    %c0_197 = arith.constant 0 : index
    %254 = vector.load %arg17[%c0_196, %c0_197] : memref<48x4xf32, #tpu.memory_space<vmem>>, vector<48x4xf32>
    %cst_198 = arith.constant dense<0.000000e+00> : vector<1x4xf32>
    %255 = tpu.matmul %251, %254, %cst_198 {dimension_numbers = #tpu.dot_dimension_numbers<[1], [0], [0], [1], [0, 0, 1, 1], [], []>} : vector<1x48xf32>, vector<48x4xf32>, vector<1x4xf32> -> vector<1x4xf32>
    %cst_199 = arith.constant 0.00347222225 : f32
    %256 = vector.broadcast %cst_199 : f32 to vector<1x4xf32>
    %257 = arith.mulf %253, %256 : vector<1x4xf32>
    %cst_200 = arith.constant 0.00347222225 : f32
    %258 = vector.broadcast %cst_200 : f32 to vector<1x4xf32>
    %259 = arith.mulf %255, %258 : vector<1x4xf32>
    %260 = arith.mulf %257, %257 : vector<1x4xf32>
    %261 = arith.subf %259, %260 : vector<1x4xf32>
    %c0_201 = arith.constant 0 : index
    %c0_202 = arith.constant 0 : index
    %262 = vector.load %arg15[%c0_201, %c0_202] : memref<1x4xf32, #tpu.memory_space<vmem>>, vector<1x4xf32>
    %cst_203 = arith.constant 9.99999974E-6 : f32
    %263 = vector.broadcast %cst_203 : f32 to vector<1x4xf32>
    %264 = arith.addf %261, %263 : vector<1x4xf32>
    %265 = math.rsqrt %264 : vector<1x4xf32>
    %266 = arith.mulf %262, %265 : vector<1x4xf32>
    %c0_204 = arith.constant 0 : index
    %c0_205 = arith.constant 0 : index
    %267 = vector.load %arg16[%c0_204, %c0_205] : memref<1x4xf32, #tpu.memory_space<vmem>>, vector<1x4xf32>
    %268 = arith.mulf %266, %257 : vector<1x4xf32>
    %269 = arith.subf %267, %268 : vector<1x4xf32>
    %c0_206 = arith.constant 0 : index
    %c0_207 = arith.constant 0 : index
    %270 = vector.load %arg18[%c0_206, %c0_207] : memref<4x48xf32, #tpu.memory_space<vmem>>, vector<4x48xf32>
    %cst_208 = arith.constant dense<0.000000e+00> : vector<1x48xf32>
    %271 = tpu.matmul %266, %270, %cst_208 {dimension_numbers = #tpu.dot_dimension_numbers<[1], [0], [0], [1], [0, 0, 1, 1], [], []>} : vector<1x4xf32>, vector<4x48xf32>, vector<1x48xf32> -> vector<1x48xf32>
    %c0_209 = arith.constant 0 : index
    %c0_210 = arith.constant 0 : index
    %272 = vector.load %arg18[%c0_209, %c0_210] : memref<4x48xf32, #tpu.memory_space<vmem>>, vector<4x48xf32>
    %cst_211 = arith.constant dense<0.000000e+00> : vector<1x48xf32>
    %273 = tpu.matmul %269, %272, %cst_211 {dimension_numbers = #tpu.dot_dimension_numbers<[1], [0], [0], [1], [0, 0, 1, 1], [], []>} : vector<1x4xf32>, vector<4x48xf32>, vector<1x48xf32> -> vector<1x48xf32>
    %274 = vector.broadcast %271 : vector<1x48xf32> to vector<12x48xf32>
    %275 = arith.mulf %274, %200 : vector<12x48xf32>
    %276 = vector.broadcast %273 : vector<1x48xf32> to vector<12x48xf32>
    %277 = arith.addf %275, %276 : vector<12x48xf32>
    %278 = vector.broadcast %271 : vector<1x48xf32> to vector<12x48xf32>
    %279 = arith.mulf %278, %244 : vector<12x48xf32>
    %280 = vector.broadcast %273 : vector<1x48xf32> to vector<12x48xf32>
    %281 = arith.addf %279, %280 : vector<12x48xf32>
    %282 = vector.extract_strided_slice %277 {offsets = [0, 0], sizes = [10, 48], strides = [1, 1]} : vector<12x48xf32> to vector<10x48xf32>
    %c0_212 = arith.constant 0 : index
    %c0_213 = arith.constant 0 : index
    %c0_214 = arith.constant 0 : index
    %283 = vector.load %arg20[%c0_212, %c0_213, %c0_214] : memref<3x48x80xf32, #tpu.memory_space<vmem>>, vector<1x48x80xf32>
    %284 = vector.shape_cast %283 : vector<1x48x80xf32> to vector<48x80xf32>
    %cst_215 = arith.constant dense<0.000000e+00> : vector<10x80xf32>
    %285 = tpu.matmul %282, %284, %cst_215 {dimension_numbers = #tpu.dot_dimension_numbers<[1], [0], [0], [1], [0, 0, 1, 1], [], []>} : vector<10x48xf32>, vector<48x80xf32>, vector<10x80xf32> -> vector<10x80xf32>
    %286 = vector.extract_strided_slice %277 {offsets = [1, 0], sizes = [10, 48], strides = [1, 1]} : vector<12x48xf32> to vector<10x48xf32>
    %c1_216 = arith.constant 1 : index
    %c0_217 = arith.constant 0 : index
    %c0_218 = arith.constant 0 : index
    %287 = vector.load %arg20[%c1_216, %c0_217, %c0_218] : memref<3x48x80xf32, #tpu.memory_space<vmem>>, vector<1x48x80xf32>
    %288 = vector.shape_cast %287 : vector<1x48x80xf32> to vector<48x80xf32>
    %cst_219 = arith.constant dense<0.000000e+00> : vector<10x80xf32>
    %289 = tpu.matmul %286, %288, %cst_219 {dimension_numbers = #tpu.dot_dimension_numbers<[1], [0], [0], [1], [0, 0, 1, 1], [], []>} : vector<10x48xf32>, vector<48x80xf32>, vector<10x80xf32> -> vector<10x80xf32>
    %290 = arith.addf %285, %289 : vector<10x80xf32>
    %291 = vector.extract_strided_slice %277 {offsets = [2, 0], sizes = [10, 48], strides = [1, 1]} : vector<12x48xf32> to vector<10x48xf32>
    %c2_220 = arith.constant 2 : index
    %c0_221 = arith.constant 0 : index
    %c0_222 = arith.constant 0 : index
    %292 = vector.load %arg20[%c2_220, %c0_221, %c0_222] : memref<3x48x80xf32, #tpu.memory_space<vmem>>, vector<1x48x80xf32>
    %293 = vector.shape_cast %292 : vector<1x48x80xf32> to vector<48x80xf32>
    %cst_223 = arith.constant dense<0.000000e+00> : vector<10x80xf32>
    %294 = tpu.matmul %291, %293, %cst_223 {dimension_numbers = #tpu.dot_dimension_numbers<[1], [0], [0], [1], [0, 0, 1, 1], [], []>} : vector<10x48xf32>, vector<48x80xf32>, vector<10x80xf32> -> vector<10x80xf32>
    %295 = arith.addf %290, %294 : vector<10x80xf32>
    %c0_224 = arith.constant 0 : index
    %c0_225 = arith.constant 0 : index
    %296 = vector.load %arg21[%c0_224, %c0_225] : memref<1x80xf32, #tpu.memory_space<vmem>>, vector<1x80xf32>
    %297 = vector.broadcast %296 : vector<1x80xf32> to vector<10x80xf32>
    %298 = arith.addf %295, %297 : vector<10x80xf32>
    %cst_226 = arith.constant 0.000000e+00 : f32
    %299 = vector.broadcast %cst_226 : f32 to vector<10x80xf32>
    %300 = arith.maximumf %298, %299 : vector<10x80xf32>
    %cst_227 = arith.constant dense<0.000000e+00> : vector<80xf32>
    %301 = vector.multi_reduction <add>, %300, %cst_227 [0] : vector<10x80xf32> to vector<80xf32>
    %302 = vector.shape_cast %301 : vector<80xf32> to vector<1x80xf32>
    %303 = arith.mulf %300, %300 : vector<10x80xf32>
    %cst_228 = arith.constant dense<0.000000e+00> : vector<80xf32>
    %304 = vector.multi_reduction <add>, %303, %cst_228 [0] : vector<10x80xf32> to vector<80xf32>
    %305 = vector.shape_cast %304 : vector<80xf32> to vector<1x80xf32>
    %306 = vector.extract_strided_slice %281 {offsets = [0, 0], sizes = [10, 48], strides = [1, 1]} : vector<12x48xf32> to vector<10x48xf32>
    %c0_229 = arith.constant 0 : index
    %c0_230 = arith.constant 0 : index
    %c0_231 = arith.constant 0 : index
    %307 = vector.load %arg20[%c0_229, %c0_230, %c0_231] : memref<3x48x80xf32, #tpu.memory_space<vmem>>, vector<1x48x80xf32>
    %308 = vector.shape_cast %307 : vector<1x48x80xf32> to vector<48x80xf32>
    %cst_232 = arith.constant dense<0.000000e+00> : vector<10x80xf32>
    %309 = tpu.matmul %306, %308, %cst_232 {dimension_numbers = #tpu.dot_dimension_numbers<[1], [0], [0], [1], [0, 0, 1, 1], [], []>} : vector<10x48xf32>, vector<48x80xf32>, vector<10x80xf32> -> vector<10x80xf32>
    %310 = vector.extract_strided_slice %281 {offsets = [1, 0], sizes = [10, 48], strides = [1, 1]} : vector<12x48xf32> to vector<10x48xf32>
    %c1_233 = arith.constant 1 : index
    %c0_234 = arith.constant 0 : index
    %c0_235 = arith.constant 0 : index
    %311 = vector.load %arg20[%c1_233, %c0_234, %c0_235] : memref<3x48x80xf32, #tpu.memory_space<vmem>>, vector<1x48x80xf32>
    %312 = vector.shape_cast %311 : vector<1x48x80xf32> to vector<48x80xf32>
    %cst_236 = arith.constant dense<0.000000e+00> : vector<10x80xf32>
    %313 = tpu.matmul %310, %312, %cst_236 {dimension_numbers = #tpu.dot_dimension_numbers<[1], [0], [0], [1], [0, 0, 1, 1], [], []>} : vector<10x48xf32>, vector<48x80xf32>, vector<10x80xf32> -> vector<10x80xf32>
    %314 = arith.addf %309, %313 : vector<10x80xf32>
    %315 = vector.extract_strided_slice %281 {offsets = [2, 0], sizes = [10, 48], strides = [1, 1]} : vector<12x48xf32> to vector<10x48xf32>
    %c2_237 = arith.constant 2 : index
    %c0_238 = arith.constant 0 : index
    %c0_239 = arith.constant 0 : index
    %316 = vector.load %arg20[%c2_237, %c0_238, %c0_239] : memref<3x48x80xf32, #tpu.memory_space<vmem>>, vector<1x48x80xf32>
    %317 = vector.shape_cast %316 : vector<1x48x80xf32> to vector<48x80xf32>
    %cst_240 = arith.constant dense<0.000000e+00> : vector<10x80xf32>
    %318 = tpu.matmul %315, %317, %cst_240 {dimension_numbers = #tpu.dot_dimension_numbers<[1], [0], [0], [1], [0, 0, 1, 1], [], []>} : vector<10x48xf32>, vector<48x80xf32>, vector<10x80xf32> -> vector<10x80xf32>
    %319 = arith.addf %314, %318 : vector<10x80xf32>
    %c0_241 = arith.constant 0 : index
    %c0_242 = arith.constant 0 : index
    %320 = vector.load %arg21[%c0_241, %c0_242] : memref<1x80xf32, #tpu.memory_space<vmem>>, vector<1x80xf32>
    %321 = vector.broadcast %320 : vector<1x80xf32> to vector<10x80xf32>
    %322 = arith.addf %319, %321 : vector<10x80xf32>
    %cst_243 = arith.constant 0.000000e+00 : f32
    %323 = vector.broadcast %cst_243 : f32 to vector<10x80xf32>
    %324 = arith.maximumf %322, %323 : vector<10x80xf32>
    %cst_244 = arith.constant dense<0.000000e+00> : vector<80xf32>
    %325 = vector.multi_reduction <add>, %324, %cst_244 [0] : vector<10x80xf32> to vector<80xf32>
    %326 = vector.shape_cast %325 : vector<80xf32> to vector<1x80xf32>
    %327 = arith.mulf %324, %324 : vector<10x80xf32>
    %cst_245 = arith.constant dense<0.000000e+00> : vector<80xf32>
    %328 = vector.multi_reduction <add>, %327, %cst_245 [0] : vector<10x80xf32> to vector<80xf32>
    %329 = vector.shape_cast %328 : vector<80xf32> to vector<1x80xf32>
    %330 = arith.addf %302, %326 : vector<1x80xf32>
    %331 = arith.addf %305, %329 : vector<1x80xf32>
    %c0_246 = arith.constant 0 : index
    %c0_247 = arith.constant 0 : index
    %332 = vector.load %arg24[%c0_246, %c0_247] : memref<80x8xf32, #tpu.memory_space<vmem>>, vector<80x8xf32>
    %cst_248 = arith.constant dense<0.000000e+00> : vector<1x8xf32>
    %333 = tpu.matmul %330, %332, %cst_248 {dimension_numbers = #tpu.dot_dimension_numbers<[1], [0], [0], [1], [0, 0, 1, 1], [], []>} : vector<1x80xf32>, vector<80x8xf32>, vector<1x8xf32> -> vector<1x8xf32>
    %c0_249 = arith.constant 0 : index
    %c0_250 = arith.constant 0 : index
    %334 = vector.load %arg24[%c0_249, %c0_250] : memref<80x8xf32, #tpu.memory_space<vmem>>, vector<80x8xf32>
    %cst_251 = arith.constant dense<0.000000e+00> : vector<1x8xf32>
    %335 = tpu.matmul %331, %334, %cst_251 {dimension_numbers = #tpu.dot_dimension_numbers<[1], [0], [0], [1], [0, 0, 1, 1], [], []>} : vector<1x80xf32>, vector<80x8xf32>, vector<1x8xf32> -> vector<1x8xf32>
    %cst_252 = arith.constant 5.000000e-03 : f32
    %336 = vector.broadcast %cst_252 : f32 to vector<1x8xf32>
    %337 = arith.mulf %333, %336 : vector<1x8xf32>
    %cst_253 = arith.constant 5.000000e-03 : f32
    %338 = vector.broadcast %cst_253 : f32 to vector<1x8xf32>
    %339 = arith.mulf %335, %338 : vector<1x8xf32>
    %340 = arith.mulf %337, %337 : vector<1x8xf32>
    %341 = arith.subf %339, %340 : vector<1x8xf32>
    %c0_254 = arith.constant 0 : index
    %c0_255 = arith.constant 0 : index
    %342 = vector.load %arg22[%c0_254, %c0_255] : memref<1x8xf32, #tpu.memory_space<vmem>>, vector<1x8xf32>
    %cst_256 = arith.constant 9.99999974E-6 : f32
    %343 = vector.broadcast %cst_256 : f32 to vector<1x8xf32>
    %344 = arith.addf %341, %343 : vector<1x8xf32>
    %345 = math.rsqrt %344 : vector<1x8xf32>
    %346 = arith.mulf %342, %345 : vector<1x8xf32>
    %c0_257 = arith.constant 0 : index
    %c0_258 = arith.constant 0 : index
    %347 = vector.load %arg23[%c0_257, %c0_258] : memref<1x8xf32, #tpu.memory_space<vmem>>, vector<1x8xf32>
    %348 = arith.mulf %346, %337 : vector<1x8xf32>
    %349 = arith.subf %347, %348 : vector<1x8xf32>
    %c0_259 = arith.constant 0 : index
    %c0_260 = arith.constant 0 : index
    %350 = vector.load %arg25[%c0_259, %c0_260] : memref<8x80xf32, #tpu.memory_space<vmem>>, vector<8x80xf32>
    %cst_261 = arith.constant dense<0.000000e+00> : vector<1x80xf32>
    %351 = tpu.matmul %346, %350, %cst_261 {dimension_numbers = #tpu.dot_dimension_numbers<[1], [0], [0], [1], [0, 0, 1, 1], [], []>} : vector<1x8xf32>, vector<8x80xf32>, vector<1x80xf32> -> vector<1x80xf32>
    %c0_262 = arith.constant 0 : index
    %c0_263 = arith.constant 0 : index
    %352 = vector.load %arg25[%c0_262, %c0_263] : memref<8x80xf32, #tpu.memory_space<vmem>>, vector<8x80xf32>
    %cst_264 = arith.constant dense<0.000000e+00> : vector<1x80xf32>
    %353 = tpu.matmul %349, %352, %cst_264 {dimension_numbers = #tpu.dot_dimension_numbers<[1], [0], [0], [1], [0, 0, 1, 1], [], []>} : vector<1x8xf32>, vector<8x80xf32>, vector<1x80xf32> -> vector<1x80xf32>
    %354 = vector.broadcast %351 : vector<1x80xf32> to vector<10x80xf32>
    %355 = arith.mulf %354, %300 : vector<10x80xf32>
    %356 = vector.broadcast %353 : vector<1x80xf32> to vector<10x80xf32>
    %357 = arith.addf %355, %356 : vector<10x80xf32>
    %358 = vector.broadcast %351 : vector<1x80xf32> to vector<10x80xf32>
    %359 = arith.mulf %358, %324 : vector<10x80xf32>
    %360 = vector.broadcast %353 : vector<1x80xf32> to vector<10x80xf32>
    %361 = arith.addf %359, %360 : vector<10x80xf32>
    %362 = vector.extract_strided_slice %357 {offsets = [0, 0], sizes = [8, 80], strides = [1, 1]} : vector<10x80xf32> to vector<8x80xf32>
    %c0_265 = arith.constant 0 : index
    %c0_266 = arith.constant 0 : index
    %c0_267 = arith.constant 0 : index
    %363 = vector.load %arg26[%c0_265, %c0_266, %c0_267] : memref<3x80x64xf32, #tpu.memory_space<vmem>>, vector<1x80x64xf32>
    %364 = vector.shape_cast %363 : vector<1x80x64xf32> to vector<80x64xf32>
    %cst_268 = arith.constant dense<0.000000e+00> : vector<8x64xf32>
    %365 = tpu.matmul %362, %364, %cst_268 {dimension_numbers = #tpu.dot_dimension_numbers<[1], [0], [0], [1], [0, 0, 1, 1], [], []>} : vector<8x80xf32>, vector<80x64xf32>, vector<8x64xf32> -> vector<8x64xf32>
    %366 = vector.extract_strided_slice %357 {offsets = [1, 0], sizes = [8, 80], strides = [1, 1]} : vector<10x80xf32> to vector<8x80xf32>
    %c1_269 = arith.constant 1 : index
    %c0_270 = arith.constant 0 : index
    %c0_271 = arith.constant 0 : index
    %367 = vector.load %arg26[%c1_269, %c0_270, %c0_271] : memref<3x80x64xf32, #tpu.memory_space<vmem>>, vector<1x80x64xf32>
    %368 = vector.shape_cast %367 : vector<1x80x64xf32> to vector<80x64xf32>
    %cst_272 = arith.constant dense<0.000000e+00> : vector<8x64xf32>
    %369 = tpu.matmul %366, %368, %cst_272 {dimension_numbers = #tpu.dot_dimension_numbers<[1], [0], [0], [1], [0, 0, 1, 1], [], []>} : vector<8x80xf32>, vector<80x64xf32>, vector<8x64xf32> -> vector<8x64xf32>
    %370 = arith.addf %365, %369 : vector<8x64xf32>
    %371 = vector.extract_strided_slice %357 {offsets = [2, 0], sizes = [8, 80], strides = [1, 1]} : vector<10x80xf32> to vector<8x80xf32>
    %c2_273 = arith.constant 2 : index
    %c0_274 = arith.constant 0 : index
    %c0_275 = arith.constant 0 : index
    %372 = vector.load %arg26[%c2_273, %c0_274, %c0_275] : memref<3x80x64xf32, #tpu.memory_space<vmem>>, vector<1x80x64xf32>
    %373 = vector.shape_cast %372 : vector<1x80x64xf32> to vector<80x64xf32>
    %cst_276 = arith.constant dense<0.000000e+00> : vector<8x64xf32>
    %374 = tpu.matmul %371, %373, %cst_276 {dimension_numbers = #tpu.dot_dimension_numbers<[1], [0], [0], [1], [0, 0, 1, 1], [], []>} : vector<8x80xf32>, vector<80x64xf32>, vector<8x64xf32> -> vector<8x64xf32>
    %375 = arith.addf %370, %374 : vector<8x64xf32>
    %c0_277 = arith.constant 0 : index
    %c0_278 = arith.constant 0 : index
    %376 = vector.load %arg27[%c0_277, %c0_278] : memref<1x64xf32, #tpu.memory_space<vmem>>, vector<1x64xf32>
    %377 = vector.broadcast %376 : vector<1x64xf32> to vector<8x64xf32>
    %378 = arith.addf %375, %377 : vector<8x64xf32>
    %cst_279 = arith.constant 0.000000e+00 : f32
    %379 = vector.broadcast %cst_279 : f32 to vector<8x64xf32>
    %380 = arith.maximumf %378, %379 : vector<8x64xf32>
    %cst_280 = arith.constant dense<0.000000e+00> : vector<64xf32>
    %381 = vector.multi_reduction <add>, %380, %cst_280 [0] : vector<8x64xf32> to vector<64xf32>
    %382 = vector.shape_cast %381 : vector<64xf32> to vector<1x64xf32>
    %383 = arith.mulf %380, %380 : vector<8x64xf32>
    %cst_281 = arith.constant dense<0.000000e+00> : vector<64xf32>
    %384 = vector.multi_reduction <add>, %383, %cst_281 [0] : vector<8x64xf32> to vector<64xf32>
    %385 = vector.shape_cast %384 : vector<64xf32> to vector<1x64xf32>
    %386 = vector.extract_strided_slice %361 {offsets = [0, 0], sizes = [8, 80], strides = [1, 1]} : vector<10x80xf32> to vector<8x80xf32>
    %c0_282 = arith.constant 0 : index
    %c0_283 = arith.constant 0 : index
    %c0_284 = arith.constant 0 : index
    %387 = vector.load %arg26[%c0_282, %c0_283, %c0_284] : memref<3x80x64xf32, #tpu.memory_space<vmem>>, vector<1x80x64xf32>
    %388 = vector.shape_cast %387 : vector<1x80x64xf32> to vector<80x64xf32>
    %cst_285 = arith.constant dense<0.000000e+00> : vector<8x64xf32>
    %389 = tpu.matmul %386, %388, %cst_285 {dimension_numbers = #tpu.dot_dimension_numbers<[1], [0], [0], [1], [0, 0, 1, 1], [], []>} : vector<8x80xf32>, vector<80x64xf32>, vector<8x64xf32> -> vector<8x64xf32>
    %390 = vector.extract_strided_slice %361 {offsets = [1, 0], sizes = [8, 80], strides = [1, 1]} : vector<10x80xf32> to vector<8x80xf32>
    %c1_286 = arith.constant 1 : index
    %c0_287 = arith.constant 0 : index
    %c0_288 = arith.constant 0 : index
    %391 = vector.load %arg26[%c1_286, %c0_287, %c0_288] : memref<3x80x64xf32, #tpu.memory_space<vmem>>, vector<1x80x64xf32>
    %392 = vector.shape_cast %391 : vector<1x80x64xf32> to vector<80x64xf32>
    %cst_289 = arith.constant dense<0.000000e+00> : vector<8x64xf32>
    %393 = tpu.matmul %390, %392, %cst_289 {dimension_numbers = #tpu.dot_dimension_numbers<[1], [0], [0], [1], [0, 0, 1, 1], [], []>} : vector<8x80xf32>, vector<80x64xf32>, vector<8x64xf32> -> vector<8x64xf32>
    %394 = arith.addf %389, %393 : vector<8x64xf32>
    %395 = vector.extract_strided_slice %361 {offsets = [2, 0], sizes = [8, 80], strides = [1, 1]} : vector<10x80xf32> to vector<8x80xf32>
    %c2_290 = arith.constant 2 : index
    %c0_291 = arith.constant 0 : index
    %c0_292 = arith.constant 0 : index
    %396 = vector.load %arg26[%c2_290, %c0_291, %c0_292] : memref<3x80x64xf32, #tpu.memory_space<vmem>>, vector<1x80x64xf32>
    %397 = vector.shape_cast %396 : vector<1x80x64xf32> to vector<80x64xf32>
    %cst_293 = arith.constant dense<0.000000e+00> : vector<8x64xf32>
    %398 = tpu.matmul %395, %397, %cst_293 {dimension_numbers = #tpu.dot_dimension_numbers<[1], [0], [0], [1], [0, 0, 1, 1], [], []>} : vector<8x80xf32>, vector<80x64xf32>, vector<8x64xf32> -> vector<8x64xf32>
    %399 = arith.addf %394, %398 : vector<8x64xf32>
    %c0_294 = arith.constant 0 : index
    %c0_295 = arith.constant 0 : index
    %400 = vector.load %arg27[%c0_294, %c0_295] : memref<1x64xf32, #tpu.memory_space<vmem>>, vector<1x64xf32>
    %401 = vector.broadcast %400 : vector<1x64xf32> to vector<8x64xf32>
    %402 = arith.addf %399, %401 : vector<8x64xf32>
    %cst_296 = arith.constant 0.000000e+00 : f32
    %403 = vector.broadcast %cst_296 : f32 to vector<8x64xf32>
    %404 = arith.maximumf %402, %403 : vector<8x64xf32>
    %cst_297 = arith.constant dense<0.000000e+00> : vector<64xf32>
    %405 = vector.multi_reduction <add>, %404, %cst_297 [0] : vector<8x64xf32> to vector<64xf32>
    %406 = vector.shape_cast %405 : vector<64xf32> to vector<1x64xf32>
    %407 = arith.mulf %404, %404 : vector<8x64xf32>
    %cst_298 = arith.constant dense<0.000000e+00> : vector<64xf32>
    %408 = vector.multi_reduction <add>, %407, %cst_298 [0] : vector<8x64xf32> to vector<64xf32>
    %409 = vector.shape_cast %408 : vector<64xf32> to vector<1x64xf32>
    %410 = arith.addf %382, %406 : vector<1x64xf32>
    %411 = arith.addf %385, %409 : vector<1x64xf32>
    %c0_299 = arith.constant 0 : index
    %c0_300 = arith.constant 0 : index
    %412 = vector.load %arg30[%c0_299, %c0_300] : memref<64x8xf32, #tpu.memory_space<vmem>>, vector<64x8xf32>
    %cst_301 = arith.constant dense<0.000000e+00> : vector<1x8xf32>
    %413 = tpu.matmul %410, %412, %cst_301 {dimension_numbers = #tpu.dot_dimension_numbers<[1], [0], [0], [1], [0, 0, 1, 1], [], []>} : vector<1x64xf32>, vector<64x8xf32>, vector<1x8xf32> -> vector<1x8xf32>
    %c0_302 = arith.constant 0 : index
    %c0_303 = arith.constant 0 : index
    %414 = vector.load %arg30[%c0_302, %c0_303] : memref<64x8xf32, #tpu.memory_space<vmem>>, vector<64x8xf32>
    %cst_304 = arith.constant dense<0.000000e+00> : vector<1x8xf32>
    %415 = tpu.matmul %411, %414, %cst_304 {dimension_numbers = #tpu.dot_dimension_numbers<[1], [0], [0], [1], [0, 0, 1, 1], [], []>} : vector<1x64xf32>, vector<64x8xf32>, vector<1x8xf32> -> vector<1x8xf32>
    %cst_305 = arith.constant 7.812500e-03 : f32
    %416 = vector.broadcast %cst_305 : f32 to vector<1x8xf32>
    %417 = arith.mulf %413, %416 : vector<1x8xf32>
    %cst_306 = arith.constant 7.812500e-03 : f32
    %418 = vector.broadcast %cst_306 : f32 to vector<1x8xf32>
    %419 = arith.mulf %415, %418 : vector<1x8xf32>
    %420 = arith.mulf %417, %417 : vector<1x8xf32>
    %421 = arith.subf %419, %420 : vector<1x8xf32>
    %c0_307 = arith.constant 0 : index
    %c0_308 = arith.constant 0 : index
    %422 = vector.load %arg28[%c0_307, %c0_308] : memref<1x8xf32, #tpu.memory_space<vmem>>, vector<1x8xf32>
    %cst_309 = arith.constant 9.99999974E-6 : f32
    %423 = vector.broadcast %cst_309 : f32 to vector<1x8xf32>
    %424 = arith.addf %421, %423 : vector<1x8xf32>
    %425 = math.rsqrt %424 : vector<1x8xf32>
    %426 = arith.mulf %422, %425 : vector<1x8xf32>
    %c0_310 = arith.constant 0 : index
    %c0_311 = arith.constant 0 : index
    %427 = vector.load %arg29[%c0_310, %c0_311] : memref<1x8xf32, #tpu.memory_space<vmem>>, vector<1x8xf32>
    %428 = arith.mulf %426, %417 : vector<1x8xf32>
    %429 = arith.subf %427, %428 : vector<1x8xf32>
    %c0_312 = arith.constant 0 : index
    %c0_313 = arith.constant 0 : index
    %430 = vector.load %arg31[%c0_312, %c0_313] : memref<8x64xf32, #tpu.memory_space<vmem>>, vector<8x64xf32>
    %cst_314 = arith.constant dense<0.000000e+00> : vector<1x64xf32>
    %431 = tpu.matmul %426, %430, %cst_314 {dimension_numbers = #tpu.dot_dimension_numbers<[1], [0], [0], [1], [0, 0, 1, 1], [], []>} : vector<1x8xf32>, vector<8x64xf32>, vector<1x64xf32> -> vector<1x64xf32>
    %c0_315 = arith.constant 0 : index
    %c0_316 = arith.constant 0 : index
    %432 = vector.load %arg31[%c0_315, %c0_316] : memref<8x64xf32, #tpu.memory_space<vmem>>, vector<8x64xf32>
    %cst_317 = arith.constant dense<0.000000e+00> : vector<1x64xf32>
    %433 = tpu.matmul %429, %432, %cst_317 {dimension_numbers = #tpu.dot_dimension_numbers<[1], [0], [0], [1], [0, 0, 1, 1], [], []>} : vector<1x8xf32>, vector<8x64xf32>, vector<1x64xf32> -> vector<1x64xf32>
    %434 = vector.broadcast %431 : vector<1x64xf32> to vector<8x64xf32>
    %435 = arith.mulf %434, %380 : vector<8x64xf32>
    %436 = vector.broadcast %433 : vector<1x64xf32> to vector<8x64xf32>
    %437 = arith.addf %435, %436 : vector<8x64xf32>
    %438 = vector.broadcast %431 : vector<1x64xf32> to vector<8x64xf32>
    %439 = arith.mulf %438, %404 : vector<8x64xf32>
    %440 = vector.broadcast %433 : vector<1x64xf32> to vector<8x64xf32>
    %441 = arith.addf %439, %440 : vector<8x64xf32>
    %c0_318 = arith.constant 0 : index
    %c0_319 = arith.constant 0 : index
    %c0_320 = arith.constant 0 : index
    %442 = vector.load %arg38[%c0_318, %c0_319, %c0_320] : memref<5x2x8xf32, #tpu.memory_space<vmem>>, vector<1x2x8xf32>
    %443 = vector.shape_cast %442 : vector<1x2x8xf32> to vector<2x8xf32>
    %cst_321 = arith.constant dense<0.000000e+00> : vector<2x64xf32>
    %444 = tpu.matmul %443, %437, %cst_321 {dimension_numbers = #tpu.dot_dimension_numbers<[1], [0], [0], [1], [0, 0, 1, 1], [], []>} : vector<2x8xf32>, vector<8x64xf32>, vector<2x64xf32> -> vector<2x64xf32>
    %c0_322 = arith.constant 0 : index
    %c0_323 = arith.constant 0 : index
    %c0_324 = arith.constant 0 : index
    %445 = vector.load %arg32[%c0_322, %c0_323, %c0_324] : memref<5x64x16xf32, #tpu.memory_space<vmem>>, vector<1x64x16xf32>
    %446 = vector.shape_cast %445 : vector<1x64x16xf32> to vector<64x16xf32>
    %cst_325 = arith.constant dense<0.000000e+00> : vector<2x16xf32>
    %447 = tpu.matmul %444, %446, %cst_325 {dimension_numbers = #tpu.dot_dimension_numbers<[1], [0], [0], [1], [0, 0, 1, 1], [], []>} : vector<2x64xf32>, vector<64x16xf32>, vector<2x16xf32> -> vector<2x16xf32>
    %c1_326 = arith.constant 1 : index
    %c0_327 = arith.constant 0 : index
    %c0_328 = arith.constant 0 : index
    %448 = vector.load %arg38[%c1_326, %c0_327, %c0_328] : memref<5x2x8xf32, #tpu.memory_space<vmem>>, vector<1x2x8xf32>
    %449 = vector.shape_cast %448 : vector<1x2x8xf32> to vector<2x8xf32>
    %cst_329 = arith.constant dense<0.000000e+00> : vector<2x64xf32>
    %450 = tpu.matmul %449, %437, %cst_329 {dimension_numbers = #tpu.dot_dimension_numbers<[1], [0], [0], [1], [0, 0, 1, 1], [], []>} : vector<2x8xf32>, vector<8x64xf32>, vector<2x64xf32> -> vector<2x64xf32>
    %c1_330 = arith.constant 1 : index
    %c0_331 = arith.constant 0 : index
    %c0_332 = arith.constant 0 : index
    %451 = vector.load %arg32[%c1_330, %c0_331, %c0_332] : memref<5x64x16xf32, #tpu.memory_space<vmem>>, vector<1x64x16xf32>
    %452 = vector.shape_cast %451 : vector<1x64x16xf32> to vector<64x16xf32>
    %cst_333 = arith.constant dense<0.000000e+00> : vector<2x16xf32>
    %453 = tpu.matmul %450, %452, %cst_333 {dimension_numbers = #tpu.dot_dimension_numbers<[1], [0], [0], [1], [0, 0, 1, 1], [], []>} : vector<2x64xf32>, vector<64x16xf32>, vector<2x16xf32> -> vector<2x16xf32>
    %454 = arith.addf %447, %453 : vector<2x16xf32>
    %c2_334 = arith.constant 2 : index
    %c0_335 = arith.constant 0 : index
    %c0_336 = arith.constant 0 : index
    %455 = vector.load %arg38[%c2_334, %c0_335, %c0_336] : memref<5x2x8xf32, #tpu.memory_space<vmem>>, vector<1x2x8xf32>
    %456 = vector.shape_cast %455 : vector<1x2x8xf32> to vector<2x8xf32>
    %cst_337 = arith.constant dense<0.000000e+00> : vector<2x64xf32>
    %457 = tpu.matmul %456, %437, %cst_337 {dimension_numbers = #tpu.dot_dimension_numbers<[1], [0], [0], [1], [0, 0, 1, 1], [], []>} : vector<2x8xf32>, vector<8x64xf32>, vector<2x64xf32> -> vector<2x64xf32>
    %c2_338 = arith.constant 2 : index
    %c0_339 = arith.constant 0 : index
    %c0_340 = arith.constant 0 : index
    %458 = vector.load %arg32[%c2_338, %c0_339, %c0_340] : memref<5x64x16xf32, #tpu.memory_space<vmem>>, vector<1x64x16xf32>
    %459 = vector.shape_cast %458 : vector<1x64x16xf32> to vector<64x16xf32>
    %cst_341 = arith.constant dense<0.000000e+00> : vector<2x16xf32>
    %460 = tpu.matmul %457, %459, %cst_341 {dimension_numbers = #tpu.dot_dimension_numbers<[1], [0], [0], [1], [0, 0, 1, 1], [], []>} : vector<2x64xf32>, vector<64x16xf32>, vector<2x16xf32> -> vector<2x16xf32>
    %461 = arith.addf %454, %460 : vector<2x16xf32>
    %c3_342 = arith.constant 3 : index
    %c0_343 = arith.constant 0 : index
    %c0_344 = arith.constant 0 : index
    %462 = vector.load %arg38[%c3_342, %c0_343, %c0_344] : memref<5x2x8xf32, #tpu.memory_space<vmem>>, vector<1x2x8xf32>
    %463 = vector.shape_cast %462 : vector<1x2x8xf32> to vector<2x8xf32>
    %cst_345 = arith.constant dense<0.000000e+00> : vector<2x64xf32>
    %464 = tpu.matmul %463, %437, %cst_345 {dimension_numbers = #tpu.dot_dimension_numbers<[1], [0], [0], [1], [0, 0, 1, 1], [], []>} : vector<2x8xf32>, vector<8x64xf32>, vector<2x64xf32> -> vector<2x64xf32>
    %c3_346 = arith.constant 3 : index
    %c0_347 = arith.constant 0 : index
    %c0_348 = arith.constant 0 : index
    %465 = vector.load %arg32[%c3_346, %c0_347, %c0_348] : memref<5x64x16xf32, #tpu.memory_space<vmem>>, vector<1x64x16xf32>
    %466 = vector.shape_cast %465 : vector<1x64x16xf32> to vector<64x16xf32>
    %cst_349 = arith.constant dense<0.000000e+00> : vector<2x16xf32>
    %467 = tpu.matmul %464, %466, %cst_349 {dimension_numbers = #tpu.dot_dimension_numbers<[1], [0], [0], [1], [0, 0, 1, 1], [], []>} : vector<2x64xf32>, vector<64x16xf32>, vector<2x16xf32> -> vector<2x16xf32>
    %468 = arith.addf %461, %467 : vector<2x16xf32>
    %c4_350 = arith.constant 4 : index
    %c0_351 = arith.constant 0 : index
    %c0_352 = arith.constant 0 : index
    %469 = vector.load %arg38[%c4_350, %c0_351, %c0_352] : memref<5x2x8xf32, #tpu.memory_space<vmem>>, vector<1x2x8xf32>
    %470 = vector.shape_cast %469 : vector<1x2x8xf32> to vector<2x8xf32>
    %cst_353 = arith.constant dense<0.000000e+00> : vector<2x64xf32>
    %471 = tpu.matmul %470, %437, %cst_353 {dimension_numbers = #tpu.dot_dimension_numbers<[1], [0], [0], [1], [0, 0, 1, 1], [], []>} : vector<2x8xf32>, vector<8x64xf32>, vector<2x64xf32> -> vector<2x64xf32>
    %c4_354 = arith.constant 4 : index
    %c0_355 = arith.constant 0 : index
    %c0_356 = arith.constant 0 : index
    %472 = vector.load %arg32[%c4_354, %c0_355, %c0_356] : memref<5x64x16xf32, #tpu.memory_space<vmem>>, vector<1x64x16xf32>
    %473 = vector.shape_cast %472 : vector<1x64x16xf32> to vector<64x16xf32>
    %cst_357 = arith.constant dense<0.000000e+00> : vector<2x16xf32>
    %474 = tpu.matmul %471, %473, %cst_357 {dimension_numbers = #tpu.dot_dimension_numbers<[1], [0], [0], [1], [0, 0, 1, 1], [], []>} : vector<2x64xf32>, vector<64x16xf32>, vector<2x16xf32> -> vector<2x16xf32>
    %475 = arith.addf %468, %474 : vector<2x16xf32>
    %c0_358 = arith.constant 0 : index
    %c0_359 = arith.constant 0 : index
    %476 = vector.load %arg33[%c0_358, %c0_359] : memref<1x16xf32, #tpu.memory_space<vmem>>, vector<1x16xf32>
    %477 = vector.broadcast %476 : vector<1x16xf32> to vector<2x16xf32>
    %478 = arith.addf %475, %477 : vector<2x16xf32>
    %cst_360 = arith.constant 0.000000e+00 : f32
    %479 = vector.broadcast %cst_360 : f32 to vector<2x16xf32>
    %480 = arith.maximumf %478, %479 : vector<2x16xf32>
    %cst_361 = arith.constant dense<0.000000e+00> : vector<16xf32>
    %481 = vector.multi_reduction <add>, %480, %cst_361 [0] : vector<2x16xf32> to vector<16xf32>
    %482 = vector.shape_cast %481 : vector<16xf32> to vector<1x16xf32>
    %483 = arith.mulf %480, %480 : vector<2x16xf32>
    %cst_362 = arith.constant dense<0.000000e+00> : vector<16xf32>
    %484 = vector.multi_reduction <add>, %483, %cst_362 [0] : vector<2x16xf32> to vector<16xf32>
    %485 = vector.shape_cast %484 : vector<16xf32> to vector<1x16xf32>
    %c0_363 = arith.constant 0 : index
    %c0_364 = arith.constant 0 : index
    %c0_365 = arith.constant 0 : index
    %486 = vector.load %arg38[%c0_363, %c0_364, %c0_365] : memref<5x2x8xf32, #tpu.memory_space<vmem>>, vector<1x2x8xf32>
    %487 = vector.shape_cast %486 : vector<1x2x8xf32> to vector<2x8xf32>
    %cst_366 = arith.constant dense<0.000000e+00> : vector<2x64xf32>
    %488 = tpu.matmul %487, %441, %cst_366 {dimension_numbers = #tpu.dot_dimension_numbers<[1], [0], [0], [1], [0, 0, 1, 1], [], []>} : vector<2x8xf32>, vector<8x64xf32>, vector<2x64xf32> -> vector<2x64xf32>
    %c0_367 = arith.constant 0 : index
    %c0_368 = arith.constant 0 : index
    %c0_369 = arith.constant 0 : index
    %489 = vector.load %arg32[%c0_367, %c0_368, %c0_369] : memref<5x64x16xf32, #tpu.memory_space<vmem>>, vector<1x64x16xf32>
    %490 = vector.shape_cast %489 : vector<1x64x16xf32> to vector<64x16xf32>
    %cst_370 = arith.constant dense<0.000000e+00> : vector<2x16xf32>
    %491 = tpu.matmul %488, %490, %cst_370 {dimension_numbers = #tpu.dot_dimension_numbers<[1], [0], [0], [1], [0, 0, 1, 1], [], []>} : vector<2x64xf32>, vector<64x16xf32>, vector<2x16xf32> -> vector<2x16xf32>
    %c1_371 = arith.constant 1 : index
    %c0_372 = arith.constant 0 : index
    %c0_373 = arith.constant 0 : index
    %492 = vector.load %arg38[%c1_371, %c0_372, %c0_373] : memref<5x2x8xf32, #tpu.memory_space<vmem>>, vector<1x2x8xf32>
    %493 = vector.shape_cast %492 : vector<1x2x8xf32> to vector<2x8xf32>
    %cst_374 = arith.constant dense<0.000000e+00> : vector<2x64xf32>
    %494 = tpu.matmul %493, %441, %cst_374 {dimension_numbers = #tpu.dot_dimension_numbers<[1], [0], [0], [1], [0, 0, 1, 1], [], []>} : vector<2x8xf32>, vector<8x64xf32>, vector<2x64xf32> -> vector<2x64xf32>
    %c1_375 = arith.constant 1 : index
    %c0_376 = arith.constant 0 : index
    %c0_377 = arith.constant 0 : index
    %495 = vector.load %arg32[%c1_375, %c0_376, %c0_377] : memref<5x64x16xf32, #tpu.memory_space<vmem>>, vector<1x64x16xf32>
    %496 = vector.shape_cast %495 : vector<1x64x16xf32> to vector<64x16xf32>
    %cst_378 = arith.constant dense<0.000000e+00> : vector<2x16xf32>
    %497 = tpu.matmul %494, %496, %cst_378 {dimension_numbers = #tpu.dot_dimension_numbers<[1], [0], [0], [1], [0, 0, 1, 1], [], []>} : vector<2x64xf32>, vector<64x16xf32>, vector<2x16xf32> -> vector<2x16xf32>
    %498 = arith.addf %491, %497 : vector<2x16xf32>
    %c2_379 = arith.constant 2 : index
    %c0_380 = arith.constant 0 : index
    %c0_381 = arith.constant 0 : index
    %499 = vector.load %arg38[%c2_379, %c0_380, %c0_381] : memref<5x2x8xf32, #tpu.memory_space<vmem>>, vector<1x2x8xf32>
    %500 = vector.shape_cast %499 : vector<1x2x8xf32> to vector<2x8xf32>
    %cst_382 = arith.constant dense<0.000000e+00> : vector<2x64xf32>
    %501 = tpu.matmul %500, %441, %cst_382 {dimension_numbers = #tpu.dot_dimension_numbers<[1], [0], [0], [1], [0, 0, 1, 1], [], []>} : vector<2x8xf32>, vector<8x64xf32>, vector<2x64xf32> -> vector<2x64xf32>
    %c2_383 = arith.constant 2 : index
    %c0_384 = arith.constant 0 : index
    %c0_385 = arith.constant 0 : index
    %502 = vector.load %arg32[%c2_383, %c0_384, %c0_385] : memref<5x64x16xf32, #tpu.memory_space<vmem>>, vector<1x64x16xf32>
    %503 = vector.shape_cast %502 : vector<1x64x16xf32> to vector<64x16xf32>
    %cst_386 = arith.constant dense<0.000000e+00> : vector<2x16xf32>
    %504 = tpu.matmul %501, %503, %cst_386 {dimension_numbers = #tpu.dot_dimension_numbers<[1], [0], [0], [1], [0, 0, 1, 1], [], []>} : vector<2x64xf32>, vector<64x16xf32>, vector<2x16xf32> -> vector<2x16xf32>
    %505 = arith.addf %498, %504 : vector<2x16xf32>
    %c3_387 = arith.constant 3 : index
    %c0_388 = arith.constant 0 : index
    %c0_389 = arith.constant 0 : index
    %506 = vector.load %arg38[%c3_387, %c0_388, %c0_389] : memref<5x2x8xf32, #tpu.memory_space<vmem>>, vector<1x2x8xf32>
    %507 = vector.shape_cast %506 : vector<1x2x8xf32> to vector<2x8xf32>
    %cst_390 = arith.constant dense<0.000000e+00> : vector<2x64xf32>
    %508 = tpu.matmul %507, %441, %cst_390 {dimension_numbers = #tpu.dot_dimension_numbers<[1], [0], [0], [1], [0, 0, 1, 1], [], []>} : vector<2x8xf32>, vector<8x64xf32>, vector<2x64xf32> -> vector<2x64xf32>
    %c3_391 = arith.constant 3 : index
    %c0_392 = arith.constant 0 : index
    %c0_393 = arith.constant 0 : index
    %509 = vector.load %arg32[%c3_391, %c0_392, %c0_393] : memref<5x64x16xf32, #tpu.memory_space<vmem>>, vector<1x64x16xf32>
    %510 = vector.shape_cast %509 : vector<1x64x16xf32> to vector<64x16xf32>
    %cst_394 = arith.constant dense<0.000000e+00> : vector<2x16xf32>
    %511 = tpu.matmul %508, %510, %cst_394 {dimension_numbers = #tpu.dot_dimension_numbers<[1], [0], [0], [1], [0, 0, 1, 1], [], []>} : vector<2x64xf32>, vector<64x16xf32>, vector<2x16xf32> -> vector<2x16xf32>
    %512 = arith.addf %505, %511 : vector<2x16xf32>
    %c4_395 = arith.constant 4 : index
    %c0_396 = arith.constant 0 : index
    %c0_397 = arith.constant 0 : index
    %513 = vector.load %arg38[%c4_395, %c0_396, %c0_397] : memref<5x2x8xf32, #tpu.memory_space<vmem>>, vector<1x2x8xf32>
    %514 = vector.shape_cast %513 : vector<1x2x8xf32> to vector<2x8xf32>
    %cst_398 = arith.constant dense<0.000000e+00> : vector<2x64xf32>
    %515 = tpu.matmul %514, %441, %cst_398 {dimension_numbers = #tpu.dot_dimension_numbers<[1], [0], [0], [1], [0, 0, 1, 1], [], []>} : vector<2x8xf32>, vector<8x64xf32>, vector<2x64xf32> -> vector<2x64xf32>
    %c4_399 = arith.constant 4 : index
    %c0_400 = arith.constant 0 : index
    %c0_401 = arith.constant 0 : index
    %516 = vector.load %arg32[%c4_399, %c0_400, %c0_401] : memref<5x64x16xf32, #tpu.memory_space<vmem>>, vector<1x64x16xf32>
    %517 = vector.shape_cast %516 : vector<1x64x16xf32> to vector<64x16xf32>
    %cst_402 = arith.constant dense<0.000000e+00> : vector<2x16xf32>
    %518 = tpu.matmul %515, %517, %cst_402 {dimension_numbers = #tpu.dot_dimension_numbers<[1], [0], [0], [1], [0, 0, 1, 1], [], []>} : vector<2x64xf32>, vector<64x16xf32>, vector<2x16xf32> -> vector<2x16xf32>
    %519 = arith.addf %512, %518 : vector<2x16xf32>
    %c0_403 = arith.constant 0 : index
    %c0_404 = arith.constant 0 : index
    %520 = vector.load %arg33[%c0_403, %c0_404] : memref<1x16xf32, #tpu.memory_space<vmem>>, vector<1x16xf32>
    %521 = vector.broadcast %520 : vector<1x16xf32> to vector<2x16xf32>
    %522 = arith.addf %519, %521 : vector<2x16xf32>
    %cst_405 = arith.constant 0.000000e+00 : f32
    %523 = vector.broadcast %cst_405 : f32 to vector<2x16xf32>
    %524 = arith.maximumf %522, %523 : vector<2x16xf32>
    %cst_406 = arith.constant dense<0.000000e+00> : vector<16xf32>
    %525 = vector.multi_reduction <add>, %524, %cst_406 [0] : vector<2x16xf32> to vector<16xf32>
    %526 = vector.shape_cast %525 : vector<16xf32> to vector<1x16xf32>
    %527 = arith.mulf %524, %524 : vector<2x16xf32>
    %cst_407 = arith.constant dense<0.000000e+00> : vector<16xf32>
    %528 = vector.multi_reduction <add>, %527, %cst_407 [0] : vector<2x16xf32> to vector<16xf32>
    %529 = vector.shape_cast %528 : vector<16xf32> to vector<1x16xf32>
    %530 = arith.addf %482, %526 : vector<1x16xf32>
    %531 = arith.addf %485, %529 : vector<1x16xf32>
    %c0_408 = arith.constant 0 : index
    %c0_409 = arith.constant 0 : index
    %532 = vector.load %arg36[%c0_408, %c0_409] : memref<16x8xf32, #tpu.memory_space<vmem>>, vector<16x8xf32>
    %cst_410 = arith.constant dense<0.000000e+00> : vector<1x8xf32>
    %533 = tpu.matmul %530, %532, %cst_410 {dimension_numbers = #tpu.dot_dimension_numbers<[1], [0], [0], [1], [0, 0, 1, 1], [], []>} : vector<1x16xf32>, vector<16x8xf32>, vector<1x8xf32> -> vector<1x8xf32>
    %c0_411 = arith.constant 0 : index
    %c0_412 = arith.constant 0 : index
    %534 = vector.load %arg36[%c0_411, %c0_412] : memref<16x8xf32, #tpu.memory_space<vmem>>, vector<16x8xf32>
    %cst_413 = arith.constant dense<0.000000e+00> : vector<1x8xf32>
    %535 = tpu.matmul %531, %534, %cst_413 {dimension_numbers = #tpu.dot_dimension_numbers<[1], [0], [0], [1], [0, 0, 1, 1], [], []>} : vector<1x16xf32>, vector<16x8xf32>, vector<1x8xf32> -> vector<1x8xf32>
    %cst_414 = arith.constant 1.250000e-01 : f32
    %536 = vector.broadcast %cst_414 : f32 to vector<1x8xf32>
    %537 = arith.mulf %533, %536 : vector<1x8xf32>
    %cst_415 = arith.constant 1.250000e-01 : f32
    %538 = vector.broadcast %cst_415 : f32 to vector<1x8xf32>
    %539 = arith.mulf %535, %538 : vector<1x8xf32>
    %540 = arith.mulf %537, %537 : vector<1x8xf32>
    %541 = arith.subf %539, %540 : vector<1x8xf32>
    %c0_416 = arith.constant 0 : index
    %c0_417 = arith.constant 0 : index
    %542 = vector.load %arg34[%c0_416, %c0_417] : memref<1x8xf32, #tpu.memory_space<vmem>>, vector<1x8xf32>
    %cst_418 = arith.constant 9.99999974E-6 : f32
    %543 = vector.broadcast %cst_418 : f32 to vector<1x8xf32>
    %544 = arith.addf %541, %543 : vector<1x8xf32>
    %545 = math.rsqrt %544 : vector<1x8xf32>
    %546 = arith.mulf %542, %545 : vector<1x8xf32>
    %c0_419 = arith.constant 0 : index
    %c0_420 = arith.constant 0 : index
    %547 = vector.load %arg35[%c0_419, %c0_420] : memref<1x8xf32, #tpu.memory_space<vmem>>, vector<1x8xf32>
    %548 = arith.mulf %546, %537 : vector<1x8xf32>
    %549 = arith.subf %547, %548 : vector<1x8xf32>
    %c0_421 = arith.constant 0 : index
    %c0_422 = arith.constant 0 : index
    %550 = vector.load %arg37[%c0_421, %c0_422] : memref<8x16xf32, #tpu.memory_space<vmem>>, vector<8x16xf32>
    %cst_423 = arith.constant dense<0.000000e+00> : vector<1x16xf32>
    %551 = tpu.matmul %546, %550, %cst_423 {dimension_numbers = #tpu.dot_dimension_numbers<[1], [0], [0], [1], [0, 0, 1, 1], [], []>} : vector<1x8xf32>, vector<8x16xf32>, vector<1x16xf32> -> vector<1x16xf32>
    %c0_424 = arith.constant 0 : index
    %c0_425 = arith.constant 0 : index
    %552 = vector.load %arg37[%c0_424, %c0_425] : memref<8x16xf32, #tpu.memory_space<vmem>>, vector<8x16xf32>
    %cst_426 = arith.constant dense<0.000000e+00> : vector<1x16xf32>
    %553 = tpu.matmul %549, %552, %cst_426 {dimension_numbers = #tpu.dot_dimension_numbers<[1], [0], [0], [1], [0, 0, 1, 1], [], []>} : vector<1x8xf32>, vector<8x16xf32>, vector<1x16xf32> -> vector<1x16xf32>
    %554 = vector.broadcast %551 : vector<1x16xf32> to vector<2x16xf32>
    %555 = arith.mulf %554, %480 : vector<2x16xf32>
    %556 = vector.broadcast %553 : vector<1x16xf32> to vector<2x16xf32>
    %557 = arith.addf %555, %556 : vector<2x16xf32>
    %558 = vector.broadcast %551 : vector<1x16xf32> to vector<2x16xf32>
    %559 = arith.mulf %558, %524 : vector<2x16xf32>
    %560 = vector.broadcast %553 : vector<1x16xf32> to vector<2x16xf32>
    %561 = arith.addf %559, %560 : vector<2x16xf32>
    %c0_427 = arith.constant 0 : index
    %c0_428 = arith.constant 0 : index
    %562 = vector.load %arg40[%c0_427, %c0_428] : memref<1x128xf32, #tpu.memory_space<vmem>>, vector<1x128xf32>
    %563 = vector.extract_strided_slice %557 {offsets = [0, 0], sizes = [1, 16], strides = [1, 1]} : vector<2x16xf32> to vector<1x16xf32>
    %c0_429 = arith.constant 0 : index
    %c0_430 = arith.constant 0 : index
    %564 = vector.load %arg39[%c0_429, %c0_430] : memref<32x128xf32, #tpu.memory_space<vmem>>, vector<16x128xf32>
    %cst_431 = arith.constant dense<0.000000e+00> : vector<1x128xf32>
    %565 = tpu.matmul %563, %564, %cst_431 {dimension_numbers = #tpu.dot_dimension_numbers<[1], [0], [0], [1], [0, 0, 1, 1], [], []>} : vector<1x16xf32>, vector<16x128xf32>, vector<1x128xf32> -> vector<1x128xf32>
    %566 = arith.addf %562, %565 : vector<1x128xf32>
    %567 = vector.extract_strided_slice %557 {offsets = [1, 0], sizes = [1, 16], strides = [1, 1]} : vector<2x16xf32> to vector<1x16xf32>
    %c16 = arith.constant 16 : index
    %c0_432 = arith.constant 0 : index
    %568 = vector.load %arg39[%c16, %c0_432] : memref<32x128xf32, #tpu.memory_space<vmem>>, vector<16x128xf32>
    %cst_433 = arith.constant dense<0.000000e+00> : vector<1x128xf32>
    %569 = tpu.matmul %567, %568, %cst_433 {dimension_numbers = #tpu.dot_dimension_numbers<[1], [0], [0], [1], [0, 0, 1, 1], [], []>} : vector<1x16xf32>, vector<16x128xf32>, vector<1x128xf32> -> vector<1x128xf32>
    %570 = arith.addf %566, %569 : vector<1x128xf32>
    %cst_434 = arith.constant 0.000000e+00 : f32
    %571 = vector.broadcast %cst_434 : f32 to vector<1x128xf32>
    %572 = arith.maximumf %570, %571 : vector<1x128xf32>
    %573 = arith.mulf %572, %572 : vector<1x128xf32>
    %c0_435 = arith.constant 0 : index
    %c0_436 = arith.constant 0 : index
    %574 = vector.load %arg40[%c0_435, %c0_436] : memref<1x128xf32, #tpu.memory_space<vmem>>, vector<1x128xf32>
    %575 = vector.extract_strided_slice %561 {offsets = [0, 0], sizes = [1, 16], strides = [1, 1]} : vector<2x16xf32> to vector<1x16xf32>
    %c0_437 = arith.constant 0 : index
    %c0_438 = arith.constant 0 : index
    %576 = vector.load %arg39[%c0_437, %c0_438] : memref<32x128xf32, #tpu.memory_space<vmem>>, vector<16x128xf32>
    %cst_439 = arith.constant dense<0.000000e+00> : vector<1x128xf32>
    %577 = tpu.matmul %575, %576, %cst_439 {dimension_numbers = #tpu.dot_dimension_numbers<[1], [0], [0], [1], [0, 0, 1, 1], [], []>} : vector<1x16xf32>, vector<16x128xf32>, vector<1x128xf32> -> vector<1x128xf32>
    %578 = arith.addf %574, %577 : vector<1x128xf32>
    %579 = vector.extract_strided_slice %561 {offsets = [1, 0], sizes = [1, 16], strides = [1, 1]} : vector<2x16xf32> to vector<1x16xf32>
    %c16_440 = arith.constant 16 : index
    %c0_441 = arith.constant 0 : index
    %580 = vector.load %arg39[%c16_440, %c0_441] : memref<32x128xf32, #tpu.memory_space<vmem>>, vector<16x128xf32>
    %cst_442 = arith.constant dense<0.000000e+00> : vector<1x128xf32>
    %581 = tpu.matmul %579, %580, %cst_442 {dimension_numbers = #tpu.dot_dimension_numbers<[1], [0], [0], [1], [0, 0, 1, 1], [], []>} : vector<1x16xf32>, vector<16x128xf32>, vector<1x128xf32> -> vector<1x128xf32>
    %582 = arith.addf %578, %581 : vector<1x128xf32>
    %cst_443 = arith.constant 0.000000e+00 : f32
    %583 = vector.broadcast %cst_443 : f32 to vector<1x128xf32>
    %584 = arith.maximumf %582, %583 : vector<1x128xf32>
    %585 = arith.addf %572, %584 : vector<1x128xf32>
    %586 = arith.mulf %584, %584 : vector<1x128xf32>
    %587 = arith.addf %573, %586 : vector<1x128xf32>
    %cst_444 = arith.constant 5.000000e-01 : f32
    %588 = vector.broadcast %cst_444 : f32 to vector<1x128xf32>
    %589 = arith.mulf %585, %588 : vector<1x128xf32>
    %cst_445 = arith.constant 5.000000e-01 : f32
    %590 = vector.broadcast %cst_445 : f32 to vector<1x128xf32>
    %591 = arith.mulf %587, %590 : vector<1x128xf32>
    %592 = arith.mulf %589, %589 : vector<1x128xf32>
    %593 = arith.subf %591, %592 : vector<1x128xf32>
    %c0_446 = arith.constant 0 : index
    %c0_447 = arith.constant 0 : index
    %594 = vector.load %arg41[%c0_446, %c0_447] : memref<1x128xf32, #tpu.memory_space<vmem>>, vector<1x128xf32>
    %cst_448 = arith.constant 9.99999974E-6 : f32
    %595 = vector.broadcast %cst_448 : f32 to vector<1x128xf32>
    %596 = arith.addf %593, %595 : vector<1x128xf32>
    %597 = math.rsqrt %596 : vector<1x128xf32>
    %598 = arith.mulf %594, %597 : vector<1x128xf32>
    %c0_449 = arith.constant 0 : index
    %c0_450 = arith.constant 0 : index
    %599 = vector.load %arg42[%c0_449, %c0_450] : memref<1x128xf32, #tpu.memory_space<vmem>>, vector<1x128xf32>
    %600 = arith.mulf %598, %589 : vector<1x128xf32>
    %601 = arith.subf %599, %600 : vector<1x128xf32>
    %602 = arith.mulf %598, %572 : vector<1x128xf32>
    %603 = arith.addf %602, %601 : vector<1x128xf32>
    %c0_451 = arith.constant 0 : index
    %c0_452 = arith.constant 0 : index
    %604 = vector.load %arg43[%c0_451, %c0_452] : memref<128x41xf32, #tpu.memory_space<vmem>>, vector<128x41xf32>
    %cst_453 = arith.constant dense<0.000000e+00> : vector<1x41xf32>
    %605 = tpu.matmul %603, %604, %cst_453 {dimension_numbers = #tpu.dot_dimension_numbers<[1], [0], [0], [1], [0, 0, 1, 1], [], []>} : vector<1x128xf32>, vector<128x41xf32>, vector<1x41xf32> -> vector<1x41xf32>
    %c0_454 = arith.constant 0 : index
    %c0_455 = arith.constant 0 : index
    %606 = vector.load %arg44[%c0_454, %c0_455] : memref<1x41xf32, #tpu.memory_space<vmem>>, vector<1x41xf32>
    %607 = arith.addf %605, %606 : vector<1x41xf32>
    %cst_456 = arith.constant dense<0xFF800000> : vector<1xf32>
    %608 = vector.multi_reduction <maximumf>, %607, %cst_456 [1] : vector<1x41xf32> to vector<1xf32>
    %609 = vector.shape_cast %608 : vector<1xf32> to vector<1x1xf32>
    %610 = vector.broadcast %609 : vector<1x1xf32> to vector<1x41xf32>
    %611 = arith.subf %607, %610 : vector<1x41xf32>
    %612 = math.exp %611 : vector<1x41xf32>
    %cst_457 = arith.constant dense<0.000000e+00> : vector<1xf32>
    %613 = vector.multi_reduction <add>, %612, %cst_457 [1] : vector<1x41xf32> to vector<1xf32>
    %614 = vector.shape_cast %613 : vector<1xf32> to vector<1x1xf32>
    %615 = vector.broadcast %614 : vector<1x1xf32> to vector<1x41xf32>
    %616 = arith.divf %612, %615 : vector<1x41xf32>
    %c0_458 = arith.constant 0 : index
    %c0_459 = arith.constant 0 : index
    %617 = vector.load %arg45[%c0_458, %c0_459] : memref<2x41xf32, #tpu.memory_space<vmem>>, vector<1x41xf32>
    tpu.vector_store %arg45[%c0_458, %c0_459], %616 {strides = array<i32>} : memref<2x41xf32, #tpu.memory_space<vmem>>, vector<1x41xf32>,
    %618 = arith.mulf %598, %584 : vector<1x128xf32>
    %619 = arith.addf %618, %601 : vector<1x128xf32>
    %c0_460 = arith.constant 0 : index
    %c0_461 = arith.constant 0 : index
    %620 = vector.load %arg43[%c0_460, %c0_461] : memref<128x41xf32, #tpu.memory_space<vmem>>, vector<128x41xf32>
    %cst_462 = arith.constant dense<0.000000e+00> : vector<1x41xf32>
    %621 = tpu.matmul %619, %620, %cst_462 {dimension_numbers = #tpu.dot_dimension_numbers<[1], [0], [0], [1], [0, 0, 1, 1], [], []>} : vector<1x128xf32>, vector<128x41xf32>, vector<1x41xf32> -> vector<1x41xf32>
    %c0_463 = arith.constant 0 : index
    %c0_464 = arith.constant 0 : index
    %622 = vector.load %arg44[%c0_463, %c0_464] : memref<1x41xf32, #tpu.memory_space<vmem>>, vector<1x41xf32>
    %623 = arith.addf %621, %622 : vector<1x41xf32>
    %cst_465 = arith.constant dense<0xFF800000> : vector<1xf32>
    %624 = vector.multi_reduction <maximumf>, %623, %cst_465 [1] : vector<1x41xf32> to vector<1xf32>
    %625 = vector.shape_cast %624 : vector<1xf32> to vector<1x1xf32>
    %626 = vector.broadcast %625 : vector<1x1xf32> to vector<1x41xf32>
    %627 = arith.subf %623, %626 : vector<1x41xf32>
    %628 = math.exp %627 : vector<1x41xf32>
    %cst_466 = arith.constant dense<0.000000e+00> : vector<1xf32>
    %629 = vector.multi_reduction <add>, %628, %cst_466 [1] : vector<1x41xf32> to vector<1xf32>
    %630 = vector.shape_cast %629 : vector<1xf32> to vector<1x1xf32>
    %631 = vector.broadcast %630 : vector<1x1xf32> to vector<1x41xf32>
    %632 = arith.divf %628, %631 : vector<1x41xf32>
    %c1_467 = arith.constant 1 : index
    %c0_468 = arith.constant 0 : index
    %633 = vector.load %arg45[%c1_467, %c0_468] : memref<2x41xf32, #tpu.memory_space<vmem>>, vector<1x41xf32>
    tpu.vector_store %arg45[%c1_467, %c0_468], %632 {strides = array<i32>} : memref<2x41xf32, #tpu.memory_space<vmem>>, vector<1x41xf32>,
    return
  }
}

</mosaic_0001>

<bundles_post_ra>
// kernel: forward.1
= control target key start
LH: loop header
LB: loop body
LE: loop exit
PB: predicated region body
PF: predicated region fallthrough
CT: control target
= control target key end

     0   :  { %s4269_s6 = smov 1   ;;  %s4270_s10 = smov 2   ;;  %s5917_s0 = inlined_call_operand.smem [shape: u32[46], index: -1, kind: input, shape index: {}] }
   0x1   :  { %s4323_s5 = sld [smem:[%s5917_s0]]   ;;  %s4271_s14 = smov 3  }
   0x2   :  { %s4328_s9 = sld [smem:[%s5917_s0 + %s4269_s6]]   ;;  %s4272_s18 = smov 4  }
   0x3   :  { %s4333_s13 = sld [smem:[%s5917_s0 + %s4270_s10]]   ;;  %s4273_s22 = smov 5  }
   0x4   :  { %s4338_s17 = sld [smem:[%s5917_s0 + %s4271_s14]]   ;;  %s4274_s26 = smov 6  }
   0x5   :  { %s4343_s21 = sld [smem:[%s5917_s0 + %s4272_s18]]   ;;  %s4275_s30 = smov 7  }
   0x6   :  { %s4348_s25 = sld [smem:[%s5917_s0 + %s4273_s22]]   ;;  %s4276_s4 = smov 8  }
   0x7   :  { %s4353_s29 = sld [smem:[%s5917_s0 + %s4274_s26]]   ;;  %s4277_s10 = smov 9  }
   0x8   :  { %s4358_s3 = sld [smem:[%s5917_s0 + %s4275_s30]]   ;;  %s4278_s15 = smov 10  }
   0x9   :  { %s4363_s8 = sld [smem:[%s5917_s0 + %s4276_s4]]   ;;  %s4279_s20 = smov 11  }
   0xa   :  { %s4368_s14 = sld [smem:[%s5917_s0 + %s4277_s10]]   ;;  %s4280_s26 = smov 12  }
   0xb   :  { %s4373_s19 = sld [smem:[%s5917_s0 + %s4278_s15]]   ;;  %s4281_s1 = smov 13  }
   0xc   :  { %s4378_s24 = sld [smem:[%s5917_s0 + %s4279_s20]]   ;;  %s4282_s7 = smov 14  }
   0xd   :  { %s4383_s30 = sld [smem:[%s5917_s0 + %s4280_s26]]   ;;  %s4283_s15 = smov 15  }
   0xe   :  { %s4388_s6 = sld [smem:[%s5917_s0 + %s4281_s1]]   ;;  %s4284_s22 = smov 16  }
   0xf   :  { %s4393_s12 = sld [smem:[%s5917_s0 + %s4282_s7]]   ;;  %s4285_s28 = smov 17  }
  0x10   :  { %s4398_s20 = sld [smem:[%s5917_s0 + %s4283_s15]]   ;;  %s4286_s7 = smov 18  }
  0x11   :  { %s4403_s27 = sld [smem:[%s5917_s0 + %s4284_s22]]   ;;  %s4287_s15 = smov 19  }
  0x12   :  { %s4408_s4 = sld [smem:[%s5917_s0 + %s4285_s28]]   ;;  %s4288_s22 = smov 20  }
  0x13   :  { %s4289_s28 = smov 21  }
  0x15   :  { %5928 = sst [smem:[#allocation5_spill]] %s4393_s12 }
  0x16   :  { %5929 = sst [smem:[#allocation6_spill]] %s4398_s20 }
  0x17   :  { %5930 = sst [smem:[#allocation7_spill]] %s4403_s27 }
  0x18   :  { %5931 = sst [smem:[#allocation8_spill]] %s4408_s4 }
  0x19   :  { %s4413_s12 = sld [smem:[%s5917_s0 + %s4286_s7]]   ;;  %s4290_s7 = smov 22  }
  0x1a   :  { %s4418_s20 = sld [smem:[%s5917_s0 + %s4287_s15]]   ;;  %s4291_s15 = smov 23  }
  0x1b   :  { %s4423_s27 = sld [smem:[%s5917_s0 + %s4288_s22]]   ;;  %s4292_s22 = smov 24  }
  0x1c   :  { %s4428_s4 = sld [smem:[%s5917_s0 + %s4289_s28]]   ;;  %s4293_s28 = smov 25  }
  0x1f   :  { %5932 = sst [smem:[#allocation9_spill]] %s4413_s12 }
  0x20   :  { %5933 = sst [smem:[#allocation10_spill]] %s4418_s20 }
  0x21   :  { %5934 = sst [smem:[#allocation11_spill]] %s4423_s27 }
  0x22   :  { %5935 = sst [smem:[#allocation12_spill]] %s4428_s4 }
  0x23   :  { %s4433_s12 = sld [smem:[%s5917_s0 + %s4290_s7]]   ;;  %s4294_s7 = smov 26  }
  0x24   :  { %s4438_s20 = sld [smem:[%s5917_s0 + %s4291_s15]]   ;;  %s4295_s15 = smov 27  }
  0x25   :  { %s4443_s27 = sld [smem:[%s5917_s0 + %s4292_s22]]   ;;  %s4296_s22 = smov 28  }
  0x26   :  { %s4448_s4 = sld [smem:[%s5917_s0 + %s4293_s28]]   ;;  %s4297_s28 = smov 29  }
  0x29   :  { %5936 = sst [smem:[#allocation13_spill]] %s4433_s12 }
  0x2a   :  { %5937 = sst [smem:[#allocation14_spill]] %s4438_s20 }
  0x2b   :  { %5938 = sst [smem:[#allocation15_spill]] %s4443_s27 }
  0x2c   :  { %5939 = sst [smem:[#allocation16_spill]] %s4448_s4 }
  0x2d   :  { %s4453_s12 = sld [smem:[%s5917_s0 + %s4294_s7]]   ;;  %s4298_s7 = smov 30  }
  0x2e   :  { %s4458_s20 = sld [smem:[%s5917_s0 + %s4295_s15]]   ;;  %s4299_s15 = smov 31  }
  0x2f   :  { %s4463_s27 = sld [smem:[%s5917_s0 + %s4296_s22]]   ;;  %s4300_s22 = smov 32  }
  0x30   :  { %s4468_s4 = sld [smem:[%s5917_s0 + %s4297_s28]]   ;;  %s4301_s28 = smov 33  }
  0x33   :  { %5940 = sst [smem:[#allocation17_spill]] %s4453_s12 }
  0x34   :  { %5941 = sst [smem:[#allocation18_spill]] %s4458_s20 }
  0x35   :  { %5942 = sst [smem:[#allocation19_spill]] %s4463_s27 }
  0x36   :  { %5943 = sst [smem:[#allocation20_spill]] %s4468_s4 }
  0x37   :  { %s4473_s12 = sld [smem:[%s5917_s0 + %s4298_s7]]   ;;  %s4302_s7 = smov 34  }
  0x38   :  { %s4478_s20 = sld [smem:[%s5917_s0 + %s4299_s15]]   ;;  %s4303_s15 = smov 35  }
  0x39   :  { %s4483_s27 = sld [smem:[%s5917_s0 + %s4300_s22]]   ;;  %s4304_s22 = smov 36  }
  0x3a   :  { %s4488_s4 = sld [smem:[%s5917_s0 + %s4301_s28]]   ;;  %s4305_s28 = smov 37  }
  0x3d   :  { %5944 = sst [smem:[#allocation21_spill]] %s4473_s12 }
  0x3e   :  { %5945 = sst [smem:[#allocation22_spill]] %s4478_s20 }
  0x3f   :  { %5946 = sst [smem:[#allocation23_spill]] %s4483_s27 }
  0x40   :  { %5947 = sst [smem:[#allocation24_spill]] %s4488_s4 }
  0x41   :  { %s4493_s12 = sld [smem:[%s5917_s0 + %s4302_s7]]   ;;  %s4306_s7 = smov 38  }
  0x42   :  { %s4498_s20 = sld [smem:[%s5917_s0 + %s4303_s15]]   ;;  %s4307_s15 = smov 39  }
  0x43   :  { %s4503_s27 = sld [smem:[%s5917_s0 + %s4304_s22]]   ;;  %s4308_s22 = smov 40  }
  0x44   :  { %s4508_s4 = sld [smem:[%s5917_s0 + %s4305_s28]]   ;;  %s4309_s28 = smov 41  }
  0x47   :  { %5948 = sst [smem:[#allocation25_spill]] %s4493_s12 }
  0x48   :  { %5949 = sst [smem:[#allocation26_spill]] %s4498_s20 }
  0x49   :  { %5950 = sst [smem:[#allocation27_spill]] %s4503_s27 }
  0x4a   :  { %5951 = sst [smem:[#allocation28_spill]] %s4508_s4 }
  0x4b   :  { %s4513_s12 = sld [smem:[%s5917_s0 + %s4306_s7]]   ;;  %s4310_s7 = smov 42  }
  0x4c   :  { %s4518_s20 = sld [smem:[%s5917_s0 + %s4307_s15]]   ;;  %s4311_s15 = smov 43  }
  0x4d   :  { %s4523_s27 = sld [smem:[%s5917_s0 + %s4308_s22]]   ;;  %s4312_s22 = smov 44  }
  0x4e   :  { %s4528_s4 = sld [smem:[%s5917_s0 + %s4309_s28]]   ;;  %s4313_s28 = smov 45  }
  0x51   :  { %5952 = sst [smem:[#allocation29_spill]] %s4513_s12 }
  0x52   :  { %5953 = sst [smem:[#allocation30_spill]] %s4518_s20 }
  0x53   :  { %5954 = sst [smem:[#allocation31_spill]] %s4523_s27 }
  0x54   :  { %5955 = sst [smem:[#allocation32_spill]] %s4528_s4 }
  0x55   :  { %s4533_s12 = sld [smem:[%s5917_s0 + %s4310_s7]]  }
  0x56   :  { %s4538_s20 = sld [smem:[%s5917_s0 + %s4311_s15]]  }
  0x57   :  { %s4543_s27 = sld [smem:[%s5917_s0 + %s4312_s22]]  }
  0x58   :  { %s4548_s4 = sld [smem:[%s5917_s0 + %s4313_s28]]  }
  0x59   :  { %v3832_v0 = vld [vmem:[%s4328_s9 + $0x38] sm:$0xff]  ;;  %v3831_v3 = vld [vmem:[%s4328_s9 + $0x30] sm:$0xff]  ;;  %v3830_v6 = vld [vmem:[%s4328_s9 + $0x28] sm:$0xff]  ;;  %vm208_vm0 = vcmask 1046528   ;;  %vm216_vm1 = vcmask 261120   ;;  %vm296_vm2 = vcmask 1045504  }
  0x5a   :  { %v198_v1 = vld [vmem:[%s4328_s9 + $0x18] sm:$0xff]  ;;  %237 = vmatpush.msra.mxu0 %v3832_v0  ;;  %v197_v4 = vld [vmem:[%s4328_s9 + $0x10] sm:$0xff]  ;;  %v196_v7 = vld [vmem:[%s4328_s9 + $0x8] sm:$0xff]  ;;  %420 = vmatpush.msra.mxu3 %v3832_v0 }
  0x5b   :  { %v3844_v2 = vld [vmem:[%s4328_s9 + $0x58] sm:$0xff]  ;;  %274 = vmatpush.msra.mxu1 %v198_v1  ;;  %v3843_v5 = vld [vmem:[%s4328_s9 + $0x50] sm:$0xff]  ;;  %v3842_v8 = vld [vmem:[%s4328_s9 + $0x48] sm:$0xff] }
  0x5c   :  { %324 = vmatpush.msra.mxu2 %v3844_v2  ;;  %238 = vmatpush.msra.mxu0 %v3831_v3  ;;  %v3829_v9 = vld [vmem:[%s4328_s9 + $0x20] sm:$0xff]  ;;  %v188_v12 = vld [vmem:[%s4323_s5 + $0x8] sm:$0xff]  ;;  %v189_v19 = vld [vmem:[%s4323_s5 + $0x10] sm:$0xff] }
  0x5d   :  { %275 = vmatpush.msra.mxu1 %v197_v4  ;;  %v195_v10 = vld [vmem:[%s4328_s9] sm:$0xff]  ;;  %421 = vmatpush.msra.mxu3 %v3831_v3  ;;  %v210_v15 = vrot.slane %v188_v12, 1  ;;  %v298_v17 = vrot.slane %v188_v12, 2  ;;  %v192_v20 = vld [vmem:[%s4323_s5 + $0x28] sm:$0xff]  ;;  %v212_v25 = vrot.slane %v189_v19, 1  ;;  %v300_v26 = vrot.slane %v189_v19, 2 }
  0x5e   :  { %325 = vmatpush.msra.mxu2 %v3843_v5  ;;  %v187_v11 = vld [vmem:[%s4323_s5] sm:$0xff]  ;;  %239 = vmatpush.msra.mxu0 %v3830_v6  ;;  %v394_v24 = vrot.slane %v192_v20, 1 }
  0x5f   :  { %276 = vmatpush.msra.mxu1 %v196_v7  ;;  %v3841_v13 = vld [vmem:[%s4328_s9 + $0x40] sm:$0xff]  ;;  %v209_v14 = vrot.slane %v187_v11, 1  ;;  %v297_v16 = vrot.slane %v187_v11, 2  ;;  %422 = vmatpush.msra.mxu3 %v3830_v6 }
  0x60   :  { %v191_v18 = vld [vmem:[%s4323_s5 + $0x20] sm:$0xff]  ;;  %326 = vmatpush.msra.mxu2 %v3842_v8  ;;  %240 = vmatpush.msra.mxu0 %v3829_v9 }
  0x61   :  { %277 = vmatpush.msra.mxu1 %v195_v10  ;;  %v211_v21 = vsel %vm208_vm0, %v209_v14, %v210_v15  ;;  %v299_v22 = vsel %vm296_vm2, %v297_v16, %v298_v17  ;;  %v393_v23 = vrot.slane %v191_v18, 1 }
  0x62   :  { %327 = vmatpush.msra.mxu2 %v3841_v13  ;;  %3833 = vmatmul.msk.f32.vlgmr.msra.gmra.mxu0 %vm216_vm1, %v211_v21 }
  0x63   :  { %3837 = vmatmul.msk.f32.vlgmr.msra.gmra.mxu1 %vm216_vm1, %v187_v11  ;;  %3845 = vmatmul.msk.f32.vlgmr.msra.gmra.mxu2 %vm216_vm1, %v299_v22  ;;  %v395_v27 = vsel %vm208_vm0, %v393_v23, %v394_v24 }
  0x64   :  { %457 = vmatpush.msrb.mxu0 %v198_v1  ;;  %501 = vmatpush.msrb.mxu1 %v3844_v2 }
  0x65   :  { %96 = vsyncpa [#allocation3], 0  ;;  %423 = vmatpush.msra.mxu3 %v3829_v9  ;;  %v193_v28 = vld [vmem:[%s4323_s5 + $0x30] sm:$0xff]  ;;  %v213_v29 = vsel %vm208_vm0, %v210_v15, %v212_v25  ;;  %v301_v30 = vsel %vm296_vm2, %v298_v17, %v300_v26  ;;  %v190_v31 = vld [vmem:[%s4323_s5 + $0x18] sm:$0xff]  ;;  %v474_v41 = vrot.slane %v191_v18, 2  ;;  %v475_v42 = vrot.slane %v192_v20, 2 }
  0x66   :  { %458 = vmatpush.msrb.mxu0 %v197_v4  ;;  %502 = vmatpush.msrb.mxu1 %v3843_v5  ;;  %v396_v32 = vrot.slane %v193_v28, 1  ;;  %v214_v33 = vrot.slane %v190_v31, 1  ;;  %v302_v34 = vrot.slane %v190_v31, 2  ;;  %v194_v36 = vld [vmem:[%s4323_s5 + $0x38] sm:$0xff]  ;;  %v477_v44 = vrot.slane %v193_v28, 2  ;;  %v576_v56 = vld [vmem:[%s4348_s25 + $0x70] sm:$0xff] }
  0x67   :  { %3849 = vmatmul.msk.f32.vlgmr.msra.gmra.mxu3 %vm216_vm1, %v395_v27  ;;  %v398_v39 = vrot.slane %v194_v36, 1  ;;  %v476_v43 = vsel %vm296_vm2, %v474_v41, %v475_v42  ;;  %v479_v46 = vrot.slane %v194_v36, 2  ;;  %581 = vmatpush.msrb.mxu2 %v576_v56  ;;  %v575_v58 = vld [vmem:[%s4348_s25 + $0x68] sm:$0xff]  ;;  %v574_v62 = vld [vmem:[%s4348_s25 + $0x60] sm:$0xff]  ;;  %v573_v63 = vld [vmem:[%s4348_s25 + $0x58] sm:$0xff]  ;;  %vm357_vm3 = vcmask 982016  }
  0x68   :  { %459 = vmatpush.msrb.mxu0 %v196_v7  ;;  %503 = vmatpush.msrb.mxu1 %v3842_v8  ;;  %v397_v35 = vsel %vm208_vm0, %v394_v24, %v396_v32  ;;  %v215_v37 = vsel %vm208_vm0, %v212_v25, %v214_v33  ;;  %v303_v38 = vsel %vm296_vm2, %v300_v26, %v302_v34  ;;  %v572_v0 = vld [vmem:[%s4348_s25 + $0x50] sm:$0xff]  ;;  %v571_v2 = vld [vmem:[%s4348_s25 + $0x48] sm:$0xff]  ;;  %v570_v8 = vld [vmem:[%s4348_s25 + $0x40] sm:$0xff]  ;;  %vm363_vm4 = vcmask 979968   ;;  %s5956_s0 = sld [smem:[#allocation10_spill]] }
  0x69   :  { %v399_v40 = vsel %vm208_vm0, %v396_v32, %v398_v39  ;;  %v478_v45 = vsel %vm296_vm2, %v475_v42, %v477_v44  ;;  %v480_v47 = vsel %vm296_vm2, %v477_v44, %v479_v46  ;;  %604 = vmatpush.msrb.mxu3 %v576_v56  ;;  %582 = vmatpush.msrb.mxu2 %v575_v58  ;;  %v569_v15 = vld [vmem:[%s4348_s25 + $0x38] sm:$0xff]  ;;  %v566_v22 = vld [vmem:[%s4348_s25 + $0x20] sm:$0xff]  ;;  %v564_v32 = vld [vmem:[%s4348_s25 + $0x10] sm:$0xff]  ;;  %vm648_vm5 = vcmask 1043456   ;;  %s5957_s5 = sld [smem:[#allocation5_spill]] }
  0x6a   :  { %3834 = vmatmul.msk.f32.gmra.mxu0 %vm216_vm1, %v213_v29  ;;  %504 = vmatpush.msrb.mxu1 %v3841_v13  ;;  %v565_v27 = vld [vmem:[%s4348_s25 + $0x18] sm:$0xff]  ;;  %v562_v42 = vld [vmem:[%s4348_s25] sm:$0xff]  ;;  %vm644_vm9 = vcmask 31744   ;;  %vm905_vm10 = vcmask 916480   ;;  %vm911_vm11 = vcmask 912384   ;;  %vm1260_vm15 = vcmask 228352  }
  0x6b   :  { %3838 = vmatmul.msk.f32.gmra.mxu1 %vm216_vm1, %v188_v12  ;;  %3846 = vmatmul.msk.f32.gmra.mxu2 %vm216_vm1, %v301_v30  ;;  %s5958_s9 = sld [smem:[#allocation8_spill]] }
  0x6c   :  { %460 = vmatpush.msrb.mxu0 %v195_v10  ;;  %605 = vmatpush.msrb.mxu3 %v575_v58  ;;  %v4614_v10 = vld [vmem:[%s4333_s13] ss:$0 sm:$0xff]  ;;  %s5959_s13 = sld [smem:[#allocation9_spill]] }
  0x6d   :  { %583 = vmatpush.msrb.mxu2 %v574_v62  ;;  %s5971_s7 = sld [smem:[#allocation22_spill]] }
  0x6e   :  { %606 = vmatpush.msrb.mxu3 %v574_v62  ;;  %s5972_s10 = sld [smem:[#allocation19_spill]] }
  0x6f   :  { %3850 = vmatmul.msk.f32.gmra.mxu3 %vm216_vm1, %v397_v35  ;;  %584 = vmatpush.msrb.mxu2 %v573_v63  ;;  %s5973_s11 = sld [smem:[#allocation20_spill]] }
  0x70   :  { %607 = vmatpush.msrb.mxu3 %v573_v63  ;;  %s5974_s15 = sld [smem:[#allocation23_spill]] }
  0x71   :  { %585 = vmatpush.msrb.mxu2 %v572_v0  ;;  %s5975_s16 = sld [smem:[#allocation29_spill]] }
  0x72   :  { %3835 = vmatmul.msk.f32.gmra.mxu0 %vm216_vm1, %v215_v37  ;;  %608 = vmatpush.msrb.mxu3 %v572_v0  ;;  %v563_v37 = vld [vmem:[%s4348_s25 + $0x8] sm:$0xff]  ;;  %s5976_s18 = sld [smem:[#allocation24_spill]] }
  0x73   :  { %3839 = vmatmul.msk.f32.gmra.mxu1 %vm216_vm1, %v189_v19  ;;  %3847 = vmatmul.msk.f32.gmra.mxu2 %vm216_vm1, %v303_v38  ;;  %s5977_s22 = sld [smem:[#allocation27_spill]] }
  0x74   :  { %586 = vmatpush.msrb.mxu2 %v571_v2  ;;  %609 = vmatpush.msrb.mxu3 %v571_v2  ;;  %s5978_s23 = sld [smem:[#allocation28_spill]] }
  0x75   :  { %s5979_s26 = sld [smem:[#allocation25_spill]] }
  0x76   :  { %587 = vmatpush.msrb.mxu2 %v570_v8  ;;  %610 = vmatpush.msrb.mxu3 %v570_v8  ;;  %s5980_s28 = sld [smem:[#allocation26_spill]] }
  0x77   :  { %3851 = vmatmul.msk.f32.gmra.mxu3 %vm216_vm1, %v399_v40  ;;  %s5981_s1 = sld [smem:[#allocation30_spill]] }
  0x78   :  { %588 = vmatpush.msrb.mxu2 %v569_v15  ;;  %611 = vmatpush.msrb.mxu3 %v569_v15  ;;  %s5982_s2 = sld [smem:[#allocation31_spill]] }
  0x7a   :  { %3836 = vmatmul.msk.f32.gmra.mxu0 %vm216_vm1, %v214_v33 }
  0x7b   :  { %3840 = vmatmul.msk.f32.gmra.mxu1 %vm216_vm1, %v190_v31  ;;  %3848 = vmatmul.msk.f32.gmra.mxu2 %vm216_vm1, %v302_v34 }
  0x7f   :  { %3852 = vmatmul.msk.f32.gmra.mxu3 %vm216_vm1, %v398_v39 }
  0x82   :  { %3853 = vmatmul.msk.f32.vlgmr.msrb.gmra.mxu0 %vm216_vm1, %v191_v18  ;;  %v568_v18 = vld [vmem:[%s4348_s25 + $0x30] sm:$0xff] }
  0x83   :  { %3857 = vmatmul.msk.f32.vlgmr.msrb.gmra.mxu1 %vm216_vm1, %v476_v43  ;;  %589 = vmatpush.msrb.mxu2 %v568_v18 }
  0x84   :  { %612 = vmatpush.msrb.mxu3 %v568_v18 }
  0x8a   :  { %3854 = vmatmul.msk.f32.gmra.mxu0 %vm216_vm1, %v192_v20  ;;  %v567_v20 = vld [vmem:[%s4348_s25 + $0x28] sm:$0xff]  ;;  %s5962_s25 = sld [smem:[#allocation7_spill]] }
  0x8b   :  { %3858 = vmatmul.msk.f32.gmra.mxu1 %vm216_vm1, %v478_v45  ;;  %590 = vmatpush.msrb.mxu2 %v567_v20 }
  0x8c   :  { %613 = vmatpush.msrb.mxu3 %v567_v20 }
  0x8d   :  { %591 = vmatpush.msrb.mxu2 %v566_v22 }
  0x8e   :  { %614 = vmatpush.msrb.mxu3 %v566_v22 }
  0x8f   :  { %592 = vmatpush.msrb.mxu2 %v565_v27 }
  0x90   :  { %615 = vmatpush.msrb.mxu3 %v565_v27 }
  0x91   :  { %593 = vmatpush.msrb.mxu2 %v564_v32 }
  0x92   :  { %3855 = vmatmul.msk.f32.gmra.mxu0 %vm216_vm1, %v193_v28  ;;  %616 = vmatpush.msrb.mxu3 %v564_v32 }
  0x93   :  { %3859 = vmatmul.msk.f32.gmra.mxu1 %vm216_vm1, %v480_v47  ;;  %594 = vmatpush.msrb.mxu2 %v563_v37 }
  0x94   :  { %617 = vmatpush.msrb.mxu3 %v563_v37 }
  0x95   :  { %595 = vmatpush.msrb.mxu2 %v562_v42 }
  0x96   :  { %618 = vmatpush.msrb.mxu3 %v562_v42 }
  0x9a   :  { %3856 = vmatmul.msk.f32.gmra.mxu0 %vm216_vm1, %v194_v36 }
  0x9b   :  { %3860 = vmatmul.msk.f32.gmra.mxu1 %vm216_vm1, %v479_v46  ;;  %vm1656_vm1 = vcmask 388096  }
  0xdf   :  { %v242_v48 = vpop.f32.mrf.mxu0 }
  0xe0   :  { %v279_v49 = vpop.f32.mrf.mxu1 }
  0xe1   :  { %v280_v3 = vadd.f32 %v279_v49, %v242_v48 }
  0xe6   :  { %v329_v50 = vpop.f32.mrf.mxu2 }
  0xe7   :  { %v245_v51 = vpop.f32.mrf.mxu0  ;;  %v341_v9 = vadd.f32 %v329_v50, %v280_v3 }
  0xe8   :  { %v282_v52 = vpop.f32.mrf.mxu1 }
  0xe9   :  { %v283_v1 = vadd.f32 %v282_v52, %v245_v51  ;;  %v349_v19 = vadd.f32 %v4614_v10, %v341_v9 }
  0xea   :  { %v425_v57 = vpop.f32.mrf.mxu3 }
  0xeb   :  { %v4627_v28 = vmax.f32 %v349_v19, 0.0 }
  0xed   :  { %v372_v38 = vmul.f32 %v4627_v28, %v4627_v28  ;;  %v358_v43 = vsel %vm357_vm3, %v4627_v28, 0.0 }
  0xee   :  { %v332_v53 = vpop.f32.mrf.mxu2 }
  0xef   :  { %v248_v54 = vpop.f32.mrf.mxu0  ;;  %v342_v4 = vadd.f32 %v332_v53, %v283_v1  ;;  %v376_v51 = vsel %vm357_vm3, %v372_v38, 0.0 }
  0xf0   :  { %v285_v55 = vpop.f32.mrf.mxu1 }
  0xf1   :  { %v286_v6 = vadd.f32 %v285_v55, %v248_v54  ;;  %v350_v16 = vadd.f32 %v4614_v10, %v342_v4 }
  0xf2   :  { %v428_v12 = vpop.f32.mrf.mxu3 }
  0xf3   :  { %v4623_v23 = vmax.f32 %v350_v16, 0.0 }
  0xf5   :  { %v373_v33 = vmul.f32 %v4623_v23, %v4623_v23  ;;  %v359_v39 = vsel %vm357_vm3, %v4623_v23, 0.0 }
  0xf6   :  { %v335_v59 = vpop.f32.mrf.mxu2  ;;  %v360_v52 = vadd.f32 %v359_v39, %v358_v43 }
  0xf7   :  { %v251_v60 = vpop.f32.mrf.mxu0  ;;  %v343_v13 = vadd.f32 %v335_v59, %v286_v6  ;;  %v377_v44 = vsel %vm357_vm3, %v373_v33, 0.0 }
  0xf8   :  { %v288_v61 = vpop.f32.mrf.mxu1 }
  0xf9   :  { %v289_v14 = vadd.f32 %v288_v61, %v251_v60  ;;  %v351_v21 = vadd.f32 %v4614_v10, %v343_v13 }
  0xfa   :  { %v431_v34 = vpop.f32.mrf.mxu3 }
  0xfb   :  { %v4629_v30 = vmax.f32 %v351_v21, 0.0 }
  0xfd   :  { %v374_v40 = vmul.f32 %v4629_v30, %v4629_v30  ;;  %v361_v46 = vsel %vm357_vm3, %v4629_v30, 0.0 }
  0xfe   :  { %v338_v11 = vpop.f32.mrf.mxu2  ;;  %v362_v58 = vadd.f32 %v361_v46, %v360_v52 }
  0xff   :  { %v462_v5 = vpop.f32.mrf.mxu0  ;;  %v344_v17 = vadd.f32 %v338_v11, %v289_v14  ;;  %v379_v53 = vsel %vm357_vm3, %v374_v40, 0.0 }
 0x100   :  { %v506_v7 = vpop.f32.mrf.mxu1  ;;  %v463_v31 = vadd.f32 %v462_v5, %v425_v57  ;;  %v378_v57 = vadd.f32 %v377_v44, %v376_v51 }
 0x101   :  { %v352_v25 = vadd.f32 %v4614_v10, %v344_v17 }
 0x102   :  { %v518_v41 = vadd.f32 %v506_v7, %v463_v31  ;;  %v380_v62 = vadd.f32 %v379_v53, %v378_v57  ;;  %v434_v0 = vpop.f32.mrf.mxu3 }
 0x103   :  { %v4634_v35 = vmax.f32 %v352_v25, 0.0 }
 0x104   :  { %v522_v55 = vadd.f32 %v4614_v10, %v518_v41 }
 0x105   :  { %v375_v47 = vmul.f32 %v4634_v35, %v4634_v35  ;;  %v364_v54 = vsel %vm363_vm4, %v4634_v35, 0.0 }
 0x106   :  { %v365_v63 = vadd.f32 %v364_v54, %v362_v58  ;;  %v4661_v1 = vmax.f32 %v522_v55, 0.0  ;;  %v643_v58 = vld [vmem:[%s4353_s29] sm:$0xf]  ;;  %s5963_s29 = sld [smem:[#allocation15_spill]] }
 0x107   :  { %v465_v24 = vpop.f32.mrf.mxu0  ;;  %v381_v59 = vsel %vm363_vm4, %v375_v47, 0.0  ;;  %3863 = vmatpush.msk.msra.mxu2 %vm648_vm5, %v643_v58  ;;  %3865 = vmatpush.msk.msra.mxu3 %vm648_vm5, %v643_v58  ;;  %v3893_v58 = vld [vmem:[%s4358_s3 + $0x108] sm:$0xff] }
 0x108   :  { %v509_v26 = vpop.f32.mrf.mxu1  ;;  %v466_v29 = vadd.f32 %v465_v24, %v428_v12  ;;  %v382_v3 = vadd.f32 %v381_v59, %v380_v62  ;;  %v366_v8 = vrot.slane %v365_v63, 4  ;;  %v543_v9 = vmul.f32 %v4661_v1, %v4661_v1  ;;  %v4696_v62 = vld [vmem:[%s4358_s3 + $0x70] sm:$0xff] }
 0x109   :  { %v530_v15 = vsel %vm357_vm3, %v4661_v1, 0.0  ;;  %801 = vmatpush.msra.mxu1 %v4696_v62 }
 0x10a   :  { %v519_v36 = vadd.f32 %v509_v26, %v466_v29  ;;  %v383_v14 = vrot.slane %v382_v3, 4  ;;  %v367_v19 = vadd.f32 %v366_v8, %v365_v63  ;;  %v547_v21 = vsel %vm357_vm3, %v543_v9, 0.0  ;;  %v4699_v63 = vld [vmem:[%s4358_s3 + $0x68] sm:$0xff]  ;;  %v4711_v8 = vld [vmem:[%s4358_s3 + $0x60] sm:$0xff]  ;;  %v4714_v9 = vld [vmem:[%s4358_s3 + $0x158] sm:$0xff] }
 0x10b   :  { %802 = vmatpush.msra.mxu1 %v4699_v63 }
 0x10c   :  { %v523_v48 = vadd.f32 %v4614_v10, %v519_v36  ;;  %v384_v27 = vadd.f32 %v383_v14, %v382_v3  ;;  %v4723_v14 = vld [vmem:[%s4358_s3 + $0x58] sm:$0xff] }
 0x10d   :  { %803 = vmatpush.msra.mxu1 %v4711_v8 }
 0x10e   :  { %v4658_v60 = vmax.f32 %v523_v48, 0.0  ;;  %v385_v38 = vrot.slane %v384_v27, 2 }
 0x10f   :  { %v468_v45 = vpop.f32.mrf.mxu0  ;;  %804 = vmatpush.msra.mxu1 %v4723_v14 }
 0x110   :  { %v469_v49 = vadd.f32 %v468_v45, %v431_v34  ;;  %v512_v50 = vpop.f32.mrf.mxu1  ;;  %v544_v5 = vmul.f32 %v4658_v60, %v4658_v60  ;;  %v531_v11 = vsel %vm357_vm3, %v4658_v60, 0.0  ;;  %v386_v43 = vadd.f32 %v385_v38, %v384_v27  ;;  %v3875_v27 = vld [vmem:[%s4358_s3 + $0xb8] sm:$0xff]  ;;  %v4773_v38 = vld [vmem:[%s4358_s3 + $0x120] sm:$0xff] }
 0x111   :  { %v532_v20 = vadd.f32 %v531_v11, %v530_v15  ;;  %v3879_v11 = vld [vmem:[%s4358_s3 + $0xd8] sm:$0xff]  ;;  %v3878_v15 = vld [vmem:[%s4358_s3 + $0xd0] sm:$0xff] }
 0x112   :  { %v520_v56 = vadd.f32 %v512_v50, %v469_v49  ;;  %v548_v16 = vsel %vm357_vm3, %v544_v5, 0.0  ;;  %v387_v49 = vrot.slane %v386_v43, 1  ;;  %v3880_v5 = vld [vmem:[%s4358_s3 + $0xe0] sm:$0xff] }
 0x113   :  { %v549_v25 = vadd.f32 %v548_v16, %v547_v21  ;;  %v4728_v16 = vld [vmem:[%s4358_s3 + $0x148] sm:$0xff] }
 0x114   :  { %v524_v61 = vadd.f32 %v4614_v10, %v520_v56  ;;  %v388_v55 = vadd.f32 %v387_v49, %v386_v43  ;;  %v4741_v21 = vld [vmem:[%s4358_s3 + $0x48] sm:$0xff] }
 0x116   :  { %v4663_v2 = vmax.f32 %v524_v61, 0.0 }
 0x117   :  { %v471_v4 = vpop.f32.mrf.mxu0 }
 0x118   :  { %v472_v6 = vadd.f32 %v471_v4, %v434_v0  ;;  %v515_v7 = vpop.f32.mrf.mxu1  ;;  %v545_v12 = vmul.f32 %v4663_v2, %v4663_v2  ;;  %v533_v17 = vsel %vm357_vm3, %v4663_v2, 0.0  ;;  %v3881_v0 = vld [vmem:[%s4358_s3 + $0xe8] sm:$0xff]  ;;  %v4704_v4 = vld [vmem:[%s4358_s3 + $0x160] sm:$0xff] }
 0x119   :  { %v534_v26 = vadd.f32 %v533_v17, %v532_v20  ;;  %764 = vmatpush.msra.mxu0 %v3881_v0  ;;  %v4737_v20 = vld [vmem:[%s4358_s3 + $0x140] sm:$0xff] }
 0x11a   :  { %v521_v13 = vadd.f32 %v515_v7, %v472_v6  ;;  %v550_v22 = vsel %vm357_vm3, %v545_v12, 0.0  ;;  %v4719_v12 = vld [vmem:[%s4358_s3 + $0x150] sm:$0xff] }
 0x11b   :  { %v551_v32 = vadd.f32 %v550_v22, %v549_v25  ;;  %765 = vmatpush.msra.mxu0 %v3880_v5  ;;  %v3876_v22 = vld [vmem:[%s4358_s3 + $0xc0] sm:$0xff]  ;;  %v4746_v25 = vld [vmem:[%s4358_s3 + $0x138] sm:$0xff] }
 0x11c   :  { %v525_v18 = vadd.f32 %v4614_v10, %v521_v13  ;;  %v368_v10 = vrot.slane %v367_v19, 2 }
 0x11d   :  { %766 = vmatpush.msra.mxu0 %v3879_v11 }
 0x11e   :  { %v4681_v24 = vmax.f32 %v525_v18, 0.0  ;;  %v369_v41 = vadd.f32 %v368_v10, %v367_v19  ;;  %v4732_v18 = vld [vmem:[%s4358_s3 + $0x50] sm:$0xff]  ;;  %v3877_v19 = vld [vmem:[%s4358_s3 + $0xc8] sm:$0xff] }
 0x11f   :  { %767 = vmatpush.msra.mxu0 %v3878_v15  ;;  %805 = vmatpush.msra.mxu1 %v4732_v18 }
 0x120   :  { %v535_v29 = vsel %vm363_vm4, %v4681_v24, 0.0  ;;  %v546_v31 = vmul.f32 %v4681_v24, %v4681_v24  ;;  %v370_v45 = vrot.slane %v369_v41, 1 }
 0x121   :  { %v536_v33 = vadd.f32 %v535_v29, %v534_v26  ;;  %768 = vmatpush.msra.mxu0 %v3877_v19  ;;  %v4750_v26 = vld [vmem:[%s4358_s3 + $0x40] sm:$0xff]  ;;  %806 = vmatpush.msra.mxu1 %v4741_v21  ;;  %v4755_v29 = vld [vmem:[%s4358_s3 + $0x130] sm:$0xff] }
 0x122   :  { %v552_v34 = vsel %vm363_vm4, %v546_v31, 0.0  ;;  %v371_v51 = vadd.f32 %v370_v45, %v369_v41  ;;  %v4759_v31 = vld [vmem:[%s4358_s3 + $0x38] sm:$0xff] }
 0x123   :  { %v537_v36 = vrot.slane %v536_v33, 4  ;;  %v553_v37 = vadd.f32 %v552_v34, %v551_v32  ;;  %769 = vmatpush.msra.mxu0 %v3876_v22  ;;  %v3874_v32 = vld [vmem:[%s4358_s3 + $0xb0] sm:$0xff]  ;;  %807 = vmatpush.msra.mxu1 %v4750_v26 }
 0x124   :  { %v4768_v34 = vld [vmem:[%s4358_s3 + $0x30] sm:$0xff] }
 0x125   :  { %v538_v39 = vadd.f32 %v537_v36, %v536_v33  ;;  %v554_v40 = vrot.slane %v553_v37, 4  ;;  %770 = vmatpush.msra.mxu0 %v3875_v27  ;;  %v4764_v33 = vld [vmem:[%s4358_s3 + $0x128] sm:$0xff]  ;;  %808 = vmatpush.msra.mxu1 %v4759_v31 }
 0x126   :  { %v3873_v36 = vld [vmem:[%s4358_s3 + $0xa8] sm:$0xff] }
 0x127   :  { %v539_v42 = vrot.slane %v538_v39, 2  ;;  %v555_v44 = vadd.f32 %v554_v40, %v553_v37  ;;  %771 = vmatpush.msra.mxu0 %v3874_v32  ;;  %809 = vmatpush.msra.mxu1 %v4768_v34 }
 0x129   :  { %v540_v46 = vadd.f32 %v539_v42, %v538_v39  ;;  %v556_v47 = vrot.slane %v555_v44, 2  ;;  %v4777_v39 = vld [vmem:[%s4358_s3 + $0x28] sm:$0xff]  ;;  %772 = vmatpush.msra.mxu0 %v3873_v36 }
 0x12a   :  { %810 = vmatpush.msra.mxu1 %v4777_v39 }
 0x12b   :  { %v541_v48 = vrot.slane %v540_v46, 1  ;;  %v557_v50 = vadd.f32 %v556_v47, %v555_v44  ;;  %v627_v44 = vld [vmem:[%s4338_s17] sm:$0x1]  ;;  %s5960_s17 = sld [smem:[#allocation11_spill]] }
 0x12c   :  { %v640_v47 = vld [vmem:[%s4343_s21] sm:$0x1]  ;;  %s5961_s21 = sld [smem:[#allocation6_spill]] }
 0x12d   :  { %v542_v52 = vadd.f32 %v541_v48, %v540_v46  ;;  %v558_v53 = vrot.slane %v557_v50, 1 }
 0x12f   :  { %v560_v54 = vadd.f32 %v542_v52, %v371_v51  ;;  %v559_v56 = vadd.f32 %v558_v53, %v557_v50  ;;  %v4788_v50 = vld [vmem:[%s4358_s3 + $0x20] sm:$0xff]  ;;  %v3895_v52 = vld [vmem:[%s4358_s3 + $0x118] sm:$0xff] }
 0x130   :  { %811 = vmatpush.msra.mxu1 %v4788_v50  ;;  %v3872_v51 = vld [vmem:[%s4358_s3 + $0xa0] sm:$0xff]  ;;  %v4794_v53 = vld [vmem:[%s4358_s3 + $0x18] sm:$0xff] }
 0x131   :  { %3861 = vmatmul.msk.f32.vlgmr.msrb.gmra.mxu2 %vm357_vm3, %v560_v54  ;;  %v561_v57 = vadd.f32 %v559_v56, %v388_v55  ;;  %773 = vmatpush.msra.mxu0 %v3872_v51  ;;  %v3871_v54 = vld [vmem:[%s4358_s3 + $0x98] sm:$0xff]  ;;  %v3894_v55 = vld [vmem:[%s4358_s3 + $0x110] sm:$0xff] }
 0x132   :  { %861 = vmatpush.msrb.mxu2 %v4704_v4  ;;  %812 = vmatpush.msra.mxu1 %v4794_v53  ;;  %v715_v56 = vld [vmem:[%s4358_s3 + $0x10] sm:$0xff] }
 0x133   :  { %3862 = vmatmul.msk.f32.vlgmr.msrb.gmra.mxu3 %vm357_vm3, %v561_v57  ;;  %774 = vmatpush.msra.mxu0 %v3871_v54  ;;  %v3870_v57 = vld [vmem:[%s4358_s3 + $0x90] sm:$0xff] }
 0x134   :  { %957 = vmatpush.msrb.mxu3 %v3881_v0  ;;  %862 = vmatpush.msrb.mxu2 %v4714_v9  ;;  %v3892_v0 = vld [vmem:[%s4358_s3 + $0x100] sm:$0xff] }
 0x135   :  { %813 = vmatpush.msra.mxu1 %v715_v56  ;;  %775 = vmatpush.msra.mxu0 %v3870_v57 }
 0x136   :  { %958 = vmatpush.msrb.mxu3 %v3880_v5  ;;  %863 = vmatpush.msrb.mxu2 %v4719_v12  ;;  %v3868_v5 = vld [vmem:[%s4358_s3 + $0x80] sm:$0xff] }
 0x138   :  { %959 = vmatpush.msrb.mxu3 %v3879_v11  ;;  %864 = vmatpush.msrb.mxu2 %v4728_v16  ;;  %v3890_v11 = vld [vmem:[%s4358_s3 + $0xf0] sm:$0xff] }
 0x13a   :  { %960 = vmatpush.msrb.mxu3 %v3878_v15  ;;  %865 = vmatpush.msrb.mxu2 %v4737_v20 }
 0x13c   :  { %961 = vmatpush.msrb.mxu3 %v3877_v19  ;;  %866 = vmatpush.msrb.mxu2 %v4746_v25 }
 0x13e   :  { %962 = vmatpush.msrb.mxu3 %v3876_v22  ;;  %867 = vmatpush.msrb.mxu2 %v4755_v29 }
 0x140   :  { %963 = vmatpush.msrb.mxu3 %v3875_v27  ;;  %868 = vmatpush.msrb.mxu2 %v4764_v33 }
 0x142   :  { %964 = vmatpush.msrb.mxu3 %v3874_v32  ;;  %869 = vmatpush.msrb.mxu2 %v4773_v38 }
 0x144   :  { %965 = vmatpush.msrb.mxu3 %v3873_v36  ;;  %870 = vmatpush.msrb.mxu2 %v3895_v52 }
 0x146   :  { %966 = vmatpush.msrb.mxu3 %v3872_v51  ;;  %871 = vmatpush.msrb.mxu2 %v3894_v55 }
 0x148   :  { %967 = vmatpush.msrb.mxu3 %v3871_v54  ;;  %872 = vmatpush.msrb.mxu2 %v3893_v58 }
 0x14a   :  { %968 = vmatpush.msrb.mxu3 %v3870_v57  ;;  %873 = vmatpush.msrb.mxu2 %v3892_v0 }
 0x1b4   :  { %v597_v59 = vpop.f32.mrf.mxu2 }
 0x1b5   :  { %v4693_v61 = vmul.f32 0.00055555557, %v597_v59  ;;  %v4803_v59 = vld [vmem:[%s4358_s3 + $0x8] sm:$0xff] }
 0x1b6   :  { %v620_v3 = vpop.f32.mrf.mxu3  ;;  %814 = vmatpush.msra.mxu1 %v4803_v59 }
 0x1b7   :  { %v625_v6 = vmul.f32 %v4693_v61, %v4693_v61  ;;  %v624_v7 = vmul.f32 0.00055555557, %v620_v3  ;;  %v4808_v3 = vld [vmem:[%s4358_s3] sm:$0xff] }
 0x1b8   :  { %815 = vmatpush.msra.mxu1 %v4808_v3 }
 0x1b9   :  { %v626_v13 = vsub.f32 %v624_v7, %v625_v6  ;;  %v3891_v6 = vld [vmem:[%s4358_s3 + $0xf8] sm:$0xff] }
 0x1ba   :  { %v3867_v7 = vld [vmem:[%s4358_s3 + $0x78] sm:$0xff]  ;;  %874 = vmatpush.msrb.mxu2 %v3891_v6  ;;  %1038 = vmatpush.msrb.mxu1 %v4704_v4 }
 0x1bb   :  { %v628_v17 = vadd.f32 1e-05, %v626_v13 }
 0x1bc   :  { %875 = vmatpush.msrb.mxu2 %v3890_v11  ;;  %1039 = vmatpush.msrb.mxu1 %v4714_v9 }
 0x1bd   :  { %4221 = vrsqrt.f32 %v628_v17  ;;  %vm635_vm7 = vweird.f32 %v628_v17 }
 0x1be   :  { %1040 = vmatpush.msrb.mxu1 %v4719_v12 }
 0x1c0   :  { %1041 = vmatpush.msrb.mxu1 %v4728_v16 }
 0x1c2   :  { %1042 = vmatpush.msrb.mxu1 %v4737_v20 }
 0x1c3   :  { %v4222_v10 = vpop.eup %4221 }
 0x1c4   :  { %v630_v37 = vmul.f32 %v4222_v10, %v628_v17  ;;  %vm636_vm6 = vweird.f32 %v4222_v10  ;;  %1043 = vmatpush.msrb.mxu1 %v4746_v25 }
 0x1c5   :  { %vm637_vm8 = vmor %vm635_vm7, %vm636_vm6  ;;  %vm2224_vm7 = vcmask 648192  }
 0x1c6   :  { %v631_v40 = vmul.f32 %v4222_v10, %v630_v37  ;;  %1044 = vmatpush.msrb.mxu1 %v4755_v29 }
 0x1c8   :  { %v632_v41 = vmul.f32 0.5, %v631_v40  ;;  %1045 = vmatpush.msrb.mxu1 %v4764_v33 }
 0x1ca   :  { %v633_v42 = vsub.f32 1.5, %v632_v41  ;;  %1046 = vmatpush.msrb.mxu1 %v4773_v38 }
 0x1cc   :  { %v634_v43 = vmul.f32 %v4222_v10, %v633_v42  ;;  %1047 = vmatpush.msrb.mxu1 %v3895_v52 }
 0x1ce   :  { %v638_v45 = vsel %vm637_vm8, %v4222_v10, %v634_v43  ;;  %1048 = vmatpush.msrb.mxu1 %v3894_v55  ;;  %vm2222_vm8 = vcmask 654336  }
 0x1cf   :  { %v639_v46 = vmul.f32 %v638_v45, %v627_v44 }
 0x1d0   :  { %1049 = vmatpush.msrb.mxu1 %v3893_v58 }
 0x1d1   :  { %3864 = vmatmul.msk.f32.vlgmr.msra.gmra.mxu2 %vm644_vm9, %v639_v46  ;;  %v641_v48 = vmul.f32 %v639_v46, %v4693_v61  ;;  %v3869_v61 = vld [vmem:[%s4358_s3 + $0x88] sm:$0xff]  ;;  %s5964_s3 = sld [smem:[#allocation12_spill]] }
 0x1d2   :  { %776 = vmatpush.msra.mxu0 %v3869_v61  ;;  %969 = vmatpush.msrb.mxu3 %v3869_v61 }
 0x1d3   :  { %v642_v49 = vsub.f32 %v640_v47, %v641_v48  ;;  %1050 = vmatpush.msrb.mxu1 %v3892_v0 }
 0x1d4   :  { %777 = vmatpush.msra.mxu0 %v3868_v5  ;;  %970 = vmatpush.msrb.mxu3 %v3868_v5  ;;  %v1123_v5 = vld [vmem:[%s4378_s24 + $0x68] sm:$0xff] }
 0x1d5   :  { %3866 = vmatmul.msk.f32.vlgmr.msra.gmra.mxu3 %vm644_vm9, %v642_v49  ;;  %1051 = vmatpush.msrb.mxu1 %v3891_v6 }
 0x1d6   :  { %778 = vmatpush.msra.mxu0 %v3867_v7  ;;  %971 = vmatpush.msrb.mxu3 %v3867_v7  ;;  %v1122_v7 = vld [vmem:[%s4378_s24 + $0x60] sm:$0xff] }
 0x1d7   :  { %1052 = vmatpush.msrb.mxu1 %v3890_v11  ;;  %1129 = vmatpush.msra.mxu2 %v1123_v5 }
 0x1d8   :  { %994 = vmatpush.msrb.mxu0 %v4696_v62  ;;  %1152 = vmatpush.msra.mxu3 %v1123_v5 }
 0x1d9   :  { %1130 = vmatpush.msra.mxu2 %v1122_v7 }
 0x1da   :  { %995 = vmatpush.msrb.mxu0 %v4699_v63  ;;  %1153 = vmatpush.msra.mxu3 %v1122_v7 }
 0x1dc   :  { %996 = vmatpush.msrb.mxu0 %v4711_v8 }
 0x1de   :  { %997 = vmatpush.msrb.mxu0 %v4723_v14 }
 0x1e0   :  { %998 = vmatpush.msrb.mxu0 %v4732_v18 }
 0x1e2   :  { %999 = vmatpush.msrb.mxu0 %v4741_v21 }
 0x1e4   :  { %1000 = vmatpush.msrb.mxu0 %v4750_v26 }
 0x1e6   :  { %1001 = vmatpush.msrb.mxu0 %v4759_v31 }
 0x1e8   :  { %1002 = vmatpush.msrb.mxu0 %v4768_v34 }
 0x1ea   :  { %1003 = vmatpush.msrb.mxu0 %v4777_v39 }
 0x1ec   :  { %1004 = vmatpush.msrb.mxu0 %v4788_v50 }
 0x1ee   :  { %1005 = vmatpush.msrb.mxu0 %v4794_v53 }
 0x1f0   :  { %1006 = vmatpush.msrb.mxu0 %v715_v56 }
 0x1f2   :  { %1007 = vmatpush.msrb.mxu0 %v4803_v59 }
 0x1f4   :  { %1008 = vmatpush.msrb.mxu0 %v4808_v3 }
 0x254   :  { %v669_v62 = vpop.f32.mrf.mxu2 }
 0x255   :  { %v695_v63 = vperm.slane %v669_v62, 0  ;;  %v1121_v62 = vld [vmem:[%s4378_s24 + $0x58] sm:$0xff] }
 0x256   :  { %1131 = vmatpush.msra.mxu2 %v1121_v62  ;;  %1154 = vmatpush.msra.mxu3 %v1121_v62 }
 0x257   :  { %v696_v8 = vmul.f32 %v695_v63, %v4627_v28  ;;  %v697_v12 = vmul.f32 %v695_v63, %v4623_v23  ;;  %v705_v13 = vmul.f32 %v695_v63, %v4661_v1  ;;  %v706_v14 = vmul.f32 %v695_v63, %v4658_v60 }
 0x258   :  { %v692_v4 = vpop.f32.mrf.mxu3  ;;  %v698_v19 = vmul.f32 %v695_v63, %v4629_v30  ;;  %v707_v60 = vmul.f32 %v695_v63, %v4663_v2  ;;  %v699_v2 = vmul.f32 %v695_v63, %v4634_v35  ;;  %v708_v10 = vmul.f32 %v695_v63, %v4681_v24 }
 0x259   :  { %v700_v9 = vperm.slane %v692_v4, 0 }
 0x25b   :  { %v701_v15 = vadd.f32 %v700_v9, %v696_v8  ;;  %v702_v16 = vadd.f32 %v700_v9, %v697_v12  ;;  %v709_v17 = vadd.f32 %v705_v13, %v700_v9  ;;  %v710_v18 = vadd.f32 %v706_v14, %v700_v9  ;;  %v1120_v12 = vld [vmem:[%s4378_s24 + $0x50] sm:$0xff]  ;;  %v4888_v14 = vld [vmem:[%s4363_s8] ss:$0 sm:$0xff]  ;;  %s5965_s8 = sld [smem:[#allocation16_spill]] }
 0x25c   :  { %v703_v27 = vadd.f32 %v700_v9, %v698_v19  ;;  %v711_v29 = vadd.f32 %v707_v60, %v700_v9  ;;  %v704_v37 = vadd.f32 %v700_v9, %v699_v2  ;;  %v712_v39 = vadd.f32 %v708_v10, %v700_v9  ;;  %1132 = vmatpush.msra.mxu2 %v1120_v12  ;;  %v1117_v60 = vld [vmem:[%s4378_s24 + $0x38] sm:$0xff]  ;;  %v1114_v10 = vld [vmem:[%s4378_s24 + $0x20] sm:$0xff] }
 0x25d   :  { %3886 = vmatmul.msk.f32.vlgmr.msra.gmra.mxu1 %vm357_vm3, %v701_v15  ;;  %v748_v28 = vrot.slane %v701_v15, 1  ;;  %v749_v20 = vrot.slane %v702_v16, 1  ;;  %v845_v23 = vrot.slane %v701_v15, 2  ;;  %v846_v21 = vrot.slane %v702_v16, 2  ;;  %1155 = vmatpush.msra.mxu3 %v1120_v12 }
 0x25e   :  { %v941_v1 = vrot.slane %v709_v17, 1  ;;  %v942_v22 = vrot.slane %v710_v18, 1  ;;  %v751_v31 = vrot.slane %v703_v27, 1  ;;  %v848_v32 = vrot.slane %v703_v27, 2 }
 0x25f   :  { %v750_v25 = vsel %vm208_vm0, %v748_v28, %v749_v20  ;;  %v847_v26 = vsel %vm296_vm2, %v845_v23, %v846_v21  ;;  %v944_v33 = vrot.slane %v711_v29, 1  ;;  %v753_v40 = vrot.slane %v704_v37, 1  ;;  %v1118_v23 = vld [vmem:[%s4378_s24 + $0x40] sm:$0xff] }
 0x260   :  { %3882 = vmatmul.msk.f32.vlgmr.msra.gmra.mxu0 %vm357_vm3, %v750_v25  ;;  %3905 = vmatmul.msk.f32.vlgmr.msrb.gmra.mxu2 %vm357_vm3, %v847_v26  ;;  %v943_v30 = vsel %vm208_vm0, %v941_v1, %v942_v22  ;;  %v752_v34 = vsel %vm208_vm0, %v749_v20, %v751_v31  ;;  %v849_v36 = vsel %vm296_vm2, %v846_v21, %v848_v32  ;;  %v850_v41 = vrot.slane %v704_v37, 2 }
 0x261   :  { %3909 = vmatmul.msk.f32.vlgmr.msrb.gmra.mxu3 %vm357_vm3, %v943_v30  ;;  %v945_v38 = vsel %vm208_vm0, %v942_v22, %v944_v33  ;;  %v946_v42 = vrot.slane %v712_v39, 1  ;;  %v754_v35 = vsel %vm208_vm0, %v751_v31, %v753_v40  ;;  %v1022_v44 = vrot.slane %v709_v17, 2 }
 0x262   :  { %v851_v24 = vsel %vm296_vm2, %v848_v32, %v850_v41  ;;  %v1023_v45 = vrot.slane %v710_v18, 2  ;;  %v1025_v47 = vrot.slane %v711_v29, 2  ;;  %v1027_v49 = vrot.slane %v712_v39, 2  ;;  %v1115_v32 = vld [vmem:[%s4378_s24 + $0x28] sm:$0xff] }
 0x263   :  { %v947_v43 = vsel %vm208_vm0, %v944_v33, %v946_v42 }
 0x264   :  { %v1024_v46 = vsel %vm296_vm2, %v1022_v44, %v1023_v45  ;;  %v1026_v48 = vsel %vm296_vm2, %v1023_v45, %v1025_v47  ;;  %v1028_v50 = vsel %vm296_vm2, %v1025_v47, %v1027_v49 }
 0x265   :  { %3887 = vmatmul.msk.f32.gmra.mxu1 %vm357_vm3, %v702_v16 }
 0x268   :  { %3883 = vmatmul.msk.f32.gmra.mxu0 %vm357_vm3, %v752_v34  ;;  %3906 = vmatmul.msk.f32.gmra.mxu2 %vm357_vm3, %v849_v36 }
 0x269   :  { %3910 = vmatmul.msk.f32.gmra.mxu3 %vm357_vm3, %v945_v38  ;;  %v1113_v38 = vld [vmem:[%s4378_s24 + $0x18] sm:$0xff] }
 0x26d   :  { %3888 = vmatmul.msk.f32.gmra.mxu1 %vm357_vm3, %v703_v27 }
 0x270   :  { %3884 = vmatmul.msk.f32.gmra.mxu0 %vm357_vm3, %v754_v35  ;;  %3907 = vmatmul.msk.f32.gmra.mxu2 %vm357_vm3, %v851_v24  ;;  %v1112_v24 = vld [vmem:[%s4378_s24 + $0x10] sm:$0xff] }
 0x271   :  { %3911 = vmatmul.msk.f32.gmra.mxu3 %vm357_vm3, %v947_v43 }
 0x275   :  { %3889 = vmatmul.msk.f32.gmra.mxu1 %vm357_vm3, %v704_v37 }
 0x278   :  { %3885 = vmatmul.msk.f32.gmra.mxu0 %vm357_vm3, %v753_v40  ;;  %3908 = vmatmul.msk.f32.gmra.mxu2 %vm357_vm3, %v850_v41 }
 0x279   :  { %3912 = vmatmul.msk.f32.gmra.mxu3 %vm357_vm3, %v946_v42 }
 0x27d   :  { %3917 = vmatmul.msk.f32.vlgmr.msrb.gmra.mxu1 %vm357_vm3, %v1024_v46 }
 0x280   :  { %3913 = vmatmul.msk.f32.vlgmr.msrb.gmra.mxu0 %vm357_vm3, %v709_v17 }
 0x285   :  { %3918 = vmatmul.msk.f32.gmra.mxu1 %vm357_vm3, %v1026_v48 }
 0x288   :  { %3914 = vmatmul.msk.f32.gmra.mxu0 %vm357_vm3, %v710_v18  ;;  %v1119_v18 = vld [vmem:[%s4378_s24 + $0x48] sm:$0xff] }
 0x289   :  { %1133 = vmatpush.msra.mxu2 %v1119_v18  ;;  %1156 = vmatpush.msra.mxu3 %v1119_v18 }
 0x28b   :  { %1134 = vmatpush.msra.mxu2 %v1118_v23  ;;  %1157 = vmatpush.msra.mxu3 %v1118_v23 }
 0x28d   :  { %3919 = vmatmul.msk.f32.gmra.mxu1 %vm357_vm3, %v1028_v50  ;;  %1135 = vmatpush.msra.mxu2 %v1117_v60 }
 0x28e   :  { %1158 = vmatpush.msra.mxu3 %v1117_v60 }
 0x290   :  { %3915 = vmatmul.msk.f32.gmra.mxu0 %vm357_vm3, %v711_v29  ;;  %v1116_v29 = vld [vmem:[%s4378_s24 + $0x30] sm:$0xff] }
 0x291   :  { %1136 = vmatpush.msra.mxu2 %v1116_v29  ;;  %1159 = vmatpush.msra.mxu3 %v1116_v29 }
 0x293   :  { %1137 = vmatpush.msra.mxu2 %v1115_v32  ;;  %1160 = vmatpush.msra.mxu3 %v1115_v32 }
 0x295   :  { %3920 = vmatmul.msk.f32.gmra.mxu1 %vm357_vm3, %v1027_v49  ;;  %1138 = vmatpush.msra.mxu2 %v1114_v10 }
 0x296   :  { %1161 = vmatpush.msra.mxu3 %v1114_v10 }
 0x297   :  { %1139 = vmatpush.msra.mxu2 %v1113_v38 }
 0x298   :  { %3916 = vmatmul.msk.f32.gmra.mxu0 %vm357_vm3, %v712_v39  ;;  %1162 = vmatpush.msra.mxu3 %v1113_v38  ;;  %vm1654_vm3 = vcmask 392192  }
 0x299   :  { %1140 = vmatpush.msra.mxu2 %v1112_v24 }
 0x29a   :  { %1163 = vmatpush.msra.mxu3 %v1112_v24 }
 0x2da   :  { %v817_v51 = vpop.f32.mrf.mxu1 }
 0x2dd   :  { %v780_v52 = vpop.f32.mrf.mxu0 }
 0x2de   :  { %v818_v63 = vadd.f32 %v817_v51, %v780_v52  ;;  %v1111_v51 = vld [vmem:[%s4378_s24 + $0x8] sm:$0xff] }
 0x2df   :  { %1141 = vmatpush.msra.mxu2 %v1111_v51  ;;  %1164 = vmatpush.msra.mxu3 %v1111_v51 }
 0x2e2   :  { %v820_v53 = vpop.f32.mrf.mxu1 }
 0x2e3   :  { %v877_v54 = vpop.f32.mrf.mxu2 }
 0x2e4   :  { %v973_v3 = vpop.f32.mrf.mxu3  ;;  %v889_v13 = vadd.f32 %v877_v54, %v818_v63 }
 0x2e5   :  { %v783_v55 = vpop.f32.mrf.mxu0 }
 0x2e6   :  { %v821_v11 = vadd.f32 %v820_v53, %v783_v55  ;;  %v897_v21 = vadd.f32 %v4888_v14, %v889_v13 }
 0x2e8   :  { %v4900_v31 = vmax.f32 %v897_v21, 0.0 }
 0x2ea   :  { %v823_v56 = vpop.f32.mrf.mxu1  ;;  %v920_v39 = vmul.f32 %v4900_v31, %v4900_v31  ;;  %v906_v43 = vsel %vm905_vm10, %v4900_v31, 0.0 }
 0x2eb   :  { %v880_v57 = vpop.f32.mrf.mxu2 }
 0x2ec   :  { %v890_v4 = vadd.f32 %v880_v57, %v821_v11  ;;  %v976_v28 = vpop.f32.mrf.mxu3  ;;  %v924_v52 = vsel %vm905_vm10, %v920_v39, 0.0 }
 0x2ed   :  { %v786_v58 = vpop.f32.mrf.mxu0 }
 0x2ee   :  { %v824_v9 = vadd.f32 %v823_v56, %v786_v58  ;;  %v898_v19 = vadd.f32 %v4888_v14, %v890_v4  ;;  %v1110_v58 = vld [vmem:[%s4378_s24] sm:$0xff]  ;;  %s5968_s24 = sld [smem:[#allocation14_spill]] }
 0x2ef   :  { %1142 = vmatpush.msra.mxu2 %v1110_v58  ;;  %1165 = vmatpush.msra.mxu3 %v1110_v58 }
 0x2f0   :  { %v4896_v25 = vmax.f32 %v898_v19, 0.0 }
 0x2f2   :  { %v826_v59 = vpop.f32.mrf.mxu1  ;;  %v921_v34 = vmul.f32 %v4896_v25, %v4896_v25  ;;  %v907_v41 = vsel %vm905_vm10, %v4896_v25, 0.0 }
 0x2f3   :  { %v883_v61 = vpop.f32.mrf.mxu2  ;;  %v908_v53 = vadd.f32 %v907_v41, %v906_v43 }
 0x2f4   :  { %v891_v16 = vadd.f32 %v883_v61, %v824_v9  ;;  %v979_v40 = vpop.f32.mrf.mxu3  ;;  %v925_v44 = vsel %vm905_vm10, %v921_v34, 0.0 }
 0x2f5   :  { %v789_v0 = vpop.f32.mrf.mxu0 }
 0x2f6   :  { %v827_v17 = vadd.f32 %v826_v59, %v789_v0  ;;  %v899_v22 = vadd.f32 %v4888_v14, %v891_v16  ;;  %v926_v59 = vadd.f32 %v925_v44, %v924_v52 }
 0x2f8   :  { %v4903_v33 = vmax.f32 %v899_v22, 0.0 }
 0x2fa   :  { %v1054_v6 = vpop.f32.mrf.mxu1  ;;  %v922_v42 = vmul.f32 %v4903_v33, %v4903_v33  ;;  %v909_v47 = vsel %vm905_vm10, %v4903_v33, 0.0 }
 0x2fb   :  { %v886_v15 = vpop.f32.mrf.mxu2  ;;  %v910_v61 = vadd.f32 %v909_v47, %v908_v53 }
 0x2fc   :  { %v892_v20 = vadd.f32 %v886_v15, %v827_v17  ;;  %v927_v54 = vsel %vm905_vm10, %v922_v42, 0.0  ;;  %v982_v4 = vpop.f32.mrf.mxu3 }
 0x2fd   :  { %v1010_v8 = vpop.f32.mrf.mxu0 }
 0x2fe   :  { %v900_v27 = vadd.f32 %v4888_v14, %v892_v20  ;;  %v1011_v2 = vadd.f32 %v1010_v8, %v973_v3 }
 0x300   :  { %v4908_v36 = vmax.f32 %v900_v27, 0.0  ;;  %v1066_v35 = vadd.f32 %v1054_v6, %v1011_v2  ;;  %v928_v6 = vadd.f32 %v927_v54, %v926_v59 }
 0x302   :  { %v1057_v1 = vpop.f32.mrf.mxu1  ;;  %v923_v48 = vmul.f32 %v4908_v36, %v4908_v36  ;;  %v912_v55 = vsel %vm911_vm11, %v4908_v36, 0.0  ;;  %v1070_v56 = vadd.f32 %v4888_v14, %v1066_v35 }
 0x303   :  { %v913_v7 = vadd.f32 %v912_v55, %v910_v61  ;;  %v1190_v61 = vld [vmem:[%s4383_s30] sm:$0xf]  ;;  %s5969_s30 = sld [smem:[#allocation21_spill]] }
 0x304   :  { %v929_v0 = vsel %vm911_vm11, %v923_v48, 0.0  ;;  %v4937_v11 = vmax.f32 %v1070_v56, 0.0  ;;  %3923 = vmatpush.msk.msrb.mxu2 %vm648_vm5, %v1190_v61  ;;  %3925 = vmatpush.msk.msrb.mxu3 %vm648_vm5, %v1190_v61  ;;  %v5107_v61 = vld [vmem:[%s4388_s6 + $0x108] sm:$0xff] }
 0x305   :  { %v1013_v26 = vpop.f32.mrf.mxu0  ;;  %v930_v63 = vadd.f32 %v929_v0, %v928_v6  ;;  %v914_v13 = vrot.slane %v913_v7, 4  ;;  %v4970_v6 = vld [vmem:[%s4388_s6 + $0xd8] sm:$0xff] }
 0x306   :  { %v1014_v30 = vadd.f32 %v1013_v26, %v976_v28  ;;  %v1091_v16 = vmul.f32 %v4937_v11, %v4937_v11  ;;  %v1078_v20 = vsel %vm905_vm10, %v4937_v11, 0.0  ;;  %1362 = vmatpush.msra.mxu0 %v4970_v6 }
 0x307   :  { %v931_v28 = vrot.slane %v930_v63, 4  ;;  %v915_v22 = vadd.f32 %v914_v13, %v913_v7  ;;  %v4973_v7 = vld [vmem:[%s4388_s6 + $0xd0] sm:$0xff]  ;;  %v4981_v13 = vld [vmem:[%s4388_s6 + $0xc0] sm:$0xff] }
 0x308   :  { %v1067_v37 = vadd.f32 %v1057_v1, %v1014_v30  ;;  %v1095_v26 = vsel %vm905_vm10, %v1091_v16, 0.0  ;;  %1363 = vmatpush.msra.mxu0 %v4973_v7  ;;  %v4985_v16 = vld [vmem:[%s4388_s6 + $0xb8] sm:$0xff] }
 0x309   :  { %v932_v29 = vadd.f32 %v931_v28, %v930_v63 }
 0x30a   :  { %v1060_v45 = vpop.f32.mrf.mxu1  ;;  %v1071_v49 = vadd.f32 %v4888_v14, %v1067_v37  ;;  %v916_v37 = vrot.slane %v915_v22, 2 }
 0x30c   :  { %v4934_v3 = vmax.f32 %v1071_v49, 0.0  ;;  %v917_v35 = vadd.f32 %v916_v37, %v915_v22  ;;  %v5013_v37 = vld [vmem:[%s4388_s6 + $0x88] sm:$0xff] }
 0x30d   :  { %v1016_v46 = vpop.f32.mrf.mxu0 }
 0x30e   :  { %v1017_v50 = vadd.f32 %v1016_v46, %v979_v40  ;;  %v1092_v9 = vmul.f32 %v4934_v3, %v4934_v3  ;;  %v1079_v17 = vsel %vm905_vm10, %v4934_v3, 0.0  ;;  %v933_v40 = vrot.slane %v932_v29, 2 }
 0x30f   :  { %v1080_v60 = vadd.f32 %v1079_v17, %v1078_v20  ;;  %v918_v47 = vrot.slane %v917_v35, 1  ;;  %v4989_v17 = vld [vmem:[%s4388_s6 + $0xb0] sm:$0xff]  ;;  %v5001_v20 = vld [vmem:[%s4388_s6 + $0x98] sm:$0xff] }
 0x310   :  { %v1068_v57 = vadd.f32 %v1060_v45, %v1017_v50  ;;  %v1096_v23 = vsel %vm905_vm10, %v1092_v9, 0.0  ;;  %v934_v44 = vadd.f32 %v933_v40, %v932_v29  ;;  %v4977_v9 = vld [vmem:[%s4388_s6 + $0xc8] sm:$0xff] }
 0x311   :  { %v1097_v32 = vadd.f32 %v1096_v23, %v1095_v26  ;;  %v919_v53 = vadd.f32 %v918_v47, %v917_v35  ;;  %1364 = vmatpush.msra.mxu0 %v4977_v9  ;;  %v1174_v26 = vld [vmem:[%s4368_s14] sm:$0x1]  ;;  %s5966_s14 = sld [smem:[#allocation17_spill]] }
 0x312   :  { %v1072_v5 = vadd.f32 %v4888_v14, %v1068_v57  ;;  %v1063_v15 = vpop.f32.mrf.mxu1  ;;  %v935_v51 = vrot.slane %v934_v44, 1 }
 0x313   :  { %1365 = vmatpush.msra.mxu0 %v4981_v13 }
 0x314   :  { %v4939_v62 = vmax.f32 %v1072_v5, 0.0  ;;  %v936_v57 = vadd.f32 %v935_v51, %v934_v44  ;;  %v5071_v51 = vld [vmem:[%s4388_s6 + $0x130] sm:$0xff] }
 0x315   :  { %v1019_v8 = vpop.f32.mrf.mxu0  ;;  %1366 = vmatpush.msra.mxu0 %v4985_v16 }
 0x316   :  { %v1020_v12 = vadd.f32 %v1019_v8, %v982_v4  ;;  %v1093_v18 = vmul.f32 %v4939_v62, %v4939_v62  ;;  %v1081_v21 = vsel %vm905_vm10, %v4939_v62, 0.0 }
 0x317   :  { %v1082_v2 = vadd.f32 %v1081_v21, %v1080_v60  ;;  %1367 = vmatpush.msra.mxu0 %v4989_v17 }
 0x318   :  { %v1069_v19 = vadd.f32 %v1063_v15, %v1020_v12  ;;  %v1098_v27 = vsel %vm905_vm10, %v1093_v18, 0.0  ;;  %v4993_v18 = vld [vmem:[%s4388_s6 + $0xa8] sm:$0xff] }
 0x319   :  { %v1099_v38 = vadd.f32 %v1098_v27, %v1097_v32  ;;  %1368 = vmatpush.msra.mxu0 %v4993_v18  ;;  %v1187_v32 = vld [vmem:[%s4373_s19] sm:$0x1]  ;;  %s5967_s19 = sld [smem:[#allocation13_spill]] }
 0x31a   :  { %v1073_v1 = vadd.f32 %v4888_v14, %v1069_v19  ;;  %v4997_v19 = vld [vmem:[%s4388_s6 + $0xa0] sm:$0xff] }
 0x31b   :  { %1369 = vmatpush.msra.mxu0 %v4997_v19 }
 0x31c   :  { %v4957_v30 = vmax.f32 %v1073_v1, 0.0 }
 0x31d   :  { %1370 = vmatpush.msra.mxu0 %v5001_v20 }
 0x31e   :  { %v1083_v10 = vsel %vm911_vm11, %v4957_v30, 0.0  ;;  %v1094_v34 = vmul.f32 %v4957_v30, %v4957_v30 }
 0x31f   :  { %v1084_v14 = vadd.f32 %v1083_v10, %v1082_v2 }
 0x320   :  { %v1100_v39 = vsel %vm911_vm11, %v1094_v34, 0.0  ;;  %v5010_v34 = vld [vmem:[%s4388_s6 + $0x90] sm:$0xff] }
 0x321   :  { %v1085_v41 = vrot.slane %v1084_v14, 4  ;;  %v1101_v42 = vadd.f32 %v1100_v39, %v1099_v38  ;;  %1371 = vmatpush.msra.mxu0 %v5010_v34  ;;  %v5018_v38 = vld [vmem:[%s4388_s6 + $0x80] sm:$0xff]  ;;  %v5025_v39 = vld [vmem:[%s4388_s6 + $0x70] sm:$0xff] }
 0x323   :  { %v1086_v24 = vadd.f32 %v1085_v41, %v1084_v14  ;;  %v1102_v43 = vrot.slane %v1101_v42, 4  ;;  %1372 = vmatpush.msra.mxu0 %v5013_v37  ;;  %v5021_v14 = vld [vmem:[%s4388_s6 + $0x78] sm:$0xff] }
 0x325   :  { %v1087_v45 = vrot.slane %v1086_v24, 2  ;;  %v1103_v46 = vadd.f32 %v1102_v43, %v1101_v42  ;;  %1373 = vmatpush.msra.mxu0 %v5018_v38 }
 0x327   :  { %v1088_v48 = vadd.f32 %v1087_v45, %v1086_v24  ;;  %v1104_v49 = vrot.slane %v1103_v46, 2  ;;  %1374 = vmatpush.msra.mxu0 %v5021_v14 }
 0x329   :  { %v1089_v50 = vrot.slane %v1088_v48, 1  ;;  %v1105_v52 = vadd.f32 %v1104_v49, %v1103_v46  ;;  %1375 = vmatpush.msra.mxu0 %v5025_v39  ;;  %v5055_v49 = vld [vmem:[%s4388_s6 + $0x148] sm:$0xff] }
 0x32b   :  { %v1090_v54 = vadd.f32 %v1089_v50, %v1088_v48  ;;  %v1106_v55 = vrot.slane %v1105_v52, 1  ;;  %v5049_v48 = vld [vmem:[%s5956_s0] sm:$0xff]  ;;  %v5067_v50 = vld [vmem:[%s4388_s6 + $0x138] sm:$0xff] }
 0x32d   :  { %v1108_v56 = vadd.f32 %v1090_v54, %v919_v53  ;;  %v1107_v58 = vadd.f32 %v1106_v55, %v1105_v52  ;;  %v5075_v52 = vld [vmem:[%s5956_s0 + $0x8] sm:$0xf]  ;;  %v5078_v53 = vld [vmem:[%s5956_s0 + $0x18] sm:$0xf]  ;;  %v5090_v55 = vld [vmem:[%s4388_s6 + $0x120] sm:$0xff] }
 0x32e   :  { %v5081_v54 = vld [vmem:[%s4388_s6 + $0x128] sm:$0xff] }
 0x32f   :  { %3921 = vmatmul.msk.f32.vlgmr.msra.gmra.mxu2 %vm905_vm10, %v1108_v56  ;;  %v1109_v59 = vadd.f32 %v1107_v58, %v936_v57  ;;  %v5094_v56 = vld [vmem:[%s4388_s6 + $0x118] sm:$0xff]  ;;  %v5098_v57 = vld [vmem:[%s4388_s6 + $0x110] sm:$0xff]  ;;  %v5102_v58 = vld [vmem:[%s5956_s0 + $0x20] sm:$0xff] }
 0x331   :  { %3922 = vmatmul.msk.f32.vlgmr.msra.gmra.mxu3 %vm905_vm10, %v1109_v59 }
 0x3b2   :  { %v1144_v0 = vpop.f32.mrf.mxu2 }
 0x3b3   :  { %v1170_v5 = vmul.f32 0.0006377551, %v1144_v0 }
 0x3b4   :  { %v1167_v63 = vpop.f32.mrf.mxu3 }
 0x3b5   :  { %v1172_v4 = vmul.f32 %v1170_v5, %v1170_v5  ;;  %v1171_v8 = vmul.f32 0.0006377551, %v1167_v63  ;;  %v5118_v63 = vld [vmem:[%s4388_s6 + $0x100] sm:$0xff] }
 0x3b7   :  { %v1173_v12 = vsub.f32 %v1171_v8, %v1172_v4  ;;  %v5129_v4 = vld [vmem:[%s4388_s6 + $0xf8] sm:$0xff] }
 0x3b9   :  { %v1175_v15 = vadd.f32 1e-05, %v1173_v12 }
 0x3bb   :  { %4223 = vrsqrt.f32 %v1175_v15  ;;  %vm1182_vm13 = vweird.f32 %v1175_v15 }
 0x3c1   :  { %v4224_v28 = vpop.eup %4223 }
 0x3c2   :  { %v1177_v23 = vmul.f32 %v4224_v28, %v1175_v15  ;;  %vm1183_vm12 = vweird.f32 %v4224_v28  ;;  %v5139_v15 = vld [vmem:[%s4388_s6 + $0xf0] sm:$0xff] }
 0x3c3   :  { %vm1184_vm14 = vmor %vm1182_vm13, %vm1183_vm12  ;;  %vm2438_vm12 = vcmask 64512  }
 0x3c4   :  { %v1178_v21 = vmul.f32 %v4224_v28, %v1177_v23  ;;  %v5148_v23 = vld [vmem:[%s4388_s6 + $0xe8] sm:$0xff] }
 0x3c6   :  { %v1179_v1 = vmul.f32 0.5, %v1178_v21  ;;  %v5156_v21 = vld [vmem:[%s4388_s6 + $0x60] sm:$0xff] }
 0x3c8   :  { %v1180_v22 = vsub.f32 1.5, %v1179_v1  ;;  %v5160_v1 = vld [vmem:[%s4388_s6 + $0xe0] sm:$0xff] }
 0x3ca   :  { %v1181_v60 = vmul.f32 %v4224_v28, %v1180_v22  ;;  %v5165_v22 = vld [vmem:[%s4388_s6 + $0x58] sm:$0xff] }
 0x3cc   :  { %v1185_v27 = vsel %vm1184_vm14, %v4224_v28, %v1181_v60  ;;  %v3954_v28 = vld [vmem:[%s5956_s0 + $0x28] sm:$0xf]  ;;  %v5170_v60 = vld [vmem:[%s4388_s6 + $0x50] sm:$0xff] }
 0x3cd   :  { %v1186_v29 = vmul.f32 %v1185_v27, %v1174_v26  ;;  %v5176_v26 = vld [vmem:[%s5956_s0 + $0x40] sm:$0xff]  ;;  %v5181_v27 = vld [vmem:[%s4388_s6 + $0x48] sm:$0xff] }
 0x3cf   :  { %3924 = vmatmul.msk.f32.vlgmr.msrb.gmra.mxu2 %vm644_vm9, %v1186_v29  ;;  %v1188_v2 = vmul.f32 %v1186_v29, %v1170_v5  ;;  %v5187_v29 = vld [vmem:[%s4388_s6 + $0x40] sm:$0xff] }
 0x3d1   :  { %v1189_v10 = vsub.f32 %v1187_v32, %v1188_v2  ;;  %v5194_v32 = vld [vmem:[%s4388_s6 + $0x38] sm:$0xff]  ;;  %v5199_v2 = vld [vmem:[%s4388_s6 + $0x30] sm:$0xff] }
 0x3d3   :  { %3926 = vmatmul.msk.f32.vlgmr.msrb.gmra.mxu3 %vm644_vm9, %v1189_v10  ;;  %v5203_v10 = vld [vmem:[%s5956_s0 + $0x48] sm:$0xf] }
 0x452   :  { %v1214_v40 = vpop.f32.mrf.mxu2 }
 0x453   :  { %v5029_v41 = vperm.slane %v1214_v40, 0  ;;  %v5207_v40 = vld [vmem:[%s4388_s6 + $0x28] sm:$0xff] }
 0x455   :  { %v1244_v24 = vmul.f32 %v5029_v41, %v4908_v36  ;;  %v1243_v44 = vmul.f32 %v5029_v41, %v4903_v33  ;;  %v1242_v46 = vmul.f32 %v5029_v41, %v4896_v25  ;;  %v1241_v33 = vmul.f32 %v5029_v41, %v4900_v31  ;;  %v5052_v25 = vld [vmem:[%s5956_s0 + $0x10] sm:$0xff]  ;;  %v5063_v31 = vld [vmem:[%s4388_s6 + $0x140] sm:$0xff] }
 0x456   :  { %v1237_v42 = vpop.f32.mrf.mxu3  ;;  %v1253_v59 = vmul.f32 %v5029_v41, %v4957_v30  ;;  %v1252_v5 = vmul.f32 %v5029_v41, %v4939_v62  ;;  %v1251_v62 = vmul.f32 %v5029_v41, %v4934_v3  ;;  %v1250_v12 = vmul.f32 %v5029_v41, %v4937_v11  ;;  %v5153_v11 = vld [vmem:[%s4388_s6 + $0x68] sm:$0xff]  ;;  %v5214_v41 = vld [vmem:[%s4388_s6 + $0x20] sm:$0xff] }
 0x457   :  { %v5031_v35 = vperm.slane %v1237_v42, 0  ;;  %1391 = vmatpush.msra.mxu1 %v5153_v11  ;;  %v5218_v42 = vld [vmem:[%s4388_s6 + $0x18] sm:$0xff] }
 0x459   :  { %v1249_v43 = vadd.f32 %v5031_v35, %v1244_v24  ;;  %v1248_v45 = vadd.f32 %v5031_v35, %v1243_v44  ;;  %v1247_v36 = vadd.f32 %v5031_v35, %v1242_v46  ;;  %v1246_v47 = vadd.f32 %v5031_v35, %v1241_v33  ;;  %1392 = vmatpush.msra.mxu1 %v5156_v21  ;;  %v5226_v24 = vld [vmem:[%s4388_s6 + $0x8] sm:$0xff]  ;;  %v3974_v44 = vld [vmem:[%s5956_s0 + $0x30] sm:$0xff] }
 0x45a   :  { %v5111_v0 = vadd.f32 %v1253_v59, %v5031_v35  ;;  %v5124_v30 = vadd.f32 %v1252_v5, %v5031_v35  ;;  %v5134_v8 = vadd.f32 %v1251_v62, %v5031_v35  ;;  %v5144_v3 = vadd.f32 %v1250_v12, %v5031_v35  ;;  %v5222_v35 = vld [vmem:[%s4388_s6 + $0x10] sm:$0xff]  ;;  %v5266_v59 = vld [vmem:[%s4388_s6 + $0x1a8] sm:$0xff]  ;;  %v5271_v5 = vld [vmem:[%s4388_s6 + $0x1a0] sm:$0xff] }
 0x45b   :  { %3927 = vmatpush.msk.msra.mxu2 %vm648_vm5, %v1249_v43  ;;  %3932 = vmatpush.msk.msra.mxu3 %vm648_vm5, %v1249_v43  ;;  %v4013_v12 = vld [vmem:[%s4388_s6 + $0x228] sm:$0xff] }
 0x45c   :  { %3976 = vmatpush.msk.msrb.mxu0 %vm648_vm5, %v1249_v43  ;;  %1393 = vmatpush.msra.mxu1 %v5165_v22 }
 0x45d   :  { %1283 = vmatpush.msra.mxu2 %v1248_v45  ;;  %1329 = vmatpush.msra.mxu3 %v1248_v45 }
 0x45e   :  { %1512 = vmatpush.msrb.mxu0 %v1248_v45  ;;  %1394 = vmatpush.msra.mxu1 %v5170_v60 }
 0x45f   :  { %1284 = vmatpush.msra.mxu2 %v1247_v36  ;;  %1330 = vmatpush.msra.mxu3 %v1247_v36 }
 0x460   :  { %1513 = vmatpush.msrb.mxu0 %v1247_v36  ;;  %1395 = vmatpush.msra.mxu1 %v5181_v27 }
 0x461   :  { %1285 = vmatpush.msra.mxu2 %v1246_v47  ;;  %1331 = vmatpush.msra.mxu3 %v1246_v47 }
 0x462   :  { %1514 = vmatpush.msrb.mxu0 %v1246_v47  ;;  %3928 = vmatmul.msk.f32.vlgmr.msra.gmra.mxu2 %vm1260_vm15, %v5049_v48 }
 0x463   :  { %3933 = vmatmul.msk.f32.vlgmr.msra.gmra.mxu3 %vm1260_vm15, %v5052_v25  ;;  %3955 = vmatpush.msk.msrb.mxu2 %vm648_vm5, %v1249_v43 }
 0x464   :  { %1467 = vmatpush.msrb.mxu3 %v5055_v49  ;;  %1396 = vmatpush.msra.mxu1 %v5187_v29 }
 0x465   :  { %1434 = vmatpush.msrb.mxu2 %v1248_v45 }
 0x466   :  { %1468 = vmatpush.msrb.mxu3 %v5063_v31  ;;  %1397 = vmatpush.msra.mxu1 %v5194_v32 }
 0x467   :  { %1435 = vmatpush.msrb.mxu2 %v1247_v36 }
 0x468   :  { %1469 = vmatpush.msrb.mxu3 %v5067_v50  ;;  %1398 = vmatpush.msra.mxu1 %v5199_v2 }
 0x469   :  { %1436 = vmatpush.msrb.mxu2 %v1246_v47 }
 0x46a   :  { %1470 = vmatpush.msrb.mxu3 %v5071_v51  ;;  %3929 = vmatmul.msk.f32.gmra.mxu2 %vm1260_vm15, %v5075_v52 }
 0x46b   :  { %3997 = vmatpush.msk.msra.mxu2 %vm648_vm5, %v1249_v43  ;;  %3934 = vmatmul.msk.f32.gmra.mxu3 %vm1260_vm15, %v5078_v53  ;;  %v5243_v43 = vld [vmem:[%s4388_s6] sm:$0xff] }
 0x46c   :  { %1471 = vmatpush.msrb.mxu3 %v5081_v54  ;;  %1399 = vmatpush.msra.mxu1 %v5207_v40 }
 0x46d   :  { %1590 = vmatpush.msra.mxu2 %v1248_v45  ;;  %v3975_v45 = vld [vmem:[%s5956_s0 + $0x38] sm:$0xf]  ;;  %s5983_s0 = sld [smem:[#allocation32_spill]] }
 0x46e   :  { %1472 = vmatpush.msrb.mxu3 %v5090_v55  ;;  %1400 = vmatpush.msra.mxu1 %v5214_v41 }
 0x46f   :  { %1591 = vmatpush.msra.mxu2 %v1247_v36 }
 0x470   :  { %1473 = vmatpush.msrb.mxu3 %v5094_v56  ;;  %1401 = vmatpush.msra.mxu1 %v5218_v42 }
 0x471   :  { %1592 = vmatpush.msra.mxu2 %v1246_v47 }
 0x472   :  { %1474 = vmatpush.msrb.mxu3 %v5098_v57  ;;  %3956 = vmatmul.msk.f32.vlgmr.msrb.gmra.mxu2 %vm1260_vm15, %v5102_v58 }
 0x473   :  { %4019 = vmatpush.msk.msrb.mxu2 %vm648_vm5, %v5111_v0  ;;  %1402 = vmatpush.msra.mxu1 %v5222_v35 }
 0x474   :  { %1475 = vmatpush.msrb.mxu3 %v5107_v61 }
 0x475   :  { %1715 = vmatpush.msrb.mxu2 %v5124_v30  ;;  %1403 = vmatpush.msra.mxu1 %v5226_v24 }
 0x476   :  { %1476 = vmatpush.msrb.mxu3 %v5118_v63 }
 0x477   :  { %1716 = vmatpush.msrb.mxu2 %v5134_v8  ;;  %1404 = vmatpush.msra.mxu1 %v5243_v43 }
 0x478   :  { %1477 = vmatpush.msrb.mxu3 %v5129_v4 }
 0x479   :  { %1717 = vmatpush.msrb.mxu2 %v5144_v3 }
 0x47a   :  { %1478 = vmatpush.msrb.mxu3 %v5139_v15  ;;  %3957 = vmatmul.msk.f32.gmra.mxu2 %vm1260_vm15, %v3954_v28 }
 0x47c   :  { %1479 = vmatpush.msrb.mxu3 %v5148_v23 }
 0x47e   :  { %1480 = vmatpush.msrb.mxu3 %v5160_v1 }
 0x480   :  { %4016 = vmatpush.msk.msra.mxu3 %vm648_vm5, %v5111_v0 }
 0x482   :  { %1692 = vmatpush.msra.mxu3 %v5124_v30  ;;  %3998 = vmatmul.msk.f32.vlgmr.msra.gmra.mxu2 %vm1260_vm15, %v5176_v26 }
 0x483   :  { %4026 = vmatpush.msk.msra.mxu2 %vm648_vm5, %v5111_v0 }
 0x484   :  { %1693 = vmatpush.msra.mxu3 %v5134_v8 }
 0x485   :  { %1796 = vmatpush.msra.mxu2 %v5124_v30 }
 0x486   :  { %1694 = vmatpush.msra.mxu3 %v5144_v3 }
 0x487   :  { %1797 = vmatpush.msra.mxu2 %v5134_v8 }
 0x489   :  { %1798 = vmatpush.msra.mxu2 %v5144_v3 }
 0x48a   :  { %3999 = vmatmul.msk.f32.gmra.mxu2 %vm1260_vm15, %v5203_v10 }
 0x492   :  { %4020 = vmatmul.msk.f32.vlgmr.msrb.gmra.mxu2 %vm1260_vm15, %v5052_v25 }
 0x493   :  { %4031 = vmatpush.msk.msrb.mxu2 %vm648_vm5, %v5111_v0 }
 0x495   :  { %1850 = vmatpush.msrb.mxu2 %v5124_v30 }
 0x497   :  { %1851 = vmatpush.msrb.mxu2 %v5134_v8 }
 0x499   :  { %1852 = vmatpush.msrb.mxu2 %v5144_v3 }
 0x49a   :  { %4021 = vmatmul.msk.f32.gmra.mxu2 %vm1260_vm15, %v5078_v53  ;;  %v5258_v53 = vld [vmem:[%s4388_s6 + $0x1b8] sm:$0xff] }
 0x49b   :  { %1545 = vmatpush.msrb.mxu1 %v5258_v53 }
 0x4a2   :  { %4027 = vmatmul.msk.f32.vlgmr.msra.gmra.mxu2 %vm1260_vm15, %v5102_v58  ;;  %v5261_v58 = vld [vmem:[%s4388_s6 + $0x1b0] sm:$0xff] }
 0x4a3   :  { %1546 = vmatpush.msrb.mxu1 %v5261_v58  ;;  %1922 = vmatpush.msra.mxu2 %v4013_v12 }
 0x4a5   :  { %1547 = vmatpush.msrb.mxu1 %v5266_v59 }
 0x4a7   :  { %1548 = vmatpush.msrb.mxu1 %v5271_v5 }
 0x4aa   :  { %4028 = vmatmul.msk.f32.gmra.mxu2 %vm1260_vm15, %v3954_v28  ;;  %v5279_v28 = vld [vmem:[%s4388_s6 + $0x198] sm:$0xff] }
 0x4ab   :  { %1549 = vmatpush.msrb.mxu1 %v5279_v28 }
 0x4b2   :  { %4032 = vmatmul.msk.f32.vlgmr.msrb.gmra.mxu2 %vm1260_vm15, %v3974_v44 }
 0x4ba   :  { %4033 = vmatmul.msk.f32.gmra.mxu2 %vm1260_vm15, %v3975_v45 }
 0x4e5   :  { %v1287_v46 = vpop.f32.mrf.mxu2 }
 0x4e6   :  { %v1333_v36 = vpop.f32.mrf.mxu3  ;;  %3951 = vmatmul.msk.f32.vlgmr.msra.gmra.mxu1 %vm905_vm10, %v1287_v46 }
 0x4e7   :  { %3949 = vmatmul.msk.f32.vlgmr.msra.gmra.mxu0 %vm905_vm10, %v1333_v36 }
 0x4e8   :  { %1623 = vmatpush.msra.mxu0 %v4013_v12  ;;  %v1976_v12 = vld [vmem:[%s5958_s9 + $0x28] sm:$0xff] }
 0x4ed   :  { %v1290_v33 = vpop.f32.mrf.mxu2 }
 0x4ee   :  { %v1336_v47 = vpop.f32.mrf.mxu3  ;;  %3952 = vmatmul.msk.f32.gmra.mxu1 %vm905_vm10, %v1290_v33 }
 0x4ef   :  { %3950 = vmatmul.msk.f32.gmra.mxu0 %vm905_vm10, %v1336_v47 }
 0x4f5   :  { %v1438_v25 = vpop.f32.mrf.mxu2 }
 0x4f6   :  { %3972 = vmatmul.msk.f32.vlgmr.msrb.gmra.mxu3 %vm905_vm10, %v1438_v25 }
 0x4f7   :  { %3977 = vmatmul.msk.f32.vlgmr.msrb.gmra.mxu0 %vm1260_vm15, %v3974_v44  ;;  %1762 = vmatpush.msrb.mxu3 %v5153_v11  ;;  %v4012_v11 = vld [vmem:[%s4388_s6 + $0x220] sm:$0xff] }
 0x4f8   :  { %1624 = vmatpush.msra.mxu0 %v4012_v11  ;;  %1923 = vmatpush.msra.mxu2 %v4012_v11  ;;  %v5297_v44 = vld [vmem:[%s4388_s6 + $0x180] sm:$0xff] }
 0x4f9   :  { %1763 = vmatpush.msrb.mxu3 %v5156_v21  ;;  %v5285_v21 = vld [vmem:[%s4388_s6 + $0x190] sm:$0xff] }
 0x4fa   :  { %1550 = vmatpush.msrb.mxu1 %v5285_v21 }
 0x4fb   :  { %1764 = vmatpush.msrb.mxu3 %v5165_v22  ;;  %v4011_v22 = vld [vmem:[%s4388_s6 + $0x218] sm:$0xff] }
 0x4fc   :  { %1625 = vmatpush.msra.mxu0 %v4011_v22  ;;  %1924 = vmatpush.msra.mxu2 %v4011_v22 }
 0x4fd   :  { %1765 = vmatpush.msrb.mxu3 %v5170_v60  ;;  %v1441_v62 = vpop.f32.mrf.mxu2  ;;  %v5291_v60 = vld [vmem:[%s4388_s6 + $0x188] sm:$0xff] }
 0x4fe   :  { %3973 = vmatmul.msk.f32.gmra.mxu3 %vm905_vm10, %v1441_v62  ;;  %1551 = vmatpush.msrb.mxu1 %v5291_v60 }
 0x4ff   :  { %3978 = vmatmul.msk.f32.gmra.mxu0 %vm1260_vm15, %v3975_v45  ;;  %1766 = vmatpush.msrb.mxu3 %v5181_v27  ;;  %v4010_v27 = vld [vmem:[%s4388_s6 + $0x210] sm:$0xff] }
 0x500   :  { %1626 = vmatpush.msra.mxu0 %v4010_v27  ;;  %1552 = vmatpush.msrb.mxu1 %v5297_v44 }
 0x501   :  { %1767 = vmatpush.msrb.mxu3 %v5187_v29  ;;  %v5304_v29 = vld [vmem:[%s4388_s6 + $0x178] sm:$0xff]  ;;  %1925 = vmatpush.msra.mxu2 %v4010_v27 }
 0x502   :  { %1553 = vmatpush.msrb.mxu1 %v5304_v29  ;;  %v1974_v27 = vld [vmem:[%s5958_s9 + $0x18] sm:$0xff] }
 0x503   :  { %1768 = vmatpush.msrb.mxu3 %v5194_v32  ;;  %v5309_v32 = vld [vmem:[%s4388_s6 + $0x170] sm:$0xff] }
 0x504   :  { %1554 = vmatpush.msrb.mxu1 %v5309_v32 }
 0x505   :  { %1769 = vmatpush.msrb.mxu3 %v5199_v2  ;;  %v5314_v2 = vld [vmem:[%s4388_s6 + $0x168] sm:$0xff] }
 0x506   :  { %4017 = vmatmul.msk.f32.vlgmr.msra.gmra.mxu3 %vm1260_vm15, %v5049_v48  ;;  %v5319_v48 = vld [vmem:[%s4388_s6 + $0x160] sm:$0xff]  ;;  %1555 = vmatpush.msrb.mxu1 %v5314_v2 }
 0x507   :  { %1770 = vmatpush.msrb.mxu3 %v5207_v40  ;;  %v5326_v40 = vld [vmem:[%s4388_s6 + $0x158] sm:$0xff] }
 0x508   :  { %1556 = vmatpush.msrb.mxu1 %v5319_v48 }
 0x509   :  { %1771 = vmatpush.msrb.mxu3 %v5214_v41  ;;  %v5331_v41 = vld [vmem:[%s4388_s6 + $0x150] sm:$0xff] }
 0x50a   :  { %1557 = vmatpush.msrb.mxu1 %v5326_v40 }
 0x50b   :  { %1772 = vmatpush.msrb.mxu3 %v5218_v42 }
 0x50c   :  { %1558 = vmatpush.msrb.mxu1 %v5331_v41 }
 0x50d   :  { %1773 = vmatpush.msrb.mxu3 %v5222_v35 }
 0x50e   :  { %4018 = vmatmul.msk.f32.gmra.mxu3 %vm1260_vm15, %v5075_v52  ;;  %1733 = vmatpush.msra.mxu1 %v4970_v6  ;;  %v4009_v6 = vld [vmem:[%s4388_s6 + $0x208] sm:$0xff] }
 0x50f   :  { %1774 = vmatpush.msrb.mxu3 %v5226_v24  ;;  %1627 = vmatpush.msra.mxu0 %v4009_v6 }
 0x510   :  { %1734 = vmatpush.msra.mxu1 %v4973_v7  ;;  %v4008_v7 = vld [vmem:[%s4388_s6 + $0x200] sm:$0xff]  ;;  %1926 = vmatpush.msra.mxu2 %v4009_v6 }
 0x511   :  { %1775 = vmatpush.msrb.mxu3 %v5243_v43  ;;  %1628 = vmatpush.msra.mxu0 %v4008_v7 }
 0x512   :  { %1735 = vmatpush.msra.mxu1 %v4977_v9  ;;  %v4007_v9 = vld [vmem:[%s4388_s6 + $0x1f8] sm:$0xff]  ;;  %1927 = vmatpush.msra.mxu2 %v4008_v7  ;;  %v1971_v7 = vld [vmem:[%s5958_s9] sm:$0xff] }
 0x513   :  { %4036 = vmatpush.msk.msra.mxu3 %vm648_vm5, %v5111_v0  ;;  %1629 = vmatpush.msra.mxu0 %v4007_v9 }
 0x514   :  { %1736 = vmatpush.msra.mxu1 %v4981_v13  ;;  %v4006_v13 = vld [vmem:[%s4388_s6 + $0x1f0] sm:$0xff]  ;;  %1928 = vmatpush.msra.mxu2 %v4007_v9 }
 0x515   :  { %1904 = vmatpush.msra.mxu3 %v5124_v30  ;;  %1630 = vmatpush.msra.mxu0 %v4006_v13 }
 0x516   :  { %1737 = vmatpush.msra.mxu1 %v4985_v16  ;;  %v1594_v16 = vpop.f32.mrf.mxu2  ;;  %1929 = vmatpush.msra.mxu2 %v4006_v13 }
 0x517   :  { %1905 = vmatpush.msra.mxu3 %v5134_v8 }
 0x518   :  { %1738 = vmatpush.msra.mxu1 %v4989_v17  ;;  %v4005_v17 = vld [vmem:[%s4388_s6 + $0x1e8] sm:$0xff] }
 0x519   :  { %1906 = vmatpush.msra.mxu3 %v5144_v3  ;;  %1631 = vmatpush.msra.mxu0 %v4005_v17 }
 0x51a   :  { %1739 = vmatpush.msra.mxu1 %v4993_v18  ;;  %v4004_v18 = vld [vmem:[%s4388_s6 + $0x1e0] sm:$0xff]  ;;  %1930 = vmatpush.msra.mxu2 %v4005_v17 }
 0x51b   :  { %1632 = vmatpush.msra.mxu0 %v4004_v18 }
 0x51c   :  { %1740 = vmatpush.msra.mxu1 %v4997_v19  ;;  %v4003_v19 = vld [vmem:[%s4388_s6 + $0x1d8] sm:$0xff]  ;;  %1931 = vmatpush.msra.mxu2 %v4004_v18 }
 0x51d   :  { %1633 = vmatpush.msra.mxu0 %v4003_v19 }
 0x51e   :  { %1741 = vmatpush.msra.mxu1 %v5001_v20  ;;  %v4002_v20 = vld [vmem:[%s4388_s6 + $0x1d0] sm:$0xff]  ;;  %1932 = vmatpush.msra.mxu2 %v4003_v19 }
 0x51f   :  { %1634 = vmatpush.msra.mxu0 %v4002_v20 }
 0x520   :  { %1742 = vmatpush.msra.mxu1 %v5010_v34  ;;  %v1597_v34 = vpop.f32.mrf.mxu2  ;;  %1933 = vmatpush.msra.mxu2 %v4002_v20 }
 0x522   :  { %1743 = vmatpush.msra.mxu1 %v5013_v37  ;;  %v4001_v37 = vld [vmem:[%s4388_s6 + $0x1c8] sm:$0xff] }
 0x523   :  { %1635 = vmatpush.msra.mxu0 %v4001_v37  ;;  %1934 = vmatpush.msra.mxu2 %v4001_v37 }
 0x524   :  { %1744 = vmatpush.msra.mxu1 %v5018_v38  ;;  %v4000_v38 = vld [vmem:[%s4388_s6 + $0x1c0] sm:$0xff]  ;;  %s5970_s6 = sld [smem:[#allocation18_spill]] }
 0x525   :  { %1636 = vmatpush.msra.mxu0 %v4000_v38  ;;  %1935 = vmatpush.msra.mxu2 %v4000_v38 }
 0x526   :  { %1745 = vmatpush.msra.mxu1 %v5021_v14  ;;  %4014 = vmatmul.msk.f32.vlgmr.msra.gmra.mxu0 %vm905_vm10, %v1594_v16 }
 0x527   :  { %1814 = vmatpush.msrb.mxu0 %v5055_v49 }
 0x528   :  { %1746 = vmatpush.msra.mxu1 %v5025_v39  ;;  %v1719_v14 = vpop.f32.mrf.mxu2 }
 0x529   :  { %1815 = vmatpush.msrb.mxu0 %v5063_v31 }
 0x52b   :  { %1816 = vmatpush.msrb.mxu0 %v5067_v50 }
 0x52d   :  { %1817 = vmatpush.msrb.mxu0 %v5071_v51 }
 0x52e   :  { %4015 = vmatmul.msk.f32.gmra.mxu0 %vm905_vm10, %v1597_v34 }
 0x52f   :  { %1818 = vmatpush.msrb.mxu0 %v5081_v54 }
 0x530   :  { %v1722_v52 = vpop.f32.mrf.mxu2 }
 0x531   :  { %1819 = vmatpush.msrb.mxu0 %v5090_v55 }
 0x533   :  { %1820 = vmatpush.msrb.mxu0 %v5094_v56 }
 0x535   :  { %1821 = vmatpush.msrb.mxu0 %v5098_v57 }
 0x537   :  { %1822 = vmatpush.msrb.mxu0 %v5107_v61 }
 0x538   :  { %v1800_v31 = vpop.f32.mrf.mxu2 }
 0x539   :  { %1823 = vmatpush.msrb.mxu0 %v5118_v63 }
 0x53b   :  { %1824 = vmatpush.msrb.mxu0 %v5129_v4 }
 0x53d   :  { %1825 = vmatpush.msrb.mxu0 %v5139_v15 }
 0x53f   :  { %1826 = vmatpush.msrb.mxu0 %v5148_v23 }
 0x540   :  { %v1803_v56 = vpop.f32.mrf.mxu2 }
 0x541   :  { %1827 = vmatpush.msrb.mxu0 %v5160_v1 }
 0x542   :  { %4029 = vmatmul.msk.f32.vlgmr.msrb.gmra.mxu0 %vm905_vm10, %v1800_v31 }
 0x543   :  { %1990 = vmatpush.msra.mxu0 %v1976_v12 }
 0x548   :  { %v1854_v4 = vpop.f32.mrf.mxu2 }
 0x54a   :  { %4030 = vmatmul.msk.f32.gmra.mxu0 %vm905_vm10, %v1803_v56 }
 0x550   :  { %v1857_v15 = vpop.f32.mrf.mxu2 }
 0x563   :  { %v1406_v50 = vpop.f32.mrf.mxu1 }
 0x564   :  { %v1377_v39 = vpop.f32.mrf.mxu0 }
 0x56b   :  { %v1409_v57 = vpop.f32.mrf.mxu1 }
 0x56c   :  { %v1380_v49 = vpop.f32.mrf.mxu0 }
 0x56d   :  { %v1410_v61 = vadd.f32 %v1409_v57, %v1380_v49 }
 0x574   :  { %v1516_v51 = vpop.f32.mrf.mxu0 }
 0x575   :  { %3993 = vmatmul.msk.f32.vlgmr.msrb.gmra.mxu1 %vm905_vm10, %v1516_v51 }
 0x576   :  { %1868 = vmatpush.msrb.mxu1 %v5258_v53 }
 0x578   :  { %1869 = vmatpush.msrb.mxu1 %v5261_v58  ;;  %v4217_v58 = vld [vmem:[%s5957_s5] ss:$0 sm:$0xff] }
 0x579   :  { %v1482_v54 = vpop.f32.mrf.mxu3 }
 0x57a   :  { %1870 = vmatpush.msrb.mxu1 %v5266_v59 }
 0x57c   :  { %v1519_v55 = vpop.f32.mrf.mxu0  ;;  %1871 = vmatpush.msrb.mxu1 %v5271_v5 }
 0x57d   :  { %3994 = vmatmul.msk.f32.gmra.mxu1 %vm905_vm10, %v1519_v55 }
 0x57e   :  { %1872 = vmatpush.msrb.mxu1 %v5279_v28 }
 0x580   :  { %1873 = vmatpush.msrb.mxu1 %v5285_v21  ;;  %v1975_v21 = vld [vmem:[%s5958_s9 + $0x20] sm:$0xff] }
 0x581   :  { %v1485_v0 = vpop.f32.mrf.mxu3  ;;  %1991 = vmatpush.msra.mxu0 %v1975_v21 }
 0x582   :  { %1874 = vmatpush.msrb.mxu1 %v5291_v60  ;;  %v1489_v63 = vadd.f32 %v1485_v0, %v1410_v61 }
 0x583   :  { %1992 = vmatpush.msra.mxu0 %v1974_v27 }
 0x584   :  { %1875 = vmatpush.msrb.mxu1 %v5297_v44 }
 0x585   :  { %4022 = vmatmul.msk.f32.vlgmr.msra.gmra.mxu1 %vm905_vm10, %v1719_v14 }
 0x586   :  { %1876 = vmatpush.msrb.mxu1 %v5304_v29  ;;  %v1973_v29 = vld [vmem:[%s5958_s9 + $0x10] sm:$0xff] }
 0x587   :  { %1993 = vmatpush.msra.mxu0 %v1973_v29 }
 0x588   :  { %1877 = vmatpush.msrb.mxu1 %v5309_v32  ;;  %v1972_v32 = vld [vmem:[%s5958_s9 + $0x8] sm:$0xff] }
 0x589   :  { %v1696_v30 = vpop.f32.mrf.mxu3  ;;  %1994 = vmatpush.msra.mxu0 %v1972_v32 }
 0x58a   :  { %1878 = vmatpush.msrb.mxu1 %v5314_v2  ;;  %4024 = vmatmul.msk.f32.vlgmr.msrb.gmra.mxu3 %vm905_vm10, %v1696_v30 }
 0x58b   :  { %2013 = vmatpush.msrb.mxu3 %v1976_v12  ;;  %1995 = vmatpush.msra.mxu0 %v1971_v7 }
 0x58c   :  { %1879 = vmatpush.msrb.mxu1 %v5319_v48 }
 0x58d   :  { %4023 = vmatmul.msk.f32.gmra.mxu1 %vm905_vm10, %v1722_v52  ;;  %2014 = vmatpush.msrb.mxu3 %v1975_v21 }
 0x58e   :  { %1880 = vmatpush.msrb.mxu1 %v5326_v40 }
 0x58f   :  { %2015 = vmatpush.msrb.mxu3 %v1974_v27  ;;  %v2043_v27 = vld [vmem:[%s5959_s13] sm:$0xf]  ;;  %s4259_s13 = scalar_lea.hbm %s4548_s4, 2 }
 0x590   :  { %1881 = vmatpush.msrb.mxu1 %v5331_v41  ;;  %4043 = vmatpush.msk.msrb.mxu0 %vm648_vm5, %v2043_v27 }
 0x591   :  { %v1699_v8 = vpop.f32.mrf.mxu3  ;;  %2016 = vmatpush.msrb.mxu3 %v1973_v29  ;;  %v5452_v29 = vld [vmem:[%s5960_s17 + $0x28] sm:$0xff] }
 0x592   :  { %4025 = vmatmul.msk.f32.gmra.mxu3 %vm905_vm10, %v1699_v8  ;;  %4045 = vmatpush.msk.msra.mxu1 %vm648_vm5, %v2043_v27 }
 0x593   :  { %2017 = vmatpush.msrb.mxu3 %v1972_v32 }
 0x595   :  { %4034 = vmatmul.msk.f32.vlgmr.msrb.gmra.mxu1 %vm905_vm10, %v1854_v4  ;;  %2018 = vmatpush.msrb.mxu3 %v1971_v7 }
 0x59a   :  { %4037 = vmatmul.msk.f32.vlgmr.msra.gmra.mxu3 %vm1260_vm15, %v5176_v26  ;;  %v1407_v26 = vadd.f32 %v1406_v50, %v1377_v39 }
 0x59c   :  { %v1488_v36 = vadd.f32 %v1482_v54, %v1407_v26 }
 0x59d   :  { %4035 = vmatmul.msk.f32.gmra.mxu1 %vm905_vm10, %v1857_v15 }
 0x5a2   :  { %4038 = vmatmul.msk.f32.gmra.mxu3 %vm1260_vm15, %v5203_v10  ;;  %vm3137_vm15 = vcmask 123904  }
 0x5a3   :  { %v1638_v43 = vpop.f32.mrf.mxu0 }
 0x5ab   :  { %v1641_v46 = vpop.f32.mrf.mxu0 }
 0x5bf   :  { %v1829_v59 = vpop.f32.mrf.mxu0 }
 0x5c7   :  { %v1832_v41 = vpop.f32.mrf.mxu0 }
 0x5f2   :  { %v1560_v35 = vpop.f32.mrf.mxu1 }
 0x5f3   :  { %v1566_v47 = vadd.f32 %v1560_v35, %v1488_v36 }
 0x5f5   :  { %v1644_v53 = vadd.f32 %v1638_v43, %v1566_v47 }
 0x5f7   :  { %v1650_v28 = vadd.f32 %v4217_v58, %v1644_v53 }
 0x5f9   :  { %v5417_v44 = vmax.f32 %v1650_v28, 0.0 }
 0x5fa   :  { %v1563_v24 = vpop.f32.mrf.mxu1 }
 0x5fb   :  { %v1567_v33 = vadd.f32 %v1563_v24, %v1489_v63  ;;  %v1665_v9 = vmul.f32 %v5417_v44, %v5417_v44  ;;  %v1655_v17 = vsel %vm1654_vm3, %v5417_v44, 0.0 }
 0x5fd   :  { %v1645_v25 = vadd.f32 %v1641_v46, %v1567_v33  ;;  %v1667_v37 = vsel %vm1654_vm3, %v1665_v9, 0.0 }
 0x5ff   :  { %v1651_v5 = vadd.f32 %v4217_v58, %v1645_v25 }
 0x601   :  { %v5414_v22 = vmax.f32 %v1651_v5, 0.0 }
 0x602   :  { %v1748_v45 = vpop.f32.mrf.mxu1 }
 0x603   :  { %v1666_v2 = vmul.f32 %v5414_v22, %v5414_v22  ;;  %v1657_v13 = vsel %vm1656_vm1, %v5414_v22, 0.0 }
 0x604   :  { %v1658_v20 = vadd.f32 %v1657_v13, %v1655_v17  ;;  %v2027_v17 = vld [vmem:[%s5961_s21] sm:$0x1] }
 0x605   :  { %v1668_v18 = vsel %vm1656_vm1, %v1666_v2, 0.0 }
 0x606   :  { %v1669_v14 = vadd.f32 %v1668_v18, %v1667_v37  ;;  %v1659_v52 = vrot.slane %v1658_v20, 4 }
 0x608   :  { %v1670_v51 = vrot.slane %v1669_v14, 4  ;;  %v1660_v55 = vadd.f32 %v1659_v52, %v1658_v20  ;;  %v4062_v52 = vld [vmem:[%s5960_s17 + $0x88] sm:$0xff] }
 0x609   :  { %2199 = vmatpush.msrb.mxu1 %v4062_v52 }
 0x60a   :  { %v1751_v10 = vpop.f32.mrf.mxu1  ;;  %v1671_v61 = vadd.f32 %v1670_v51, %v1669_v14  ;;  %v1661_v4 = vrot.slane %v1660_v55, 2  ;;  %v2107_v14 = vld [vmem:[%s5960_s17 + $0x20] sm:$0xff] }
 0x60b   :  { %v4061_v51 = vld [vmem:[%s5960_s17 + $0x80] sm:$0xff] }
 0x60c   :  { %v1662_v35 = vadd.f32 %v1661_v4, %v1660_v55  ;;  %2200 = vmatpush.msrb.mxu1 %v4061_v51  ;;  %v4050_v55 = vld [vmem:[%s5960_s17 + $0x48] sm:$0xff]  ;;  %v4048_v4 = vld [vmem:[%s5960_s17 + $0x38] sm:$0xff] }
 0x60d   :  { %v1777_v3 = vpop.f32.mrf.mxu3 }
 0x60e   :  { %v1778_v62 = vadd.f32 %v1777_v3, %v1748_v45  ;;  %v1663_v36 = vrot.slane %v1662_v35, 1 }
 0x610   :  { %v1835_v60 = vadd.f32 %v1829_v59, %v1778_v62 }
 0x612   :  { %v1883_v11 = vpop.f32.mrf.mxu1 }
 0x613   :  { %v1889_v48 = vadd.f32 %v1883_v11, %v1835_v60 }
 0x615   :  { %v1780_v23 = vpop.f32.mrf.mxu3 }
 0x616   :  { %v1781_v40 = vadd.f32 %v1780_v23, %v1751_v10  ;;  %v1672_v23 = vrot.slane %v1671_v61, 2 }
 0x618   :  { %v1836_v19 = vadd.f32 %v1832_v41, %v1781_v40  ;;  %v1673_v45 = vadd.f32 %v1672_v23, %v1671_v61  ;;  %v2104_v61 = vld [vmem:[%s5960_s17 + $0x8] sm:$0xff] }
 0x61a   :  { %v1886_v34 = vpop.f32.mrf.mxu1  ;;  %v1674_v53 = vrot.slane %v1673_v45, 1 }
 0x61b   :  { %v1890_v39 = vadd.f32 %v1886_v34, %v1836_v19  ;;  %v2040_v34 = vld [vmem:[%s5962_s25] sm:$0x1] }
 0x61c   :  { %v1675_v12 = vadd.f32 %v1674_v53, %v1673_v45 }
 0x61d   :  { %v1908_v1 = vpop.f32.mrf.mxu3 }
 0x61e   :  { %4039 = vmatmul.msk.f32.vlgmr.msra.gmra.mxu2 %vm905_vm10, %v1908_v1 }
 0x625   :  { %v1911_v42 = vpop.f32.mrf.mxu3 }
 0x626   :  { %4040 = vmatmul.msk.f32.gmra.mxu2 %vm905_vm10, %v1911_v42 }
 0x6a1   :  { %v1937_v6 = vpop.f32.mrf.mxu2 }
 0x6a2   :  { %v1943_v16 = vadd.f32 %v1937_v6, %v1889_v48 }
 0x6a4   :  { %v1945_v38 = vadd.f32 %v4217_v58, %v1943_v16 }
 0x6a6   :  { %v5432_v31 = vmax.f32 %v1945_v38, 0.0 }
 0x6a8   :  { %v1958_v56 = vmul.f32 %v5432_v31, %v5432_v31  ;;  %v1949_v0 = vsel %vm1654_vm3, %v5432_v31, 0.0 }
 0x6a9   :  { %v1940_v49 = vpop.f32.mrf.mxu2 }
 0x6aa   :  { %v1944_v50 = vadd.f32 %v1940_v49, %v1890_v39  ;;  %v1960_v15 = vsel %vm1654_vm3, %v1958_v56, 0.0  ;;  %v4052_v39 = vld [vmem:[%s5960_s17 + $0x58] sm:$0xff] }
 0x6ab   :  { %2135 = vmatpush.msra.mxu3 %v4052_v39  ;;  %v2106_v49 = vld [vmem:[%s5960_s17 + $0x18] sm:$0xff]  ;;  %2263 = vmatpush.msrb.mxu2 %v4052_v39 }
 0x6ac   :  { %v1946_v54 = vadd.f32 %v4217_v58, %v1944_v50  ;;  %v1664_v58 = vadd.f32 %v1663_v36, %v1662_v35  ;;  %v4051_v50 = vld [vmem:[%s5960_s17 + $0x50] sm:$0xff]  ;;  %v4060_v56 = vld [vmem:[%s5960_s17 + $0x78] sm:$0xff] }
 0x6ad   :  { %2136 = vmatpush.msra.mxu3 %v4051_v50  ;;  %2264 = vmatpush.msrb.mxu2 %v4051_v50 }
 0x6ae   :  { %v5436_v57 = vmax.f32 %v1946_v54, 0.0  ;;  %v2105_v54 = vld [vmem:[%s5960_s17 + $0x10] sm:$0xff]  ;;  %2201 = vmatpush.msrb.mxu1 %v4060_v56 }
 0x6af   :  { %2137 = vmatpush.msra.mxu3 %v4050_v55  ;;  %2265 = vmatpush.msrb.mxu2 %v4050_v55 }
 0x6b0   :  { %v1950_v63 = vsel %vm1656_vm1, %v5436_v57, 0.0  ;;  %v1959_v30 = vmul.f32 %v5436_v57, %v5436_v57 }
 0x6b1   :  { %v1951_v8 = vadd.f32 %v1950_v63, %v1949_v0  ;;  %v4049_v0 = vld [vmem:[%s5960_s17 + $0x40] sm:$0xff]  ;;  %v4059_v63 = vld [vmem:[%s5960_s17 + $0x70] sm:$0xff] }
 0x6b2   :  { %v1961_v3 = vsel %vm1656_vm1, %v1959_v30, 0.0  ;;  %v2103_v30 = vld [vmem:[%s5960_s17] sm:$0xff]  ;;  %2138 = vmatpush.msra.mxu3 %v4049_v0  ;;  %2202 = vmatpush.msrb.mxu1 %v4059_v63  ;;  %vm3392_vm1 = vcmask 130048  }
 0x6b3   :  { %v1952_v1 = vrot.slane %v1951_v8, 4  ;;  %v1962_v42 = vadd.f32 %v1961_v3, %v1960_v15  ;;  %2266 = vmatpush.msrb.mxu2 %v4049_v0  ;;  %v4047_v15 = vld [vmem:[%s5960_s17 + $0x30] sm:$0xff]  ;;  %v4057_v3 = vld [vmem:[%s5960_s17 + $0x60] sm:$0xff] }
 0x6b4   :  { %2139 = vmatpush.msra.mxu3 %v4048_v4 }
 0x6b5   :  { %v1953_v24 = vadd.f32 %v1952_v1, %v1951_v8  ;;  %v1963_v43 = vrot.slane %v1962_v42, 4  ;;  %v4058_v8 = vld [vmem:[%s5960_s17 + $0x68] sm:$0xff]  ;;  %2267 = vmatpush.msrb.mxu2 %v4048_v4 }
 0x6b6   :  { %2203 = vmatpush.msrb.mxu1 %v4058_v8  ;;  %2140 = vmatpush.msra.mxu3 %v4047_v15 }
 0x6b7   :  { %v1954_v26 = vrot.slane %v1953_v24, 2  ;;  %v1964_v46 = vadd.f32 %v1963_v43, %v1962_v42  ;;  %2268 = vmatpush.msrb.mxu2 %v4047_v15 }
 0x6b8   :  { %2204 = vmatpush.msrb.mxu1 %v4057_v3 }
 0x6b9   :  { %v1955_v33 = vadd.f32 %v1954_v26, %v1953_v24  ;;  %v1965_v10 = vrot.slane %v1964_v46, 2 }
 0x6bb   :  { %v1956_v47 = vrot.slane %v1955_v33, 1  ;;  %v1966_v25 = vadd.f32 %v1965_v10, %v1964_v46 }
 0x6bd   :  { %v1957_v59 = vadd.f32 %v1956_v47, %v1955_v33  ;;  %v1967_v5 = vrot.slane %v1966_v25, 1 }
 0x6bf   :  { %v1969_v62 = vadd.f32 %v1957_v59, %v1664_v58  ;;  %v1968_v28 = vadd.f32 %v1967_v5, %v1966_v25 }
 0x6c1   :  { %4041 = vmatmul.msk.f32.vlgmr.msra.gmra.mxu0 %vm1654_vm3, %v1969_v62  ;;  %v1970_v11 = vadd.f32 %v1968_v28, %v1675_v12 }
 0x6c2   :  { %2162 = vmatpush.msra.mxu0 %v5452_v29 }
 0x6c3   :  { %4042 = vmatmul.msk.f32.vlgmr.msrb.gmra.mxu3 %vm1654_vm3, %v1970_v11 }
 0x6c4   :  { %2163 = vmatpush.msra.mxu0 %v2107_v14  ;;  %2290 = vmatpush.msrb.mxu3 %v5452_v29  ;;  %v2369_v29 = vld [vmem:[%s5963_s29 + $0x40] sm:$0xff] }
 0x6c6   :  { %2164 = vmatpush.msra.mxu0 %v2106_v49  ;;  %2291 = vmatpush.msrb.mxu3 %v2107_v14 }
 0x6c8   :  { %2165 = vmatpush.msra.mxu0 %v2105_v54  ;;  %2292 = vmatpush.msrb.mxu3 %v2106_v49  ;;  %v2362_v49 = vld [vmem:[%s5963_s29 + $0x8] sm:$0xff] }
 0x6ca   :  { %2166 = vmatpush.msra.mxu0 %v2104_v61  ;;  %2293 = vmatpush.msrb.mxu3 %v2105_v54  ;;  %v2361_v54 = vld [vmem:[%s5963_s29] sm:$0xff] }
 0x6cc   :  { %2167 = vmatpush.msra.mxu0 %v2103_v30  ;;  %2294 = vmatpush.msrb.mxu3 %v2104_v61 }
 0x6ce   :  { %2295 = vmatpush.msrb.mxu3 %v2103_v30 }
 0x73e   :  { %v1997_v21 = vpop.f32.mrf.mxu0 }
 0x73f   :  { %v2023_v60 = vmul.f32 0.0034722222, %v1997_v21 }
 0x741   :  { %v2025_v2 = vmul.f32 %v2023_v60, %v2023_v60 }
 0x746   :  { %v2020_v32 = vpop.f32.mrf.mxu3 }
 0x747   :  { %v2024_v48 = vmul.f32 0.0034722222, %v2020_v32 }
 0x749   :  { %v2026_v40 = vsub.f32 %v2024_v48, %v2025_v2  ;;  %v2368_v2 = vld [vmem:[%s5963_s29 + $0x38] sm:$0xff] }
 0x74b   :  { %v2028_v41 = vadd.f32 1e-05, %v2026_v40  ;;  %v4218_v40 = vld [vmem:[%s5964_s3] ss:$0 sm:$0xff] }
 0x74d   :  { %4225 = vrsqrt.f32 %v2028_v41  ;;  %vm2035_vm5 = vweird.f32 %v2028_v41 }
 0x753   :  { %v4226_v6 = vpop.eup %4225 }
 0x754   :  { %v2030_v7 = vmul.f32 %v4226_v6, %v2028_v41  ;;  %vm2036_vm4 = vweird.f32 %v4226_v6 }
 0x755   :  { %vm2037_vm6 = vmor %vm2035_vm5, %vm2036_vm4 }
 0x756   :  { %v2031_v9 = vmul.f32 %v4226_v6, %v2030_v7 }
 0x758   :  { %v2032_v13 = vmul.f32 0.5, %v2031_v9 }
 0x75a   :  { %v2033_v16 = vsub.f32 1.5, %v2032_v13  ;;  %v2366_v13 = vld [vmem:[%s5963_s29 + $0x28] sm:$0xff] }
 0x75c   :  { %v2034_v18 = vmul.f32 %v4226_v6, %v2033_v16 }
 0x75e   :  { %v2038_v19 = vsel %vm2037_vm6, %v4226_v6, %v2034_v18  ;;  %v2367_v6 = vld [vmem:[%s5963_s29 + $0x30] sm:$0xff]  ;;  %v2365_v18 = vld [vmem:[%s5963_s29 + $0x20] sm:$0xff] }
 0x75f   :  { %v2039_v20 = vmul.f32 %v2038_v19, %v2027_v17 }
 0x761   :  { %v2041_v37 = vmul.f32 %v2039_v20, %v2023_v60  ;;  %4044 = vmatmul.msk.f32.vlgmr.msrb.gmra.mxu0 %vm644_vm9, %v2039_v20  ;;  %v2370_v60 = vld [vmem:[%s5963_s29 + $0x48] sm:$0xff] }
 0x762   :  { %2320 = vmatpush.msrb.mxu0 %v4062_v52  ;;  %v2363_v52 = vld [vmem:[%s5963_s29 + $0x10] sm:$0xff] }
 0x763   :  { %v2042_v38 = vsub.f32 %v2040_v34, %v2041_v37  ;;  %v2364_v34 = vld [vmem:[%s5963_s29 + $0x18] sm:$0xff] }
 0x764   :  { %2321 = vmatpush.msrb.mxu0 %v4061_v51 }
 0x765   :  { %4046 = vmatmul.msk.f32.vlgmr.msra.gmra.mxu1 %vm644_vm9, %v2042_v38 }
 0x766   :  { %2322 = vmatpush.msrb.mxu0 %v4060_v56 }
 0x768   :  { %2323 = vmatpush.msrb.mxu0 %v4059_v63 }
 0x76a   :  { %2324 = vmatpush.msrb.mxu0 %v4058_v8 }
 0x76c   :  { %2325 = vmatpush.msrb.mxu0 %v4057_v3 }
 0x7de   :  { %v2067_v23 = vpop.f32.mrf.mxu0 }
 0x7df   :  { %v2093_v1 = vperm.slane %v2067_v23, 0 }
 0x7e1   :  { %v2094_v42 = vmul.f32 %v2093_v1, %v5417_v44  ;;  %v2095_v24 = vmul.f32 %v2093_v1, %v5414_v22  ;;  %v2099_v43 = vmul.f32 %v2093_v1, %v5432_v31  ;;  %v2100_v45 = vmul.f32 %v2093_v1, %v5436_v57 }
 0x7e2   :  { %v2090_v35 = vpop.f32.mrf.mxu1 }
 0x7e3   :  { %v2096_v26 = vperm.slane %v2090_v35, 0 }
 0x7e5   :  { %v2097_v46 = vadd.f32 %v2096_v26, %v2094_v42  ;;  %v2098_v36 = vadd.f32 %v2096_v26, %v2095_v24  ;;  %v2101_v33 = vadd.f32 %v2099_v43, %v2096_v26  ;;  %v2102_v10 = vadd.f32 %v2100_v45, %v2096_v26 }
 0x7e7   :  { %4055 = vmatmul.msk.f32.vlgmr.msra.gmra.mxu0 %vm1654_vm3, %v2097_v46  ;;  %v2118_v47 = vrot.slane %v2097_v46, 1  ;;  %v2119_v25 = vrot.slane %v2098_v36, 1  ;;  %v2182_v53 = vrot.slane %v2097_v46, 2  ;;  %v2183_v58 = vrot.slane %v2098_v36, 2 }
 0x7e8   :  { %v2246_v59 = vrot.slane %v2101_v33, 1  ;;  %v2247_v44 = vrot.slane %v2102_v10, 1  ;;  %v2303_v57 = vrot.slane %v2101_v33, 2  ;;  %v2304_v62 = vrot.slane %v2102_v10, 2  ;;  %2380 = vmatpush.msra.mxu0 %v2370_v60 }
 0x7e9   :  { %v2120_v5 = vsel %vm208_vm0, %v2118_v47, %v2119_v25  ;;  %v2184_v22 = vsel %vm296_vm2, %v2182_v53, %v2183_v58 }
 0x7ea   :  { %4053 = vmatmul.msk.f32.vlgmr.msra.gmra.mxu3 %vm1654_vm3, %v2120_v5  ;;  %4063 = vmatmul.msk.f32.vlgmr.msrb.gmra.mxu1 %vm1654_vm3, %v2184_v22  ;;  %v2248_v31 = vsel %vm208_vm0, %v2246_v59, %v2247_v44  ;;  %v2305_v12 = vsel %vm296_vm2, %v2303_v57, %v2304_v62 }
 0x7eb   :  { %4065 = vmatmul.msk.f32.vlgmr.msrb.gmra.mxu2 %vm1654_vm3, %v2248_v31  ;;  %2403 = vmatpush.msra.mxu3 %v2370_v60 }
 0x7ec   :  { %2381 = vmatpush.msra.mxu0 %v2369_v29 }
 0x7ed   :  { %2404 = vmatpush.msra.mxu3 %v2369_v29 }
 0x7ee   :  { %2382 = vmatpush.msra.mxu0 %v2368_v2 }
 0x7ef   :  { %4056 = vmatmul.msk.f32.gmra.mxu0 %vm1654_vm3, %v2098_v36  ;;  %2405 = vmatpush.msra.mxu3 %v2368_v2 }
 0x7f0   :  { %2383 = vmatpush.msra.mxu0 %v2367_v6 }
 0x7f1   :  { %2406 = vmatpush.msra.mxu3 %v2367_v6 }
 0x7f2   :  { %4054 = vmatmul.msk.f32.gmra.mxu3 %vm1654_vm3, %v2119_v25  ;;  %4064 = vmatmul.msk.f32.gmra.mxu1 %vm1654_vm3, %v2183_v58 }
 0x7f3   :  { %4066 = vmatmul.msk.f32.gmra.mxu2 %vm1654_vm3, %v2247_v44  ;;  %2384 = vmatpush.msra.mxu0 %v2366_v13 }
 0x7f4   :  { %2407 = vmatpush.msra.mxu3 %v2366_v13 }
 0x7f5   :  { %2385 = vmatpush.msra.mxu0 %v2365_v18 }
 0x7f6   :  { %2408 = vmatpush.msra.mxu3 %v2365_v18 }
 0x7f7   :  { %4069 = vmatmul.msk.f32.vlgmr.msrb.gmra.mxu0 %vm1654_vm3, %v2305_v12 }
 0x7f8   :  { %2386 = vmatpush.msra.mxu0 %v2364_v34  ;;  %2409 = vmatpush.msra.mxu3 %v2364_v34  ;;  %v5542_v34 = vld [vmem:[%s5966_s14 + $0x48] sm:$0xff] }
 0x7f9   :  { %2551 = vmatpush.msra.mxu2 %v5542_v34 }
 0x7fa   :  { %4067 = vmatmul.msk.f32.vlgmr.msrb.gmra.mxu3 %vm1654_vm3, %v2101_v33  ;;  %2387 = vmatpush.msra.mxu0 %v2363_v52 }
 0x7fb   :  { %2410 = vmatpush.msra.mxu3 %v2363_v52 }
 0x7fc   :  { %2388 = vmatpush.msra.mxu0 %v2362_v49 }
 0x7fd   :  { %2411 = vmatpush.msra.mxu3 %v2362_v49  ;;  %v4083_v49 = vld [vmem:[%s5966_s14 + $0x90] sm:$0xff] }
 0x7fe   :  { %2389 = vmatpush.msra.mxu0 %v2361_v54 }
 0x7ff   :  { %4070 = vmatmul.msk.f32.gmra.mxu0 %vm1654_vm3, %v2304_v62  ;;  %2412 = vmatpush.msra.mxu3 %v2361_v54  ;;  %v5553_v54 = vld [vmem:[%s5966_s14 + $0x38] sm:$0xff] }
 0x802   :  { %4068 = vmatmul.msk.f32.gmra.mxu3 %vm1654_vm3, %v2102_v10 }
 0x864   :  { %v2169_v28 = vpop.f32.mrf.mxu0 }
 0x867   :  { %v2206_v11 = vpop.f32.mrf.mxu1 }
 0x86c   :  { %v2172_v32 = vpop.f32.mrf.mxu0 }
 0x86d   :  { %v2142_v21 = vpop.f32.mrf.mxu3 }
 0x86e   :  { %v2170_v27 = vadd.f32 %v2169_v28, %v2142_v21  ;;  %v2270_v20 = vpop.f32.mrf.mxu2 }
 0x86f   :  { %v2209_v9 = vpop.f32.mrf.mxu1 }
 0x870   :  { %v2212_v48 = vadd.f32 %v2206_v11, %v2170_v27 }
 0x872   :  { %v2218_v16 = vadd.f32 %v4218_v40, %v2212_v48 }
 0x874   :  { %v5505_v37 = vmax.f32 %v2218_v16, 0.0  ;;  %v2327_v14 = vpop.f32.mrf.mxu0 }
 0x875   :  { %v2145_v41 = vpop.f32.mrf.mxu3 }
 0x876   :  { %v2173_v7 = vadd.f32 %v2172_v32, %v2145_v41  ;;  %v2233_v55 = vmul.f32 %v5505_v37, %v5505_v37  ;;  %v2223_v0 = vsel %vm2222_vm8, %v5505_v37, 0.0  ;;  %v2273_v3 = vpop.f32.mrf.mxu2 }
 0x878   :  { %v2213_v17 = vadd.f32 %v2209_v9, %v2173_v7  ;;  %v2235_v4 = vsel %vm2222_vm8, %v2233_v55, 0.0  ;;  %v4082_v55 = vld [vmem:[%s5966_s14 + $0x88] sm:$0xff] }
 0x87a   :  { %v2219_v19 = vadd.f32 %v4218_v40, %v2213_v17 }
 0x87c   :  { %v5507_v38 = vmax.f32 %v2219_v19, 0.0  ;;  %v2330_v35 = vpop.f32.mrf.mxu0 }
 0x87d   :  { %v2297_v39 = vpop.f32.mrf.mxu3 }
 0x87e   :  { %v2234_v50 = vmul.f32 %v5507_v38, %v5507_v38  ;;  %v2298_v51 = vadd.f32 %v2297_v39, %v2270_v20  ;;  %v2225_v56 = vsel %vm2224_vm7, %v5507_v38, 0.0  ;;  %v2437_v20 = vld [vmem:[%s5965_s8] sm:$0xff]  ;;  %v4084_v39 = vld [vmem:[%s5966_s14 + $0x98] sm:$0xff] }
 0x87f   :  { %v2226_v30 = vadd.f32 %v2225_v56, %v2223_v0  ;;  %2457 = vmatpush.msrb.mxu3 %v2437_v20  ;;  %2480 = vmatpush.msrb.mxu0 %v2437_v20  ;;  %v4081_v0 = vld [vmem:[%s5966_s14 + $0x80] sm:$0xff] }
 0x880   :  { %v2333_v61 = vadd.f32 %v2327_v14, %v2298_v51  ;;  %v2236_v63 = vsel %vm2224_vm7, %v2234_v50, 0.0  ;;  %v5545_v14 = vld [vmem:[%s5966_s14 + $0x40] sm:$0xff]  ;;  %2529 = vmatpush.msra.mxu1 %v4084_v39 }
 0x881   :  { %v2237_v15 = vadd.f32 %v2236_v63, %v2235_v4  ;;  %v2227_v42 = vrot.slane %v2226_v30, 4  ;;  %2552 = vmatpush.msra.mxu2 %v5545_v14  ;;  %v4096_v63 = vld [vmem:[%s5966_s14 + $0xe8] sm:$0xff] }
 0x882   :  { %v2335_v8 = vadd.f32 %v4218_v40, %v2333_v61  ;;  %2530 = vmatpush.msra.mxu1 %v4083_v49  ;;  %v5558_v61 = vld [vmem:[%s5966_s14 + $0x30] sm:$0xff] }
 0x883   :  { %v2238_v45 = vrot.slane %v2237_v15, 4  ;;  %v2228_v46 = vadd.f32 %v2227_v42, %v2226_v30  ;;  %2553 = vmatpush.msra.mxu2 %v5553_v54  ;;  %v4095_v30 = vld [vmem:[%s5966_s14 + $0xe0] sm:$0xff]  ;;  %v4093_v42 = vld [vmem:[%s5966_s14 + $0xd0] sm:$0xff] }
 0x884   :  { %v5522_v24 = vmax.f32 %v2335_v8, 0.0  ;;  %2531 = vmatpush.msra.mxu1 %v4082_v55  ;;  %v5565_v8 = vld [vmem:[%s5966_s14 + $0x28] sm:$0xff] }
 0x885   :  { %v2300_v23 = vpop.f32.mrf.mxu3  ;;  %v2239_v10 = vadd.f32 %v2238_v45, %v2237_v15  ;;  %v2229_v58 = vrot.slane %v2228_v46, 2  ;;  %v4080_v15 = vld [vmem:[%s5966_s14 + $0x78] sm:$0xff]  ;;  %2554 = vmatpush.msra.mxu2 %v5558_v61  ;;  %v5582_v45 = vld [vmem:[%s5966_s14 + $0x10] sm:$0xff] }
 0x886   :  { %v2301_v1 = vadd.f32 %v2300_v23, %v2273_v3  ;;  %v2348_v36 = vmul.f32 %v5522_v24, %v5522_v24  ;;  %v2339_v47 = vsel %vm2222_vm8, %v5522_v24, 0.0  ;;  %2532 = vmatpush.msra.mxu1 %v4081_v0  ;;  %v4094_v3 = vld [vmem:[%s5966_s14 + $0xd8] sm:$0xff]  ;;  %v5571_v23 = vld [vmem:[%s5966_s14 + $0x20] sm:$0xff] }
 0x887   :  { %v2240_v22 = vrot.slane %v2239_v10, 2  ;;  %v2230_v62 = vadd.f32 %v2229_v58, %v2228_v46  ;;  %2555 = vmatpush.msra.mxu2 %v5565_v8 }
 0x888   :  { %v2334_v43 = vadd.f32 %v2330_v35, %v2301_v1  ;;  %v2350_v44 = vsel %vm2222_vm8, %v2348_v36, 0.0  ;;  %v4079_v1 = vld [vmem:[%s5966_s14 + $0x70] sm:$0xff]  ;;  %2533 = vmatpush.msra.mxu1 %v4080_v15  ;;  %v5577_v35 = vld [vmem:[%s5966_s14 + $0x18] sm:$0xff]  ;;  %v2496_v36 = vld [vmem:[%s5966_s14 + $0x8] sm:$0xff] }
 0x889   :  { %v2241_v11 = vadd.f32 %v2240_v22, %v2239_v10  ;;  %v2231_v27 = vrot.slane %v2230_v62, 1  ;;  %2556 = vmatpush.msra.mxu2 %v5571_v23  ;;  %v4076_v10 = vld [vmem:[%s5966_s14 + $0x58] sm:$0xff] }
 0x88a   :  { %v2336_v26 = vadd.f32 %v4218_v40, %v2334_v43  ;;  %v4078_v43 = vld [vmem:[%s5966_s14 + $0x68] sm:$0xff]  ;;  %2534 = vmatpush.msra.mxu1 %v4079_v1 }
 0x88b   :  { %v2242_v2 = vrot.slane %v2241_v11, 1  ;;  %v2232_v41 = vadd.f32 %v2231_v27, %v2230_v62  ;;  %2557 = vmatpush.msra.mxu2 %v5577_v35  ;;  %v4089_v27 = vld [vmem:[%s5966_s14 + $0xb0] sm:$0xff] }
 0x88c   :  { %v5526_v33 = vmax.f32 %v2336_v26, 0.0  ;;  %v4077_v26 = vld [vmem:[%s5966_s14 + $0x60] sm:$0xff]  ;;  %2535 = vmatpush.msra.mxu1 %v4078_v43 }
 0x88d   :  { %v2243_v9 = vadd.f32 %v2242_v2, %v2241_v11  ;;  %2558 = vmatpush.msra.mxu2 %v5582_v45  ;;  %v4092_v11 = vld [vmem:[%s5966_s14 + $0xc8] sm:$0xff] }
 0x88e   :  { %v2340_v25 = vsel %vm2224_vm7, %v5526_v33, 0.0  ;;  %v2349_v53 = vmul.f32 %v5526_v33, %v5526_v33  ;;  %2536 = vmatpush.msra.mxu1 %v4077_v26 }
 0x88f   :  { %v2341_v59 = vadd.f32 %v2340_v25, %v2339_v47  ;;  %v2495_v25 = vld [vmem:[%s5966_s14] sm:$0xff]  ;;  %2559 = vmatpush.msra.mxu2 %v2496_v36 }
 0x890   :  { %v2351_v5 = vsel %vm2224_vm7, %v2349_v53, 0.0  ;;  %2537 = vmatpush.msra.mxu1 %v4076_v10 }
 0x891   :  { %v2342_v31 = vrot.slane %v2341_v59, 4  ;;  %v2352_v57 = vadd.f32 %v2351_v5, %v2350_v44  ;;  %2560 = vmatpush.msra.mxu2 %v2495_v25  ;;  %v2421_v44 = vld [vmem:[%s5967_s19] sm:$0x1] }
 0x893   :  { %v2343_v12 = vadd.f32 %v2342_v31, %v2341_v59  ;;  %v2353_v28 = vrot.slane %v2352_v57, 4  ;;  %2684 = vmatpush.msrb.mxu2 %v4096_v63 }
 0x895   :  { %v2344_v21 = vrot.slane %v2343_v12, 2  ;;  %v2354_v60 = vadd.f32 %v2353_v28, %v2352_v57  ;;  %2685 = vmatpush.msrb.mxu2 %v4095_v30  ;;  %v2434_v57 = vld [vmem:[%s5968_s24] sm:$0x1]  ;;  %v4075_v28 = vld [vmem:[%s5966_s14 + $0x50] sm:$0xff] }
 0x896   :  { %2538 = vmatpush.msra.mxu1 %v4075_v28 }
 0x897   :  { %v2345_v29 = vadd.f32 %v2344_v21, %v2343_v12  ;;  %v2355_v32 = vrot.slane %v2354_v60, 2  ;;  %2686 = vmatpush.msrb.mxu2 %v4094_v3  ;;  %v4091_v21 = vld [vmem:[%s5966_s14 + $0xc0] sm:$0xff] }
 0x898   :  { %2659 = vmatpush.msrb.mxu1 %v5542_v34 }
 0x899   :  { %v2346_v48 = vrot.slane %v2345_v29, 1  ;;  %v2356_v40 = vadd.f32 %v2355_v32, %v2354_v60  ;;  %2687 = vmatpush.msrb.mxu2 %v4093_v42  ;;  %v4090_v60 = vld [vmem:[%s5966_s14 + $0xb8] sm:$0xff]  ;;  %v4087_v32 = vld [vmem:[%s5966_s14 + $0xa0] sm:$0xff] }
 0x89a   :  { %2660 = vmatpush.msrb.mxu1 %v5545_v14 }
 0x89b   :  { %v2347_v6 = vadd.f32 %v2346_v48, %v2345_v29  ;;  %v2357_v7 = vrot.slane %v2356_v40, 1  ;;  %2688 = vmatpush.msrb.mxu2 %v4092_v11  ;;  %v4088_v29 = vld [vmem:[%s5966_s14 + $0xa8] sm:$0xff] }
 0x89c   :  { %2661 = vmatpush.msrb.mxu1 %v5553_v54  ;;  %v2725_v54 = vld [vmem:[%s5969_s30 + $0x38] sm:$0xff] }
 0x89d   :  { %v2358_v13 = vadd.f32 %v2357_v7, %v2356_v40  ;;  %v2359_v16 = vadd.f32 %v2347_v6, %v2232_v41  ;;  %2689 = vmatpush.msrb.mxu2 %v4091_v21 }
 0x89e   :  { %2662 = vmatpush.msrb.mxu1 %v5558_v61  ;;  %v2722_v61 = vld [vmem:[%s5969_s30 + $0x20] sm:$0xff] }
 0x89f   :  { %4071 = vmatmul.msk.f32.vlgmr.msra.gmra.mxu0 %vm2222_vm8, %v2359_v16  ;;  %v2360_v17 = vadd.f32 %v2358_v13, %v2243_v9  ;;  %2690 = vmatpush.msrb.mxu2 %v4090_v60 }
 0x8a0   :  { %2637 = vmatpush.msra.mxu0 %v4084_v39  ;;  %2663 = vmatpush.msrb.mxu1 %v5565_v8  ;;  %v2718_v8 = vld [vmem:[%s5969_s30] sm:$0xff] }
 0x8a1   :  { %4072 = vmatmul.msk.f32.vlgmr.msra.gmra.mxu3 %vm2222_vm8, %v2360_v17  ;;  %2691 = vmatpush.msrb.mxu2 %v4089_v27 }
 0x8a2   :  { %2638 = vmatpush.msra.mxu0 %v4083_v49  ;;  %2587 = vmatpush.msra.mxu3 %v4096_v63  ;;  %v2720_v63 = vld [vmem:[%s5969_s30 + $0x10] sm:$0xff] }
 0x8a3   :  { %2664 = vmatpush.msrb.mxu1 %v5571_v23  ;;  %2692 = vmatpush.msrb.mxu2 %v4088_v29  ;;  %v4219_v23 = vld [vmem:[%s5970_s6] ss:$0 sm:$0xff] }
 0x8a4   :  { %2639 = vmatpush.msra.mxu0 %v4082_v55  ;;  %2588 = vmatpush.msra.mxu3 %v4095_v30  ;;  %v2724_v55 = vld [vmem:[%s5969_s30 + $0x30] sm:$0xff] }
 0x8a5   :  { %2665 = vmatpush.msrb.mxu1 %v5577_v35  ;;  %2693 = vmatpush.msrb.mxu2 %v4087_v32 }
 0x8a6   :  { %2640 = vmatpush.msra.mxu0 %v4081_v0  ;;  %2589 = vmatpush.msra.mxu3 %v4094_v3  ;;  %v2721_v0 = vld [vmem:[%s5969_s30 + $0x18] sm:$0xff] }
 0x8a7   :  { %2666 = vmatpush.msrb.mxu1 %v5582_v45 }
 0x8a8   :  { %2641 = vmatpush.msra.mxu0 %v4080_v15  ;;  %2590 = vmatpush.msra.mxu3 %v4093_v42 }
 0x8a9   :  { %2667 = vmatpush.msrb.mxu1 %v2496_v36 }
 0x8aa   :  { %2642 = vmatpush.msra.mxu0 %v4079_v1  ;;  %2591 = vmatpush.msra.mxu3 %v4092_v11 }
 0x8ab   :  { %2668 = vmatpush.msrb.mxu1 %v2495_v25 }
 0x8ac   :  { %2643 = vmatpush.msra.mxu0 %v4078_v43  ;;  %2592 = vmatpush.msra.mxu3 %v4091_v21 }
 0x8ae   :  { %2644 = vmatpush.msra.mxu0 %v4077_v26  ;;  %2593 = vmatpush.msra.mxu3 %v4090_v60 }
 0x8b0   :  { %2645 = vmatpush.msra.mxu0 %v4076_v10  ;;  %2594 = vmatpush.msra.mxu3 %v4089_v27 }
 0x8b2   :  { %2646 = vmatpush.msra.mxu0 %v4075_v28  ;;  %2595 = vmatpush.msra.mxu3 %v4088_v29 }
 0x8b4   :  { %2596 = vmatpush.msra.mxu3 %v4087_v32 }
 0x91c   :  { %v2391_v18 = vpop.f32.mrf.mxu0 }
 0x91d   :  { %v5538_v19 = vmul.f32 0.005, %v2391_v18 }
 0x91f   :  { %v2419_v50 = vmul.f32 %v5538_v19, %v5538_v19 }
 0x924   :  { %v2414_v52 = vpop.f32.mrf.mxu3 }
 0x925   :  { %v2418_v51 = vmul.f32 0.005, %v2414_v52 }
 0x927   :  { %v2420_v56 = vsub.f32 %v2418_v51, %v2419_v50 }
 0x929   :  { %v2422_v4 = vadd.f32 1e-05, %v2420_v56  ;;  %v2723_v56 = vld [vmem:[%s5969_s30 + $0x28] sm:$0xff] }
 0x92b   :  { %4227 = vrsqrt.f32 %v2422_v4  ;;  %vm2429_vm10 = vweird.f32 %v2422_v4 }
 0x931   :  { %v4228_v46 = vpop.eup %4227 }
 0x932   :  { %v2424_v47 = vmul.f32 %v4228_v46, %v2422_v4  ;;  %vm2430_vm9 = vweird.f32 %v4228_v46  ;;  %v2719_v4 = vld [vmem:[%s5969_s30 + $0x8] sm:$0xff] }
 0x933   :  { %vm2431_vm11 = vmor %vm2429_vm10, %vm2430_vm9  ;;  %vm3678_vm9 = vcmask 327680  }
 0x934   :  { %v2425_v53 = vmul.f32 %v4228_v46, %v2424_v47 }
 0x936   :  { %v2426_v58 = vmul.f32 0.5, %v2425_v53 }
 0x938   :  { %v2427_v59 = vsub.f32 1.5, %v2426_v58 }
 0x93a   :  { %v2428_v5 = vmul.f32 %v4228_v46, %v2427_v59 }
 0x93c   :  { %v2432_v22 = vsel %vm2431_vm11, %v4228_v46, %v2428_v5 }
 0x93d   :  { %v2433_v31 = vmul.f32 %v2432_v22, %v2421_v44 }
 0x93f   :  { %v2435_v62 = vmul.f32 %v2433_v31, %v5538_v19  ;;  %4073 = vmatmul.msk.f32.vlgmr.msrb.gmra.mxu3 %vm2438_vm12, %v2433_v31 }
 0x940   :  { %2737 = vmatpush.msrb.mxu3 %v2725_v54 }
 0x941   :  { %v2436_v12 = vsub.f32 %v2434_v57, %v2435_v62 }
 0x942   :  { %2738 = vmatpush.msrb.mxu3 %v2724_v55 }
 0x943   :  { %4074 = vmatmul.msk.f32.vlgmr.msrb.gmra.mxu0 %vm2438_vm12, %v2436_v12 }
 0x944   :  { %2760 = vmatpush.msrb.mxu0 %v2725_v54  ;;  %2739 = vmatpush.msrb.mxu3 %v2723_v56 }
 0x946   :  { %2761 = vmatpush.msrb.mxu0 %v2724_v55  ;;  %2740 = vmatpush.msrb.mxu3 %v2722_v61 }
 0x948   :  { %2762 = vmatpush.msrb.mxu0 %v2723_v56  ;;  %2741 = vmatpush.msrb.mxu3 %v2721_v0 }
 0x94a   :  { %2763 = vmatpush.msrb.mxu0 %v2722_v61  ;;  %2742 = vmatpush.msrb.mxu3 %v2720_v63 }
 0x94c   :  { %2764 = vmatpush.msrb.mxu0 %v2721_v0  ;;  %2743 = vmatpush.msrb.mxu3 %v2719_v4  ;;  %v2776_v0 = vld [vmem:[%s5972_s10] sm:$0x1] }
 0x94e   :  { %2765 = vmatpush.msrb.mxu0 %v2720_v63  ;;  %2744 = vmatpush.msrb.mxu3 %v2718_v8 }
 0x950   :  { %2766 = vmatpush.msrb.mxu0 %v2719_v4 }
 0x952   :  { %2767 = vmatpush.msrb.mxu0 %v2718_v8  ;;  %v2789_v8 = vld [vmem:[%s5973_s11] sm:$0x1] }
 0x9c0   :  { %v2482_v2 = vpop.f32.mrf.mxu0 }
 0x9c1   :  { %v2488_v41 = vperm.slane %v2482_v2, 0 }
 0x9c2   :  { %v2459_v48 = vpop.f32.mrf.mxu3 }
 0x9c3   :  { %v2485_v40 = vperm.slane %v2459_v48, 0 }
 0x9c5   :  { %v2486_v6 = vmul.f32 %v2485_v40, %v5505_v37  ;;  %v2487_v7 = vmul.f32 %v2485_v40, %v5507_v38  ;;  %v2491_v9 = vmul.f32 %v2485_v40, %v5522_v24  ;;  %v2492_v13 = vmul.f32 %v2485_v40, %v5526_v33 }
 0x9c7   :  { %v2489_v16 = vadd.f32 %v2488_v41, %v2486_v6  ;;  %v2490_v17 = vadd.f32 %v2488_v41, %v2487_v7  ;;  %v2493_v18 = vadd.f32 %v2491_v9, %v2488_v41  ;;  %v2494_v19 = vadd.f32 %v2492_v13, %v2488_v41 }
 0x9c9   :  { %v2519_v20 = vrot.slane %v2490_v17, 1  ;;  %v2577_v34 = vrot.slane %v2490_v17, 2  ;;  %v2627_v14 = vrot.slane %v2494_v19, 1  ;;  %4086 = vmatmul.msk.f32.vlgmr.msra.gmra.mxu2 %vm2222_vm8, %v2489_v16  ;;  %v2518_v39 = vrot.slane %v2489_v16, 1 }
 0x9ca   :  { %v2576_v52 = vrot.slane %v2489_v16, 2  ;;  %v2626_v37 = vrot.slane %v2493_v18, 1  ;;  %v2674_v49 = vrot.slane %v2494_v19, 2  ;;  %v2673_v50 = vrot.slane %v2493_v18, 2 }
 0x9cb   :  { %v2520_v38 = vsel %vm208_vm0, %v2518_v39, %v2519_v20  ;;  %v2792_v39 = vld [vmem:[%s5971_s7] sm:$0xff] }
 0x9cc   :  { %v2578_v24 = vsel %vm296_vm2, %v2576_v52, %v2577_v34  ;;  %v2628_v33 = vsel %vm208_vm0, %v2626_v37, %v2627_v14  ;;  %4085 = vmatmul.msk.f32.vlgmr.msra.gmra.mxu1 %vm2222_vm8, %v2520_v38  ;;  %v2675_v51 = vsel %vm296_vm2, %v2673_v50, %v2674_v49  ;;  %vm2608_vm0 = vcmask 523264   ;;  %2834 = vmatpush.msra.mxu2 %v2792_v39 }
 0x9cd   :  { %4097 = vmatmul.msk.f32.vlgmr.msra.gmra.mxu3 %vm2222_vm8, %v2578_v24  ;;  %4098 = vmatmul.msk.f32.vlgmr.msra.gmra.mxu0 %vm2222_vm8, %v2628_v33 }
 0x9ce   :  { %2811 = vmatpush.msra.mxu1 %v2792_v39 }
 0x9d1   :  { %4100 = vmatmul.msk.f32.vlgmr.msrb.gmra.mxu2 %vm2222_vm8, %v2675_v51 }
 0x9d4   :  { %4099 = vmatmul.msk.f32.vlgmr.msrb.gmra.mxu1 %vm2222_vm8, %v2493_v18 }
 0xa49   :  { %v2540_v30 = vpop.f32.mrf.mxu1 }
 0xa4a   :  { %v2648_v35 = vpop.f32.mrf.mxu0 }
 0xa4c   :  { %v2562_v15 = vpop.f32.mrf.mxu2 }
 0xa4d   :  { %v2563_v3 = vadd.f32 %v2562_v15, %v2540_v30 }
 0xa50   :  { %v2598_v1 = vpop.f32.mrf.mxu3 }
 0xa51   :  { %v2601_v42 = vadd.f32 %v2598_v1, %v2563_v3  ;;  %v2670_v43 = vpop.f32.mrf.mxu1  ;;  %v5658_v1 = vld [vmem:[%s5974_s15 + $0x30] sm:$0xff] }
 0xa52   :  { %v2671_v26 = vadd.f32 %v2670_v43, %v2648_v35  ;;  %v5666_v35 = vld [vmem:[%s5974_s15 + $0x20] sm:$0xff]  ;;  %v5670_v43 = vld [vmem:[%s5974_s15 + $0x18] sm:$0xff] }
 0xa53   :  { %v2606_v45 = vadd.f32 %v4219_v23, %v2601_v42  ;;  %v5662_v42 = vld [vmem:[%s5974_s15 + $0x28] sm:$0xff] }
 0xa54   :  { %v2695_v46 = vpop.f32.mrf.mxu2 }
 0xa55   :  { %v5633_v36 = vmax.f32 %v2606_v45, 0.0  ;;  %v2698_v10 = vadd.f32 %v2695_v46, %v2671_v26  ;;  %v5675_v45 = vld [vmem:[%s5974_s15 + $0x10] sm:$0xff]  ;;  %v5678_v26 = vld [vmem:[%s5974_s15 + $0x8] sm:$0xff]  ;;  %v5682_v46 = vld [vmem:[%s5974_s15] sm:$0xff] }
 0xa57   :  { %v2609_v47 = vsel %vm2608_vm0, %v5633_v36, 0.0  ;;  %v2616_v25 = vmul.f32 %v5633_v36, %v5633_v36  ;;  %v2699_v53 = vadd.f32 %v4219_v23, %v2698_v10  ;;  %v5655_v23 = vld [vmem:[%s5974_s15 + $0x38] sm:$0xff] }
 0xa58   :  { %v2610_v58 = vrot.slane %v2609_v47, 4  ;;  %2945 = vmatpush.msrb.mxu2 %v5655_v23  ;;  %v5687_v10 = vld [vmem:[%s5974_s15 + $0x78] sm:$0xff] }
 0xa59   :  { %v2617_v59 = vsel %vm2608_vm0, %v2616_v25, 0.0  ;;  %v5640_v44 = vmax.f32 %v2699_v53, 0.0  ;;  %2922 = vmatpush.msrb.mxu1 %v5687_v10  ;;  %v5694_v25 = vld [vmem:[%s5974_s15 + $0x68] sm:$0xff] }
 0xa5a   :  { %v2611_v5 = vadd.f32 %v2610_v58, %v2609_v47  ;;  %v2618_v22 = vrot.slane %v2617_v59, 4  ;;  %2946 = vmatpush.msrb.mxu2 %v5658_v1  ;;  %v5690_v47 = vld [vmem:[%s5974_s15 + $0x70] sm:$0xff]  ;;  %v5698_v58 = vld [vmem:[%s5974_s15 + $0x60] sm:$0xff] }
 0xa5b   :  { %v2701_v31 = vsel %vm2608_vm0, %v5640_v44, 0.0  ;;  %v2708_v57 = vmul.f32 %v5640_v44, %v5640_v44  ;;  %2923 = vmatpush.msrb.mxu1 %v5690_v47 }
 0xa5c   :  { %v2612_v62 = vrot.slane %v2611_v5, 2  ;;  %v2619_v12 = vadd.f32 %v2618_v22, %v2617_v59  ;;  %v2702_v28 = vrot.slane %v2701_v31, 4  ;;  %2947 = vmatpush.msrb.mxu2 %v5662_v42  ;;  %v5702_v59 = vld [vmem:[%s5974_s15 + $0x58] sm:$0xff]  ;;  %v5706_v22 = vld [vmem:[%s5974_s15 + $0x50] sm:$0xff] }
 0xa5d   :  { %v2709_v11 = vsel %vm2608_vm0, %v2708_v57, 0.0  ;;  %2924 = vmatpush.msrb.mxu1 %v5694_v25  ;;  %v5710_v57 = vld [vmem:[%s5974_s15 + $0x48] sm:$0xff] }
 0xa5e   :  { %v2613_v21 = vadd.f32 %v2612_v62, %v2611_v5  ;;  %v2620_v60 = vrot.slane %v2619_v12, 2  ;;  %v2703_v27 = vadd.f32 %v2702_v28, %v2701_v31  ;;  %v2710_v29 = vrot.slane %v2709_v11, 4  ;;  %2948 = vmatpush.msrb.mxu2 %v5666_v35 }
 0xa5f   :  { %2925 = vmatpush.msrb.mxu1 %v5698_v58 }
 0xa60   :  { %v2621_v32 = vadd.f32 %v2620_v60, %v2619_v12  ;;  %v2704_v2 = vrot.slane %v2703_v27, 2  ;;  %v2711_v48 = vadd.f32 %v2710_v29, %v2709_v11  ;;  %v2614_v40 = vrot.slane %v2613_v21, 1  ;;  %2949 = vmatpush.msrb.mxu2 %v5670_v43  ;;  %v5715_v11 = vld [vmem:[%s5975_s16] sm:$0x3]  ;;  %v5722_v60 = vld [vmem:[%s5975_s16 + $0x2] sm:$0x3] }
 0xa61   :  { %2926 = vmatpush.msrb.mxu1 %v5702_v59  ;;  %v5734_v29 = vld [vmem:[%s5974_s15 + $0xf8] sm:$0xff] }
 0xa62   :  { %v2705_v41 = vadd.f32 %v2704_v2, %v2703_v27  ;;  %v2712_v6 = vrot.slane %v2711_v48, 2  ;;  %v2622_v7 = vrot.slane %v2621_v32, 1  ;;  %v2615_v16 = vadd.f32 %v2614_v40, %v2613_v21  ;;  %2950 = vmatpush.msrb.mxu2 %v5675_v45  ;;  %v5719_v21 = vld [vmem:[%s5974_s15 + $0xb8] sm:$0xff]  ;;  %v5730_v27 = vld [vmem:[%s5974_s15 + $0x40] sm:$0xff]  ;;  %v5744_v2 = vld [vmem:[%s5974_s15 + $0xf0] sm:$0xff] }
 0xa63   :  { %2927 = vmatpush.msrb.mxu1 %v5706_v22  ;;  %v5752_v40 = vld [vmem:[%s5975_s16 + $0x4] sm:$0x3] }
 0xa64   :  { %v2706_v9 = vrot.slane %v2705_v41, 1  ;;  %v2713_v13 = vadd.f32 %v2712_v6, %v2711_v48  ;;  %v2623_v19 = vadd.f32 %v2622_v7, %v2621_v32  ;;  %2951 = vmatpush.msrb.mxu2 %v5678_v26  ;;  %v5737_v32 = vld [vmem:[%s5974_s15 + $0xa8] sm:$0xff]  ;;  %v5747_v48 = vld [vmem:[%s5974_s15 + $0xa0] sm:$0xff]  ;;  %v5758_v6 = vld [vmem:[%s5974_s15 + $0x98] sm:$0xff] }
 0xa65   :  { %2928 = vmatpush.msrb.mxu1 %v5710_v57  ;;  %v5763_v7 = vld [vmem:[%s5974_s15 + $0xe0] sm:$0xff] }
 0xa66   :  { %v2707_v17 = vadd.f32 %v2706_v9, %v2705_v41  ;;  %v2714_v18 = vrot.slane %v2713_v13, 1  ;;  %2952 = vmatpush.msrb.mxu2 %v5682_v46  ;;  %v5755_v41 = vld [vmem:[%s5974_s15 + $0xe8] sm:$0xff]  ;;  %v5768_v9 = vld [vmem:[%s5974_s15 + $0x90] sm:$0xff] }
 0xa67   :  { %2929 = vmatpush.msrb.mxu1 %v5730_v27 }
 0xa68   :  { %v2715_v20 = vadd.f32 %v2714_v18, %v2713_v13  ;;  %v2716_v34 = vadd.f32 %v2707_v17, %v2615_v16  ;;  %v5773_v13 = vld [vmem:[%s5974_s15 + $0xd8] sm:$0xff]  ;;  %v5776_v16 = vld [vmem:[%s5974_s15 + $0x88] sm:$0xff]  ;;  %v4133_v17 = vld [vmem:[%s5974_s15 + $0xd0] sm:$0xff] }
 0xa6a   :  { %v2717_v14 = vadd.f32 %v2715_v20, %v2623_v19  ;;  %4101 = vmatmul.msk.f32.vlgmr.msrb.gmra.mxu3 %vm2608_vm0, %v2716_v34  ;;  %v5783_v19 = vld [vmem:[%s5974_s15 + $0x80] sm:$0xff] }
 0xa6b   :  { %v4129_v20 = vld [vmem:[%s5975_s16 + $0x6] sm:$0x3] }
 0xa6c   :  { %4102 = vmatmul.msk.f32.vlgmr.msrb.gmra.mxu0 %vm2608_vm0, %v2717_v14  ;;  %v4132_v14 = vld [vmem:[%s5974_s15 + $0xc8] sm:$0xff] }
 0xae9   :  { %v2769_v52 = vpop.f32.mrf.mxu0 }
 0xaea   :  { %v2773_v38 = vmul.f32 0.0078125, %v2769_v52 }
 0xaed   :  { %v2746_v37 = vpop.f32.mrf.mxu3 }
 0xaee   :  { %v2772_v49 = vmul.f32 0.0078125, %v2746_v37  ;;  %v4149_v37 = vld [vmem:[%s5974_s15 + $0x138] sm:$0xff] }
 0xaf0   :  { %v2774_v24 = vmul.f32 %v2772_v49, %v2772_v49 }
 0xaf2   :  { %v2775_v33 = vsub.f32 %v2773_v38, %v2774_v24  ;;  %v4147_v38 = vld [vmem:[%s5974_s15 + $0x128] sm:$0xff] }
 0xaf3   :  { %v5802_v24 = vld [vmem:[%s5975_s16 + $0x8] sm:$0x3] }
 0xaf4   :  { %v2777_v50 = vadd.f32 1e-05, %v2775_v33 }
 0xaf6   :  { %4229 = vrsqrt.f32 %v2777_v50  ;;  %vm2784_vm13 = vweird.f32 %v2777_v50 }
 0xafc   :  { %v4230_v51 = vpop.eup %4229 }
 0xafd   :  { %v2779_v54 = vmul.f32 %v4230_v51, %v2777_v50  ;;  %vm2785_vm2 = vweird.f32 %v4230_v51 }
 0xafe   :  { %vm2786_vm14 = vmor %vm2784_vm13, %vm2785_vm2 }
 0xaff   :  { %v2780_v55 = vmul.f32 %v4230_v51, %v2779_v54  ;;  %v4145_v54 = vld [vmem:[%s5974_s15 + $0x118] sm:$0xff] }
 0xb01   :  { %v2781_v56 = vmul.f32 0.5, %v2780_v55  ;;  %v4144_v55 = vld [vmem:[%s5974_s15 + $0x110] sm:$0xff] }
 0xb03   :  { %v2782_v61 = vsub.f32 1.5, %v2781_v56  ;;  %v4143_v56 = vld [vmem:[%s5974_s15 + $0x108] sm:$0xff] }
 0xb05   :  { %v2783_v63 = vmul.f32 %v4230_v51, %v2782_v61  ;;  %v4142_v61 = vld [vmem:[%s5974_s15 + $0x100] sm:$0xff] }
 0xb07   :  { %v2787_v30 = vsel %vm2786_vm14, %v4230_v51, %v2783_v63  ;;  %v4146_v51 = vld [vmem:[%s5974_s15 + $0x120] sm:$0xff] }
 0xb08   :  { %v2788_v4 = vmul.f32 %v2787_v30, %v2776_v0 }
 0xb0a   :  { %v2790_v15 = vmul.f32 %v2788_v4, %v2772_v49  ;;  %4103 = vmatmul.msk.f32.vlgmr.msra.gmra.mxu1 %vm2438_vm12, %v2788_v4  ;;  %v4148_v49 = vld [vmem:[%s5974_s15 + $0x130] sm:$0xff] }
 0xb0b   :  { %3060 = vmatpush.msra.mxu1 %v5734_v29 }
 0xb0c   :  { %v2791_v3 = vsub.f32 %v2789_v8, %v2790_v15 }
 0xb0d   :  { %3061 = vmatpush.msra.mxu1 %v5744_v2 }
 0xb0e   :  { %4104 = vmatmul.msk.f32.vlgmr.msra.gmra.mxu2 %vm2438_vm12, %v2791_v3 }
 0xb0f   :  { %3062 = vmatpush.msra.mxu1 %v5755_v41 }
 0xb11   :  { %3063 = vmatpush.msra.mxu1 %v5763_v7 }
 0xb13   :  { %3064 = vmatpush.msra.mxu1 %v5773_v13 }
 0xb15   :  { %3065 = vmatpush.msra.mxu1 %v4133_v17 }
 0xb17   :  { %3066 = vmatpush.msra.mxu1 %v4132_v14 }
 0xb87   :  { %v2813_v53 = vpop.f32.mrf.mxu1 }
 0xb88   :  { %v2839_v5 = vperm.slane %v2813_v53, 0 }
 0xb8a   :  { %v2840_v62 = vmul.f32 %v2839_v5, %v5633_v36  ;;  %v5727_v36 = vld [vmem:[%s5974_s15 + $0xb0] sm:$0xff]  ;;  %v2843_v18 = vmul.f32 %v2839_v5, %v5640_v44  ;;  %v4131_v44 = vld [vmem:[%s5974_s15 + $0xc0] sm:$0xff] }
 0xb8b   :  { %3067 = vmatpush.msra.mxu1 %v4131_v44  ;;  %v3390_v5 = vld [vmem:[%s5977_s22] sm:$0xff] }
 0xb91   :  { %v2836_v31 = vpop.f32.mrf.mxu2 }
 0xb92   :  { %v2841_v12 = vperm.slane %v2836_v31, 0 }
 0xb94   :  { %v2842_v28 = vadd.f32 %v2841_v12, %v2840_v62  ;;  %v2844_v34 = vadd.f32 %v2843_v18, %v2841_v12 }
 0xb96   :  { %2864 = vmatpush.msra.mxu3 %v2842_v28  ;;  %2897 = vmatpush.msra.mxu0 %v2842_v28 }
 0xb97   :  { %3093 = vmatpush.msra.mxu2 %v2842_v28  ;;  %4105 = vmatmul.msk.f32.vlgmr.msra.gmra.mxu3 %vm2438_vm12, %v5715_v11 }
 0xb98   :  { %2977 = vmatpush.msrb.mxu3 %v2842_v28  ;;  %3002 = vmatpush.msrb.mxu0 %v5719_v21 }
 0xb99   :  { %4107 = vmatmul.msk.f32.vlgmr.msra.gmra.mxu0 %vm2438_vm12, %v5722_v60 }
 0xb9a   :  { %3035 = vmatpush.msra.mxu3 %v2842_v28  ;;  %3003 = vmatpush.msrb.mxu0 %v5727_v36 }
 0xb9c   :  { %3004 = vmatpush.msrb.mxu0 %v5737_v32 }
 0xb9e   :  { %3005 = vmatpush.msrb.mxu0 %v5747_v48 }
 0xb9f   :  { %4119 = vmatmul.msk.f32.vlgmr.msrb.gmra.mxu3 %vm2438_vm12, %v5752_v40 }
 0xba0   :  { %3006 = vmatpush.msrb.mxu0 %v5758_v6  ;;  %3118 = vmatpush.msrb.mxu3 %v4149_v37 }
 0xba2   :  { %3007 = vmatpush.msrb.mxu0 %v5768_v9  ;;  %3119 = vmatpush.msrb.mxu3 %v4148_v49 }
 0xba4   :  { %3008 = vmatpush.msrb.mxu0 %v5776_v16  ;;  %3120 = vmatpush.msrb.mxu3 %v4147_v38 }
 0xba6   :  { %3009 = vmatpush.msrb.mxu0 %v5783_v19  ;;  %3121 = vmatpush.msrb.mxu3 %v4146_v51 }
 0xba7   :  { %4130 = vmatmul.msk.f32.vlgmr.msra.gmra.mxu3 %vm2438_vm12, %v4129_v20 }
 0xba8   :  { %3168 = vmatpush.msra.mxu0 %v2844_v34  ;;  %3122 = vmatpush.msrb.mxu3 %v4145_v54 }
 0xbaa   :  { %3123 = vmatpush.msrb.mxu3 %v4144_v55 }
 0xbac   :  { %3124 = vmatpush.msrb.mxu3 %v4143_v56 }
 0xbae   :  { %3125 = vmatpush.msrb.mxu3 %v4142_v61 }
 0xbb0   :  { %3270 = vmatpush.msra.mxu3 %v5719_v21 }
 0xbb2   :  { %3271 = vmatpush.msra.mxu3 %v5727_v36 }
 0xbb4   :  { %3272 = vmatpush.msra.mxu3 %v5737_v32 }
 0xbb6   :  { %3273 = vmatpush.msra.mxu3 %v5747_v48 }
 0xbb8   :  { %3274 = vmatpush.msra.mxu3 %v5758_v6 }
 0xbba   :  { %3275 = vmatpush.msra.mxu3 %v5768_v9 }
 0xbbc   :  { %3276 = vmatpush.msra.mxu3 %v5776_v16 }
 0xbbe   :  { %3277 = vmatpush.msra.mxu3 %v5783_v19 }
 0xc16   :  { %v2899_v39 = vpop.f32.mrf.mxu0 }
 0xc17   :  { %4116 = vmatmul.msk.f32.vlgmr.msrb.gmra.mxu1 %vm2608_vm0, %v2899_v39 }
 0xc18   :  { %3227 = vmatpush.msrb.mxu1 %v5655_v23 }
 0xc1a   :  { %v2866_v52 = vpop.f32.mrf.mxu3  ;;  %3228 = vmatpush.msrb.mxu1 %v5658_v1 }
 0xc1b   :  { %4117 = vmatmul.msk.f32.vlgmr.msrb.gmra.mxu2 %vm2608_vm0, %v2866_v52 }
 0xc1c   :  { %3188 = vmatpush.msrb.mxu2 %v2844_v34  ;;  %3229 = vmatpush.msrb.mxu1 %v5662_v42 }
 0xc1e   :  { %3230 = vmatpush.msrb.mxu1 %v5666_v35 }
 0xc20   :  { %3231 = vmatpush.msrb.mxu1 %v5670_v43 }
 0xc22   :  { %v2979_v33 = vpop.f32.mrf.mxu3  ;;  %3232 = vmatpush.msrb.mxu1 %v5675_v45 }
 0xc23   :  { %4128 = vmatmul.msk.f32.vlgmr.msrb.gmra.mxu0 %vm2608_vm0, %v2979_v33  ;;  %4141 = vmatmul.msk.f32.vlgmr.msra.gmra.mxu2 %vm2438_vm12, %v5802_v24 }
 0xc24   :  { %3254 = vmatpush.msra.mxu2 %v2844_v34  ;;  %3233 = vmatpush.msrb.mxu1 %v5678_v26 }
 0xc25   :  { %3204 = vmatpush.msrb.mxu0 %v5687_v10 }
 0xc26   :  { %3234 = vmatpush.msrb.mxu1 %v5682_v46 }
 0xc27   :  { %3205 = vmatpush.msrb.mxu0 %v5690_v47  ;;  %v4220_v47 = vld [vmem:[%s5976_s18] ss:$0 sm:$0xff] }
 0xc29   :  { %3206 = vmatpush.msrb.mxu0 %v5694_v25 }
 0xc2a   :  { %v3037_v50 = vpop.f32.mrf.mxu3 }
 0xc2b   :  { %4139 = vmatmul.msk.f32.vlgmr.msra.gmra.mxu1 %vm2608_vm0, %v3037_v50  ;;  %4151 = vmatmul.msk.f32.vlgmr.msra.gmra.mxu0 %vm2438_vm12, %v5715_v11 }
 0xc2c   :  { %4152 = vmatmul.msk.f32.vlgmr.msrb.gmra.mxu2 %vm2438_vm12, %v5722_v60  ;;  %3342 = vmatpush.msra.mxu1 %v2844_v34 }
 0xc2d   :  { %3298 = vmatpush.msrb.mxu2 %v2844_v34  ;;  %3207 = vmatpush.msrb.mxu0 %v5698_v58 }
 0xc2f   :  { %3208 = vmatpush.msrb.mxu0 %v5702_v59  ;;  %v3391_v59 = vld [vmem:[%s5977_s22 + $0x8] sm:$0xff] }
 0xc31   :  { %3209 = vmatpush.msrb.mxu0 %v5706_v22 }
 0xc33   :  { %3210 = vmatpush.msrb.mxu0 %v5710_v57 }
 0xc34   :  { %4155 = vmatmul.msk.f32.vlgmr.msra.gmra.mxu2 %vm2438_vm12, %v5752_v40 }
 0xc35   :  { %3211 = vmatpush.msrb.mxu0 %v5730_v27  ;;  %3358 = vmatpush.msra.mxu2 %v4149_v37 }
 0xc37   :  { %3314 = vmatpush.msra.mxu0 %v5734_v29  ;;  %3359 = vmatpush.msra.mxu2 %v4148_v49 }
 0xc39   :  { %3315 = vmatpush.msra.mxu0 %v5744_v2  ;;  %3360 = vmatpush.msra.mxu2 %v4147_v38 }
 0xc3b   :  { %3316 = vmatpush.msra.mxu0 %v5755_v41  ;;  %3361 = vmatpush.msra.mxu2 %v4146_v51 }
 0xc3c   :  { %4157 = vmatmul.msk.f32.vlgmr.msrb.gmra.mxu2 %vm2438_vm12, %v4129_v20 }
 0xc3d   :  { %3317 = vmatpush.msra.mxu0 %v5763_v7  ;;  %3362 = vmatpush.msra.mxu2 %v4145_v54 }
 0xc3f   :  { %3318 = vmatpush.msra.mxu0 %v5773_v13  ;;  %3363 = vmatpush.msra.mxu2 %v4144_v55 }
 0xc41   :  { %3319 = vmatpush.msra.mxu0 %v4133_v17  ;;  %3364 = vmatpush.msra.mxu2 %v4143_v56 }
 0xc43   :  { %3320 = vmatpush.msra.mxu0 %v4132_v14  ;;  %3365 = vmatpush.msra.mxu2 %v4142_v61  ;;  %v3459_v61 = vld [vmem:[%s5978_s23] sm:$0xff] }
 0xc45   :  { %3321 = vmatpush.msra.mxu0 %v4131_v44 }
 0xc94   :  { %v2931_v0 = vpop.f32.mrf.mxu1 }
 0xc9e   :  { %v2954_v63 = vpop.f32.mrf.mxu2 }
 0xc9f   :  { %v2955_v30 = vadd.f32 %v2954_v63, %v2931_v0 }
 0xca0   :  { %v3011_v4 = vpop.f32.mrf.mxu0 }
 0xca1   :  { %v3014_v8 = vadd.f32 %v3011_v4, %v2955_v30 }
 0xca6   :  { %v3095_v15 = vpop.f32.mrf.mxu2 }
 0xca7   :  { %4150 = vmatmul.msk.f32.vlgmr.msrb.gmra.mxu3 %vm2608_vm0, %v3095_v15 }
 0xca8   :  { %v3170_v3 = vpop.f32.mrf.mxu0  ;;  %v3069_v35 = vpop.f32.mrf.mxu1  ;;  %3410 = vmatpush.msrb.mxu3 %v3391_v59 }
 0xca9   :  { %4154 = vmatmul.msk.f32.vlgmr.msrb.gmra.mxu1 %vm2608_vm0, %v3170_v3  ;;  %v3072_v46 = vadd.f32 %v3069_v35, %v3014_v8 }
 0xcaa   :  { %3433 = vmatpush.msrb.mxu1 %v3391_v59  ;;  %3411 = vmatpush.msrb.mxu3 %v3390_v5  ;;  %v3514_v59 = vld [vmem:[%s5981_s1 + $0x8] sm:$0xff] }
 0xcac   :  { %3434 = vmatpush.msrb.mxu1 %v3390_v5  ;;  %v3513_v5 = vld [vmem:[%s5981_s1] sm:$0xff] }
 0xcaf   :  { %v3190_v23 = vpop.f32.mrf.mxu2 }
 0xcb0   :  { %4153 = vmatmul.msk.f32.vlgmr.msrb.gmra.mxu0 %vm2608_vm0, %v3190_v23 }
 0xcb1   :  { %4159 = vmatmul.msk.f32.vlgmr.msra.gmra.mxu1 %vm2438_vm12, %v5802_v24  ;;  %3501 = vmatpush.msrb.mxu0 %v3459_v61 }
 0xcb2   :  { %3532 = vmatpush.msra.mxu1 %v3514_v59 }
 0xcb4   :  { %3533 = vmatpush.msra.mxu1 %v3513_v5 }
 0xcb7   :  { %v3256_v1 = vpop.f32.mrf.mxu2 }
 0xcb8   :  { %4156 = vmatmul.msk.f32.vlgmr.msra.gmra.mxu3 %vm2608_vm0, %v3256_v1 }
 0xcb9   :  { %3478 = vmatpush.msra.mxu3 %v3459_v61  ;;  %v3642_v61 = vld [vmem:[%s4538_s20 + $0x8] sm:$0xff] }
 0xcbf   :  { %v3300_v42 = vpop.f32.mrf.mxu2 }
 0xcc0   :  { %4158 = vmatmul.msk.f32.vlgmr.msra.gmra.mxu0 %vm2608_vm0, %v3300_v42 }
 0xd26   :  { %v3236_v43 = vpop.f32.mrf.mxu1 }
 0xd2a   :  { %v3127_v26 = vpop.f32.mrf.mxu3 }
 0xd2b   :  { %v3130_v10 = vadd.f32 %v3127_v26, %v3072_v46 }
 0xd2d   :  { %v3135_v25 = vadd.f32 %v4220_v47, %v3130_v10  ;;  %v3213_v53 = vpop.f32.mrf.mxu0 }
 0xd2e   :  { %v3344_v45 = vpop.f32.mrf.mxu1  ;;  %v3237_v57 = vadd.f32 %v3236_v43, %v3213_v53 }
 0xd2f   :  { %4160 = vmatmul.msk.f32.vlgmr.msra.gmra.mxu2 %vm2608_vm0, %v3344_v45  ;;  %v5854_v58 = vmax.f32 %v3135_v25, 0.0  ;;  %v3443_v45 = vld [vmem:[%s5979_s26] sm:$0x1] }
 0xd31   :  { %v3145_v31 = vmul.f32 %v5854_v58, %v5854_v58  ;;  %v3138_v62 = vsel %vm3137_vm15, %v5854_v58, 0.0 }
 0xd32   :  { %v3139_v21 = vrot.slane %v3138_v62, 4 }
 0xd33   :  { %v3146_v11 = vsel %vm3137_vm15, %v3145_v31, 0.0  ;;  %v3539_v31 = vld [vmem:[%s5981_s1 + $0x10] sm:$0xff] }
 0xd34   :  { %v3147_v36 = vrot.slane %v3146_v11, 4  ;;  %v3140_v32 = vadd.f32 %v3139_v21, %v3138_v62 }
 0xd36   :  { %v3148_v48 = vadd.f32 %v3147_v36, %v3146_v11  ;;  %v3141_v41 = vrot.slane %v3140_v32, 2 }
 0xd38   :  { %v3149_v9 = vrot.slane %v3148_v48, 2  ;;  %v3142_v17 = vadd.f32 %v3141_v41, %v3140_v32  ;;  %v3656_v32 = vld [vmem:[%s4538_s20 + $0x78] sm:$0xff]  ;;  %v3651_v41 = vld [vmem:[%s4538_s20 + $0x50] sm:$0xff] }
 0xd3a   :  { %v3150_v20 = vadd.f32 %v3149_v9, %v3148_v48  ;;  %v3143_v44 = vrot.slane %v3142_v17, 1  ;;  %v3653_v48 = vld [vmem:[%s4538_s20 + $0x60] sm:$0xff] }
 0xd3b   :  { %v3279_v22 = vpop.f32.mrf.mxu3  ;;  %v3512_v9 = vld [vmem:[%s5982_s2] sm:$0x1] }
 0xd3c   :  { %v3282_v12 = vadd.f32 %v3279_v22, %v3237_v57  ;;  %v3151_v37 = vrot.slane %v3150_v20, 1  ;;  %v3144_v24 = vadd.f32 %v3143_v44, %v3142_v17  ;;  %v3540_v22 = vld [vmem:[%s5981_s1 + $0x18] sm:$0xff] }
 0xd3d   :  { %v3323_v28 = vpop.f32.mrf.mxu0  ;;  %3558 = vmatpush.msrb.mxu2 %v3540_v22  ;;  %3608 = vmatpush.msra.mxu0 %v3540_v22  ;;  %v3657_v22 = vld [vmem:[%s4543_s27] sm:$0x1] }
 0xd3e   :  { %v3326_v60 = vadd.f32 %v3323_v28, %v3282_v12  ;;  %v3152_v51 = vadd.f32 %v3151_v37, %v3150_v20  ;;  %v3647_v20 = vld [vmem:[%s4538_s20 + $0x30] sm:$0xff] }
 0xd3f   :  { %3559 = vmatpush.msrb.mxu2 %v3539_v31  ;;  %3609 = vmatpush.msra.mxu0 %v3539_v31 }
 0xd41   :  { %3723 = vmatpush.msra.mxu2 %v3656_v32 }
 0xdb2   :  { %v3367_v27 = vpop.f32.mrf.mxu2 }
 0xdb3   :  { %v3370_v29 = vadd.f32 %v3367_v27, %v3326_v60 }
 0xdb5   :  { %v3371_v2 = vadd.f32 %v4220_v47, %v3370_v29  ;;  %v3456_v47 = vld [vmem:[%s5980_s28] sm:$0x1] }
 0xdb7   :  { %v5863_v40 = vmax.f32 %v3371_v2, 0.0  ;;  %v3654_v2 = vld [vmem:[%s4538_s20 + $0x68] sm:$0xff] }
 0xdb9   :  { %v3373_v6 = vsel %vm3137_vm15, %v5863_v40, 0.0  ;;  %v3380_v7 = vmul.f32 %v5863_v40, %v5863_v40 }
 0xdba   :  { %v3374_v13 = vrot.slane %v3373_v6, 4 }
 0xdbb   :  { %v3381_v16 = vsel %vm3137_vm15, %v3380_v7, 0.0  ;;  %v3649_v7 = vld [vmem:[%s4538_s20 + $0x40] sm:$0xff] }
 0xdbc   :  { %v3375_v18 = vadd.f32 %v3374_v13, %v3373_v6  ;;  %v3382_v19 = vrot.slane %v3381_v16, 4  ;;  %v3650_v6 = vld [vmem:[%s4538_s20 + $0x48] sm:$0xff] }
 0xdbe   :  { %v3376_v34 = vrot.slane %v3375_v18, 2  ;;  %v3383_v14 = vadd.f32 %v3382_v19, %v3381_v16  ;;  %v3648_v16 = vld [vmem:[%s4538_s20 + $0x38] sm:$0xff] }
 0xdc0   :  { %v3377_v39 = vadd.f32 %v3376_v34, %v3375_v18  ;;  %v3384_v52 = vrot.slane %v3383_v14, 2 }
 0xdc2   :  { %v3378_v49 = vrot.slane %v3377_v39, 1  ;;  %v3385_v38 = vadd.f32 %v3384_v52, %v3383_v14  ;;  %v3646_v52 = vld [vmem:[%s4538_s20 + $0x28] sm:$0xff] }
 0xdc4   :  { %v3379_v33 = vadd.f32 %v3378_v49, %v3377_v39  ;;  %v3386_v50 = vrot.slane %v3385_v38, 1 }
 0xdc6   :  { %v3387_v54 = vadd.f32 %v3386_v50, %v3385_v38  ;;  %v3388_v55 = vadd.f32 %v3379_v33, %v3144_v24  ;;  %v3645_v38 = vld [vmem:[%s4538_s20 + $0x20] sm:$0xff] }
 0xdc8   :  { %v3389_v56 = vadd.f32 %v3387_v54, %v3152_v51  ;;  %4161 = vmatmul.msk.f32.vlgmr.msrb.gmra.mxu3 %vm3392_vm1, %v3388_v55  ;;  %v3644_v51 = vld [vmem:[%s4538_s20 + $0x18] sm:$0xff] }
 0xdc9   :  { %3584 = vmatpush.msrb.mxu3 %v3514_v59 }
 0xdca   :  { %4162 = vmatmul.msk.f32.vlgmr.msrb.gmra.mxu1 %vm3392_vm1, %v3389_v56  ;;  %v3643_v56 = vld [vmem:[%s4538_s20 + $0x10] sm:$0xff] }
 0xdcb   :  { %3585 = vmatpush.msrb.mxu3 %v3513_v5  ;;  %3658 = vmatpush.msrb.mxu1 %v3656_v32 }
 0xe47   :  { %v3436_v0 = vpop.f32.mrf.mxu1 }
 0xe48   :  { %v3440_v4 = vmul.f32 0.125, %v3436_v0 }
 0xe4b   :  { %v3413_v63 = vpop.f32.mrf.mxu3 }
 0xe4c   :  { %v3439_v30 = vmul.f32 0.125, %v3413_v63 }
 0xe4e   :  { %v3441_v8 = vmul.f32 %v3439_v30, %v3439_v30 }
 0xe50   :  { %v3442_v15 = vsub.f32 %v3440_v4, %v3441_v8 }
 0xe52   :  { %v3444_v3 = vadd.f32 1e-05, %v3442_v15 }
 0xe54   :  { %4231 = vrsqrt.f32 %v3444_v3  ;;  %vm3451_vm4 = vweird.f32 %v3444_v3 }
 0xe5a   :  { %v4232_v23 = vpop.eup %4231 }
 0xe5b   :  { %v3446_v1 = vmul.f32 %v4232_v23, %v3444_v3  ;;  %vm3452_vm3 = vweird.f32 %v4232_v23 }
 0xe5c   :  { %vm3453_vm5 = vmor %vm3451_vm4, %vm3452_vm3 }
 0xe5d   :  { %v3447_v42 = vmul.f32 %v4232_v23, %v3446_v1 }
 0xe5f   :  { %v3448_v35 = vmul.f32 0.5, %v3447_v42 }
 0xe61   :  { %v3449_v43 = vsub.f32 1.5, %v3448_v35  ;;  %v3623_v35 = vld [vmem:[%s5983_s0] sm:$0x1] }
 0xe63   :  { %v3450_v26 = vmul.f32 %v4232_v23, %v3449_v43 }
 0xe65   :  { %v3454_v46 = vsel %vm3453_vm5, %v4232_v23, %v3450_v26 }
 0xe66   :  { %v3455_v10 = vmul.f32 %v3454_v46, %v3443_v45  ;;  %v3636_v46 = vld [vmem:[%s4533_s12] sm:$0x1]  ;;  %s4314_s12 = smov [#allocation2]  }
 0xe68   :  { %v3457_v25 = vmul.f32 %v3455_v10, %v3439_v30  ;;  %4163 = vmatmul.msk.f32.vlgmr.msra.gmra.mxu3 %vm2438_vm12, %v3455_v10  ;;  %v3641_v30 = vld [vmem:[%s4538_s20] sm:$0xff] }
 0xe6a   :  { %v3458_v53 = vsub.f32 %v3456_v47, %v3457_v25 }
 0xe6c   :  { %4164 = vmatmul.msk.f32.vlgmr.msrb.gmra.mxu0 %vm2438_vm12, %v3458_v53 }
 0xee9   :  { %v3503_v57 = vpop.f32.mrf.mxu0 }
 0xeea   :  { %v3508_v28 = vperm.slane %v3503_v57, 0 }
 0xeeb   :  { %v3480_v62 = vpop.f32.mrf.mxu3 }
 0xeec   :  { %v3506_v12 = vperm.slane %v3480_v62, 0 }
 0xeee   :  { %v3507_v11 = vmul.f32 %v3506_v12, %v5854_v58  ;;  %v3510_v21 = vmul.f32 %v3506_v12, %v5863_v40  ;;  %v3655_v58 = vld [vmem:[%s4538_s20 + $0x70] sm:$0xff]  ;;  %v3652_v40 = vld [vmem:[%s4538_s20 + $0x58] sm:$0xff]  ;;  %v3722_v12 = vld [vmem:[%s4543_s27] sm:$0x1]  ;;  %s3773_s20 = sshll.u32 %s4314_s12, 4  ;;  %s3775_s27 = sshll.u32 %s4548_s4, 4  ;;  %s3774_s20 = int_to_ptr.vmem [resolvable:$true] %s3773_s20  ;;  %s3776_s27 = int_to_ptr.hbm [resolvable:$true] %s3775_s27 }
 0xeef   :  { %3659 = vmatpush.msrb.mxu1 %v3655_v58  ;;  %3724 = vmatpush.msra.mxu2 %v3655_v58  ;;  %s4255_s5 = sshra.s32 %s3776_s27, 4  ;;  %s4256_s5 = int_to_ptr.hbm [resolvable:$true] %s4255_s5 }
 0xef0   :  { %v3509_v60 = vadd.f32 %v3508_v28, %v3507_v11  ;;  %v3511_v36 = vadd.f32 %v3510_v21, %v3508_v28  ;;  %s4257_s9 = scalar_lea.hbm %s4256_s5, 2  ;;  %p4260_p1 = scmp.lt.s32.totalorder %s4256_s5, %s4548_s4 }
 0xef1   :  { %3660 = vmatpush.msrb.mxu1 %v3654_v2  ;;  %3725 = vmatpush.msra.mxu2 %v3654_v2  ;;  %p4258_p0 = scmp.ne.s32.totalorder %s4256_s5, %s4257_s9  ;;  %p4261_p2 = scmp.lt.s32.totalorder %s4259_s13, %s4257_s9 }
 0xef2   :  { %v3541_v27 = vrot.slane %v3509_v60, 1  ;;  %v3591_v29 = vrot.slane %v3511_v36, 1  ;;  %4165 = vmatmul.msk.f32.vlgmr.msra.gmra.mxu1 %vm3392_vm1, %v3509_v60  ;;  %4167 = vmatmul.msk.f32.vlgmr.msrb.gmra.mxu3 %vm3392_vm1, %v3511_v36 }
 0xef3   :  { %3661 = vmatpush.msrb.mxu1 %v3653_v48  ;;  %3726 = vmatpush.msra.mxu2 %v3653_v48  ;;  %p4262_p3 = por %p4261_p2, %p4260_p1 }
 0xef4   :  { %4166 = vmatmul.msk.f32.vlgmr.msrb.gmra.mxu2 %vm3392_vm1, %v3541_v27  ;;  %4168 = vmatmul.msk.f32.vlgmr.msra.gmra.mxu0 %vm3392_vm1, %v3591_v29 }
 0xef5   :  { %3662 = vmatpush.msrb.mxu1 %v3652_v40  ;;  %3727 = vmatpush.msra.mxu2 %v3652_v40  ;;  %p4263_p4 = pnand %p4262_p3, %p4258_p0 }
 0xef7   :  { %3663 = vmatpush.msrb.mxu1 %v3651_v41  ;;  %3728 = vmatpush.msra.mxu2 %v3651_v41 }
 0xef9   :  { %3664 = vmatpush.msrb.mxu1 %v3650_v6  ;;  %3729 = vmatpush.msra.mxu2 %v3650_v6 }
 0xefb   :  { %3665 = vmatpush.msrb.mxu1 %v3649_v7  ;;  %3730 = vmatpush.msra.mxu2 %v3649_v7 }
 0xefd   :  { %3666 = vmatpush.msrb.mxu1 %v3648_v16  ;;  %3731 = vmatpush.msra.mxu2 %v3648_v16 }
 0xeff   :  { %3667 = vmatpush.msrb.mxu1 %v3647_v20  ;;  %3732 = vmatpush.msra.mxu2 %v3647_v20 }
 0xf01   :  { %3668 = vmatpush.msrb.mxu1 %v3646_v52  ;;  %3733 = vmatpush.msra.mxu2 %v3646_v52 }
 0xf03   :  { %3669 = vmatpush.msrb.mxu1 %v3645_v38  ;;  %3734 = vmatpush.msra.mxu2 %v3645_v38 }
 0xf05   :  { %3670 = vmatpush.msrb.mxu1 %v3644_v51  ;;  %3735 = vmatpush.msra.mxu2 %v3644_v51 }
 0xf07   :  { %3671 = vmatpush.msrb.mxu1 %v3643_v56  ;;  %3736 = vmatpush.msra.mxu2 %v3643_v56 }
 0xf09   :  { %3672 = vmatpush.msrb.mxu1 %v3642_v61  ;;  %3737 = vmatpush.msra.mxu2 %v3642_v61 }
 0xf0b   :  { %3673 = vmatpush.msrb.mxu1 %v3641_v30  ;;  %3738 = vmatpush.msra.mxu2 %v3641_v30 }
 0xf6f   :  { %v3535_v13 = vpop.f32.mrf.mxu1 }
 0xf70   :  { %v3538_v18 = vadd.f32 %v3535_v13, %v3512_v9 }
 0xf71   :  { %v3611_v34 = vpop.f32.mrf.mxu0 }
 0xf75   :  { %v3587_v17 = vpop.f32.mrf.mxu3 }
 0xf76   :  { %v3590_v19 = vadd.f32 %v3587_v17, %v3512_v9 }
 0xf77   :  { %v3561_v14 = vpop.f32.mrf.mxu2 }
 0xf78   :  { %v3614_v44 = vadd.f32 %v3611_v34, %v3590_v19  ;;  %v3564_v39 = vadd.f32 %v3561_v14, %v3538_v18 }
 0xf7a   :  { %v3615_v37 = vmax.f32 %v3614_v44, 0.0  ;;  %v3565_v49 = vmax.f32 %v3564_v39, 0.0 }
 0xf7c   :  { %v3617_v24 = vmul.f32 %v3615_v37, %v3615_v37  ;;  %v3566_v33 = vmul.f32 %v3565_v49, %v3565_v49  ;;  %v3616_v50 = vadd.f32 %v3615_v37, %v3565_v49 }
 0xf7e   :  { %v3618_v54 = vadd.f32 %v3617_v24, %v3566_v33  ;;  %v3619_v55 = vmul.f32 0.5, %v3616_v50 }
 0xf80   :  { %v3620_v0 = vmul.f32 0.5, %v3618_v54  ;;  %v3621_v63 = vmul.f32 %v3619_v55, %v3619_v55 }
 0xf82   :  { %v3622_v4 = vsub.f32 %v3620_v0, %v3621_v63 }
 0xf84   :  { %v3624_v8 = vadd.f32 1e-05, %v3622_v4 }
 0xf86   :  { %4233 = vrsqrt.f32 %v3624_v8  ;;  %vm3631_vm7 = vweird.f32 %v3624_v8 }
 0xf8c   :  { %v4234_v15 = vpop.eup %4233 }
 0xf8d   :  { %v3626_v3 = vmul.f32 %v4234_v15, %v3624_v8  ;;  %vm3632_vm6 = vweird.f32 %v4234_v15 }
 0xf8e   :  { %vm3633_vm8 = vmor %vm3631_vm7, %vm3632_vm6 }
 0xf8f   :  { %v3627_v23 = vmul.f32 %v4234_v15, %v3626_v3 }
 0xf91   :  { %v3628_v1 = vmul.f32 0.5, %v3627_v23 }
 0xf93   :  { %v3629_v42 = vsub.f32 1.5, %v3628_v1 }
 0xf95   :  { %v3630_v43 = vmul.f32 %v4234_v15, %v3629_v42 }
 0xf97   :  { %v3634_v45 = vsel %vm3633_vm8, %v4234_v15, %v3630_v43 }
 0xf98   :  { %v3635_v26 = vmul.f32 %v3634_v45, %v3623_v35 }
 0xf9a   :  { %v3637_v10 = vmul.f32 %v3635_v26, %v3619_v55  ;;  %v3639_v25 = vmul.f32 %v3635_v26, %v3565_v49  ;;  %v3704_v53 = vmul.f32 %v3635_v26, %v3615_v37 }
 0xf9c   :  { %v3638_v47 = vsub.f32 %v3636_v46, %v3637_v10 }
 0xf9e   :  { %v3640_v59 = vadd.f32 %v3639_v25, %v3638_v47  ;;  %v3705_v5 = vadd.f32 %v3704_v53, %v3638_v47 }
 0xfa0   :  { %3674 = vmatmul.f32.vlgmr.msrb.gmra.mxu1 %v3640_v59  ;;  %3739 = vmatmul.f32.vlgmr.msra.gmra.mxu2 %v3705_v5 }
0x101d   :  { %v3675_v31 = vpop.f32.mrf.mxu1 }
0x101e   :  { %v3676_v57 = vadd.f32 %v3675_v31, %v3657_v22 }
0x1020   :  { %v3679_v62 = vsel %vm3678_vm9, %v3676_v57, -inf }
0x1021   :  { %3680 = vmax.xlane.f32.xlu0 %v3679_v62 }
0x1023   :  { %v3740_v28 = vpop.f32.mrf.mxu2 }
0x1024   :  { %v3741_v11 = vadd.f32 %v3740_v28, %v3722_v12 }
0x1026   :  { %v3743_v21 = vsel %vm3678_vm9, %v3741_v11, -inf }
0x1029   :  { %3744 = vmax.xlane.f32.xlu0 %v3743_v21 }
0x1094   :  { %v3681_v60 = vpop.xlane.xlu0 %3680 }
0x1095   :  { %v3682_v36 = vsub.f32 %v3676_v57, %v3681_v60 }
0x1097   :  { %v3683_v27 = vmul.f32 1.442695, %v3682_v36 }
0x1099   :  { %4235 = vpow2.f32 %v3683_v27 }
0x109c   :  { %v3745_v29 = vpop.xlane.xlu0 %3744 }
0x109d   :  { %v3746_v32 = vsub.f32 %v3741_v11, %v3745_v29 }
0x109f   :  { %v4236_v58 = vpop.eup %4235  ;;  %v3747_v2 = vmul.f32 1.442695, %v3746_v32 }
0x10a0   :  { %v3685_v48 = vsel %vm3678_vm9, %v4236_v58, 0.0 }
0x10a1   :  { %4237 = vpow2.f32 %v3747_v2  ;;  %3686 = vadd.xlane.f32.xlu1 %v3685_v48 }
0x10a7   :  { %v4238_v40 = vpop.eup %4237 }
0x10a8   :  { %v3749_v41 = vsel %vm3678_vm9, %v4238_v40, 0.0 }
0x10a9   :  { %3750 = vadd.xlane.f32.xlu1 %v3749_v41 }
0x1114   :  { %v3687_v6 = vpop.xlane.xlu1 %3686 }
0x1115   :  { %4239 = vrcp.f32 %v3687_v6  ;;  %v3699_v17 = vand.u32 2147483648, %v3687_v6  ;;  %v3697_v19 = vand.u32 2147483647, %v3687_v6  ;;  %vm3693_vm11 = vweird.f32 %v3687_v6 }
0x1117   :  { %v3700_v14 = vor.u32 1.1754944e-38, %v3699_v17  ;;  %vm3698_vm0 = vcmp.eq.f32.partialorder %v3697_v19, 8.507059e+37 }
0x111b   :  { %v4240_v7 = vpop.eup %4239 }
0x111c   :  { %v3689_v9 = vmul.f32 %v4240_v7, %v3687_v6  ;;  %v3751_v13 = vpop.xlane.xlu1 %3750  ;;  %vm3694_vm10 = vweird.f32 %v4240_v7 }
0x111d   :  { %4241 = vrcp.f32 %v3751_v13  ;;  %vm3695_vm12 = vmor %vm3693_vm11, %vm3694_vm10  ;;  %v3763_v38 = vand.u32 2147483648, %v3751_v13  ;;  %v3761_v33 = vand.u32 2147483647, %v3751_v13  ;;  %vm3757_vm13 = vweird.f32 %v3751_v13 }
0x111e   :  { %v3690_v16 = vsub.f32 1.0, %v3689_v9 }
0x111f   :  { %v3764_v51 = vor.u32 1.1754944e-38, %v3763_v38  ;;  %vm3762_vm15 = vcmp.eq.f32.partialorder %v3761_v33, 8.507059e+37 }
0x1120   :  { %v3691_v18 = vmul.f32 %v4240_v7, %v3690_v16 }
0x1122   :  { %v3692_v20 = vadd.f32 %v4240_v7, %v3691_v18 }
0x1123   :  { %v4242_v34 = vpop.eup %4241 }
0x1124   :  { %v3753_v44 = vmul.f32 %v4242_v34, %v3751_v13  ;;  %v3696_v39 = vsel %vm3695_vm12, %v4240_v7, %v3692_v20  ;;  %vm3758_vm2 = vweird.f32 %v4242_v34 }
0x1125   :  { %v3701_v52 = vsel %vm3698_vm0, %v3700_v14, %v3696_v39  ;;  %vm3759_vm14 = vmor %vm3757_vm13, %vm3758_vm2 }
0x1126   :  { %v3754_v37 = vsub.f32 1.0, %v3753_v44  ;;  %v3702_v49 = vmul.f32 %v4236_v58, %v3701_v52 }
0x1128   :  { %v3755_v24 = vmul.f32 %v4242_v34, %v3754_v37  ;;  %3703 = vst.msk [vmem:[#allocation2] sm:$0x1] %vm3678_vm9, %v3702_v49 }
0x112a   :  { %v3756_v50 = vadd.f32 %v4242_v34, %v3755_v24 }
0x112c   :  { %v3760_v54 = vsel %vm3759_vm14, %v4242_v34, %v3756_v50 }
0x112d   :  { %v3765_v55 = vsel %vm3762_vm15, %v3764_v51, %v3760_v54 }
0x112e   :  { %v3766_v56 = vmul.f32 %v4238_v40, %v3765_v55 }
0x1130   :  { %3767 = vst.msk [vmem:[#allocation2 + $0x1] sm:$0x1] %vm3678_vm9, %v3766_v56 }
0x1131   :  { %4266 = shalt.err (!%p4263_p4)
}
0x1132   :  { %3778 = dma.vmem_to_hbm [thread:$0]  %s3774_s20, 32, %s3776_s27, [#allocation3]  }
0x1133   :  { %4267 = dma.done.wait [#allocation3], 32  }
0x1134   :  { %4268 = vsyncadd [#allocation3], 4294967264 }
0x1135   :  { %3783 = vsyncpa [#allocation3], 1 }

</bundles_post_ra>
